<compile_context>
chip_gen: v7x
topology: tpu7x:2x2x1
jax: 0.10.0
libtpu: 0.0.40
codegen_flags: <defaults>
</compile_context>

<pallas_src>
import functools

import jax
import jax.numpy as jnp
import numpy as np
from jax import lax
from jax.experimental import pallas as pl
from jax.experimental.pallas import tpu as pltpu

EPS = 1e-5
LANE = 128
# bf16 MXU operands + bf16 inter-pass intermediates; all accumulation and BN
# statistics remain f32.
MXU_DTYPE = jnp.bfloat16


def _round_up(x, m):
    return (x + m - 1) // m * m


def _vmem_limit_bytes():
    """Per-generation VMEM budget (v5e/v6e: 128 MiB physical, v7x: 64 MiB)."""
    cap = 128 * 1024 * 1024
    try:
        cap = int(getattr(pltpu.get_tpu_info(), "vmem_capacity_bytes", cap))
    except Exception:
        pass
    return max(32 * 1024 * 1024, min((cap * 3) // 4, 100 * 1024 * 1024))


def _compiler_params():
    return pltpu.CompilerParams(
        dimension_semantics=("parallel",),     # images shard across TCs
        vmem_limit_bytes=_vmem_limit_bytes(),
    )


# ----------------------------------------------------------------------------
# Pass A: conv1 (3x3, stride) [+ 1x1 projection shortcut] + per-image BN stats
# ----------------------------------------------------------------------------
def _conv1_kernel(x_ref, *refs, H, W, Ho, Wo, stride, projection):
    if projection:
        (w1_ref, ws_ref, y1_ref, ys_ref, s1_ref, ss_ref,
         pad_ref, acc_ref) = refs
    else:
        (w1_ref, y1_ref, s1_ref, pad_ref, acc_ref) = refs
        ws_ref = ys_ref = ss_ref = None

    ci = x_ref.shape[-1]

    # In-kernel spatial halo: zero only the border each step (interior is
    # fully overwritten), then copy the resident x tile into the interior.
    zrow = jnp.zeros((1, W + 2, ci), jnp.float32)
    zcol = jnp.zeros((H + 2, 1, ci), jnp.float32)
    pad_ref[0:1, :, :] = zrow
    pad_ref[H + 1:H + 2, :, :] = zrow
    pad_ref[:, 0:1, :] = zcol
    pad_ref[:, W + 1:W + 2, :] = zcol
    pad_ref[1:H + 1, 1:W + 1, :] = x_ref[...].astype(jnp.float32)

    def tap(dy, dx):
        if stride == 1:
            sl = pad_ref[dy:dy + Ho, dx:dx + Wo, :]
        else:
            # TODO(synk): deinterleave W in glue for dense stride-2 taps.
            sl = pad_ref[pl.ds(dy, Ho, stride=stride),
                         pl.ds(dx, Wo, stride=stride), :]
        # The (Ho, Wo) merge is layout-preserving when Wo is a sublane
        # multiple.  TODO(synk): switch to a 3-D dot_general once Mosaic
        # supports two non-contracting lhs dims, removing the reshape.
        return sl.reshape(Ho * Wo, ci).astype(MXU_DTYPE)

    # conv1 = 9 shifted-slice MXU matmuls accumulated in an f32 VMEM scratch
    acc_ref[...] = jnp.dot(tap(0, 0), w1_ref[0],
                           preferred_element_type=jnp.float32)
    for k in range(1, 9):
        dy, dx = divmod(k, 3)
        acc_ref[...] += jnp.dot(tap(dy, dx), w1_ref[k],
                                preferred_element_type=jnp.float32)
    acc = acc_ref[...]
    y1_ref[...] = acc.astype(y1_ref.dtype)
    # per-image BN sufficient statistics: [sum, sum-of-squares] per channel
    s1_ref[0:1, :] = jnp.sum(acc, axis=0, keepdims=True)
    s1_ref[1:2, :] = jnp.sum(acc * acc, axis=0, keepdims=True)

    if projection:
        # 1x1 projection shortcut (same stride) reuses the resident x tile
        ys = jnp.dot(tap(1, 1), ws_ref[...],
                     preferred_element_type=jnp.float32)
        ys_ref[...] = ys.astype(ys_ref.dtype)
        ss_ref[0:1, :] = jnp.sum(ys, axis=0, keepdims=True)
        ss_ref[1:2, :] = jnp.sum(ys * ys, axis=0, keepdims=True)


# ----------------------------------------------------------------------------
# Pass B: BN1-affine + ReLU + conv2 (3x3, stride 1) + per-image BN2 stats
# ----------------------------------------------------------------------------
def _bn_relu_conv2_kernel(y1_ref, w2_ref, ab1_ref, y2_ref, s2_ref,
                          pad_ref, acc_ref, *, Ho, Wo):
    co = y1_ref.shape[-1]
    # BN1 folded to a per-channel affine; out1 never leaves VMEM
    out1 = jnp.maximum(
        y1_ref[...].astype(jnp.float32) * ab1_ref[0:1, :] + ab1_ref[1:2, :],
        0.0)

    # halo scratch for conv2's pad=1: zero only the border each step
    zrow = jnp.zeros((1, Wo + 2, co), jnp.float32)
    zcol = jnp.zeros((Ho + 2, 1, co), jnp.float32)
    pad_ref[0:1, :, :] = zrow
    pad_ref[Ho + 1:Ho + 2, :, :] = zrow
    pad_ref[:, 0:1, :] = zcol
    pad_ref[:, Wo + 1:Wo + 2, :] = zcol
    pad_ref[1:Ho + 1, 1:Wo + 1, :] = out1.reshape(Ho, Wo, co)

    def tap(dy, dx):
        return pad_ref[dy:dy + Ho, dx:dx + Wo, :].reshape(
            Ho * Wo, co).astype(MXU_DTYPE)

    acc_ref[...] = jnp.dot(tap(0, 0), w2_ref[0],
                           preferred_element_type=jnp.float32)
    for k in range(1, 9):
        dy, dx = divmod(k, 3)
        acc_ref[...] += jnp.dot(tap(dy, dx), w2_ref[k],
                                preferred_element_type=jnp.float32)
    acc = acc_ref[...]
    y2_ref[...] = acc.astype(y2_ref.dtype)
    s2_ref[0:1, :] = jnp.sum(acc, axis=0, keepdims=True)
    s2_ref[1:2, :] = jnp.sum(acc * acc, axis=0, keepdims=True)


# ----------------------------------------------------------------------------
# Pass C: BN2-affine + shortcut affine + residual add (elementwise, VPU only)
# ----------------------------------------------------------------------------
def _bn_add_kernel(y2_ref, ys_ref, ab_ref, o_ref):
    y2 = y2_ref[...].astype(jnp.float32)
    ys = ys_ref[...].astype(jnp.float32)
    o_ref[...] = (y2 * ab_ref[0:1, :] + ab_ref[1:2, :]
                  + ys * ab_ref[2:3, :] + ab_ref[3:4, :])


# ----------------------------------------------------------------------------
# Glue helpers (tiny per-channel / layout work only)
# ----------------------------------------------------------------------------
def _w3x3(w, cpi, cpo):
    cout, cin, kh, kw = w.shape
    m = jnp.transpose(w, (2, 3, 1, 0)).reshape(kh * kw, cin, cout)
    return jnp.pad(m, ((0, 0), (0, cpi - cin), (0, cpo - cout))).astype(MXU_DTYPE)


def _w1x1(w, cpi, cpo):
    cout, cin = w.shape[0], w.shape[1]
    m = jnp.transpose(w.reshape(cout, cin), (1, 0))
    return jnp.pad(m, ((0, cpi - cin), (0, cpo - cout))).astype(MXU_DTYPE)


def _bn_affine(stats, count, gamma, beta):
    """Fold batch-stat BN into per-channel scale/shift from per-image
    [sum, sum-of-squares] partials (exact global statistics, f32)."""
    s = jnp.sum(stats, axis=0)                      # (2, C)
    mean = s[0] / count
    var = jnp.maximum(s[1] / count - mean * mean, 0.0)
    scale = gamma * lax.rsqrt(var + EPS)
    shift = beta - mean * scale
    return scale, shift


# ----------------------------------------------------------------------------
# ResBlk forward
# ----------------------------------------------------------------------------
@functools.partial(jax.jit, static_argnames=("stride",))
def resblk_forward(x_nchw, params, stride=1):
    N, Cin, H, W = x_nchw.shape
    Cout = params["w1"].shape[0]
    # Matches the PyTorch module: the 1x1-conv+BN shortcut exists iff
    # ch_out != ch_in; otherwise the shortcut is a pure identity.
    projection = (Cin != Cout)
    if (not projection) and stride != 1:
        # The reference module is shape-inconsistent in this configuration
        # (identity shortcut cannot be added to a downsampled main path).
        raise NotImplementedError("ResBlk with ch_in == ch_out needs stride=1")

    Ho = (H + 2 - 3) // stride + 1
    Wo = (W + 2 - 3) // stride + 1
    M = N * Ho * Wo
    Cpi = _round_up(Cin, LANE)
    Cpo = _round_up(Cout, LANE)

    # Layout glue: NCHW -> NHWC + lane-pad channels to 128, in bf16.  Spatial
    # halo padding happens inside pass A, so x makes only this one trip.
    x = jnp.transpose(x_nchw, (0, 2, 3, 1))
    xl = jnp.pad(x, ((0, 0), (0, 0), (0, 0), (0, Cpi - Cin))).astype(MXU_DTYPE)

    w1m = _w3x3(params["w1"], Cpi, Cpo)
    w2m = _w3x3(params["w2"], Cpo, Cpo)

    def padc(v):
        return jnp.pad(v, (0, Cpo - Cout))

    # NOTE: conv biases (b1, b2, bs) are intentionally unused - a constant
    # per-channel bias is exactly cancelled by the batch-mean subtraction of
    # training-mode BatchNorm, so dropping them is a mathematical no-op.

    # ---- pass A ------------------------------------------------------------
    a_in_specs = [
        pl.BlockSpec((None, H, W, Cpi), lambda n: (n, 0, 0, 0)),
        pl.BlockSpec((9, Cpi, Cpo), lambda n: (0, 0, 0)),
    ]
    a_operands = [xl, w1m]
    a_out_shape = [
        jax.ShapeDtypeStruct((N, Ho * Wo, Cpo), MXU_DTYPE),     # y1 (pre-BN)
        jax.ShapeDtypeStruct((N, 2, Cpo), jnp.float32),         # stats y1
    ]
    a_out_specs = [
        pl.BlockSpec((None, Ho * Wo, Cpo), lambda n: (n, 0, 0)),
        pl.BlockSpec((None, 2, Cpo), lambda n: (n, 0, 0)),
    ]
    if projection:
        wsm = _w1x1(params["ws"], Cpi, Cpo)
        a_in_specs.append(pl.BlockSpec((Cpi, Cpo), lambda n: (0, 0)))
        a_operands.append(wsm)
        a_out_shape = [
            a_out_shape[0],
            jax.ShapeDtypeStruct((N, Ho * Wo, Cpo), MXU_DTYPE), # ys (pre-BN)
            a_out_shape[1],
            jax.ShapeDtypeStruct((N, 2, Cpo), jnp.float32),     # stats ys
        ]
        a_out_specs = [
            a_out_specs[0],
            pl.BlockSpec((None, Ho * Wo, Cpo), lambda n: (n, 0, 0)),
            a_out_specs[1],
            pl.BlockSpec((None, 2, Cpo), lambda n: (n, 0, 0)),
        ]

    fa = 2 * M * Cpi * Cpo * (9 + (1 if projection else 0))
    ba = ((xl.size + w1m.size + (Cpi * Cpo if projection else 0)
           + (2 if projection else 1) * M * Cpo) * 2
          + (2 if projection else 1) * N * 2 * Cpo * 4)
    res_a = pl.pallas_call(
        functools.partial(_conv1_kernel, H=H, W=W, Ho=Ho, Wo=Wo,
                          stride=stride, projection=projection),
        grid=(N,),
        in_specs=a_in_specs,
        out_shape=tuple(a_out_shape),
        out_specs=tuple(a_out_specs),
        scratch_shapes=[pltpu.VMEM((H + 2, W + 2, Cpi), jnp.float32),
                        pltpu.VMEM((Ho * Wo, Cpo), jnp.float32)],
        compiler_params=_compiler_params(),
        cost_estimate=pl.CostEstimate(flops=fa, transcendentals=0,
                                      bytes_accessed=ba),
    )(*a_operands)
    if projection:
        y1, ys, st1, sts = res_a
    else:
        y1, st1 = res_a

    # fold BN1 / shortcut-BN into per-channel affine (tiny glue)
    sc1, sh1 = _bn_affine(st1, M, padc(params["g1"]), padc(params["be1"]))
    ab1 = jnp.stack([sc1, sh1], axis=0)                         # (2, Cpo) f32
    if projection:
        scs, shs = _bn_affine(sts, M, padc(params["gs"]), padc(params["bes"]))
        shortcut = ys
    else:
        scs = jnp.ones((Cpo,), jnp.float32)
        shs = jnp.zeros((Cpo,), jnp.float32)
        shortcut = xl.reshape(N, H * W, Cpi)    # identity: stride==1 => Ho*Wo==H*W

    # ---- pass B ------------------------------------------------------------
    fb = 2 * M * Cpo * Cpo * 9
    bb = (y1.size + w2m.size + M * Cpo) * 2 + (2 * Cpo + N * 2 * Cpo) * 4
    y2, st2 = pl.pallas_call(
        functools.partial(_bn_relu_conv2_kernel, Ho=Ho, Wo=Wo),
        grid=(N,),
        in_specs=[
            pl.BlockSpec((None, Ho * Wo, Cpo), lambda n: (n, 0, 0)),
            pl.BlockSpec((9, Cpo, Cpo), lambda n: (0, 0, 0)),
            pl.BlockSpec((2, Cpo), lambda n: (0, 0)),
        ],
        out_shape=(
            jax.ShapeDtypeStruct((N, Ho * Wo, Cpo), MXU_DTYPE),  # y2 (pre-BN)
            jax.ShapeDtypeStruct((N, 2, Cpo), jnp.float32),      # stats y2
        ),
        out_specs=(
            pl.BlockSpec((None, Ho * Wo, Cpo), lambda n: (n, 0, 0)),
            pl.BlockSpec((None, 2, Cpo), lambda n: (n, 0, 0)),
        ),
        scratch_shapes=[pltpu.VMEM((Ho + 2, Wo + 2, Cpo), jnp.float32),
                        pltpu.VMEM((Ho * Wo, Cpo), jnp.float32)],
        compiler_params=_compiler_params(),
        cost_estimate=pl.CostEstimate(flops=fb, transcendentals=0,
                                      bytes_accessed=bb),
    )(y1, w2m, ab1)

    sc2, sh2 = _bn_affine(st2, M, padc(params["g2"]), padc(params["be2"]))
    abc = jnp.stack([sc2, sh2, scs, shs], axis=0)               # (4, Cpo) f32

    # ---- pass C ------------------------------------------------------------
    fc = 4 * M * Cpo
    bc = 2 * M * Cpo * 2 + 4 * Cpo * 4 + M * Cpo * 4
    out = pl.pallas_call(
        _bn_add_kernel,
        grid=(N,),
        in_specs=[
            pl.BlockSpec((None, Ho * Wo, Cpo), lambda n: (n, 0, 0)),
            pl.BlockSpec((None, Ho * Wo, Cpo), lambda n: (n, 0, 0)),
            pl.BlockSpec((4, Cpo), lambda n: (0, 0)),
        ],
        out_shape=jax.ShapeDtypeStruct((N, Ho * Wo, Cpo), jnp.float32),
        out_specs=pl.BlockSpec((None, Ho * Wo, Cpo), lambda n: (n, 0, 0)),
        compiler_params=_compiler_params(),
        cost_estimate=pl.CostEstimate(flops=fc, transcendentals=0,
                                      bytes_accessed=bc),
    )(y2, shortcut, abc)

    out = out.reshape(N, Ho, Wo, Cpo)[..., :Cout]               # crop lanes
    return jnp.transpose(out, (0, 3, 1, 2))                     # -> NCHW


# ----------------------------------------------------------------------------
# Pure-JAX f32 reference (PyTorch training-mode semantics, incl. conv biases)
# ----------------------------------------------------------------------------
def ref_forward(x, P, stride):
    def conv(x, w, b, s, p):
        y = lax.conv_general_dilated(
            x, w, (s, s), [(p, p), (p, p)],
            dimension_numbers=("NCHW", "OIHW", "NCHW"))
        return y + b[None, :, None, None]

    def bn(y, g, be):
        mu = jnp.mean(y, axis=(0, 2, 3), keepdims=True)
        var = jnp.mean((y - mu) ** 2, axis=(0, 2, 3), keepdims=True)
        return ((y - mu) * lax.rsqrt(var + EPS)
                * g[None, :, None, None] + be[None, :, None, None])

    out = jax.nn.relu(bn(conv(x, P["w1"], P["b1"], stride, 1), P["g1"], P["be1"]))
    out = bn(conv(out, P["w2"], P["b2"], 1, 1), P["g2"], P["be2"])
    if "ws" in P:
        sc = bn(conv(x, P["ws"], P["bs"], stride, 0), P["gs"], P["bes"])
    else:
        sc = x
    return sc + out


# ----------------------------------------------------------------------------
if __name__ == "__main__":
    def make_params(key, cin, cout):
        ks = jax.random.split(key, 12)
        p = {
            "w1": 0.1 * jax.random.normal(ks[0], (cout, cin, 3, 3), jnp.float32),
            "b1": 0.1 * jax.random.normal(ks[1], (cout,), jnp.float32),
            "g1": 1.0 + 0.1 * jax.random.normal(ks[2], (cout,), jnp.float32),
            "be1": 0.1 * jax.random.normal(ks[3], (cout,), jnp.float32),
            "w2": 0.1 * jax.random.normal(ks[4], (cout, cout, 3, 3), jnp.float32),
            "b2": 0.1 * jax.random.normal(ks[5], (cout,), jnp.float32),
            "g2": 1.0 + 0.1 * jax.random.normal(ks[6], (cout,), jnp.float32),
            "be2": 0.1 * jax.random.normal(ks[7], (cout,), jnp.float32),
        }
        if cin != cout:     # projection shortcut exists iff ch_out != ch_in
            p.update({
                "ws": 0.1 * jax.random.normal(ks[8], (cout, cin, 1, 1), jnp.float32),
                "bs": 0.1 * jax.random.normal(ks[9], (cout,), jnp.float32),
                "gs": 1.0 + 0.1 * jax.random.normal(ks[10], (cout,), jnp.float32),
                "bes": 0.1 * jax.random.normal(ks[11], (cout,), jnp.float32),
            })
        return p

    key = jax.random.PRNGKey(0)
    kp1, kp2, kx1, kx2 = jax.random.split(key, 4)
    # bf16 operands/intermediates vs. the f32 reference -> relaxed tolerance.
    RTOL, ATOL = 5e-2, 8e-2

    # case 1: projection shortcut (ch_in != ch_out), stride 1
    N, Cin, H, W, Cout = 2, 4, 16, 16, 8
    params = make_params(kp1, Cin, Cout)
    x = jax.random.normal(kx1, (N, Cin, H, W), jnp.float32)
    out = jax.block_until_ready(resblk_forward(x, params, stride=1))
    ref = jax.block_until_ready(ref_forward(x, params, 1))
    np.testing.assert_allclose(np.asarray(out), np.asarray(ref),
                               rtol=RTOL, atol=ATOL)

    # case 2: identity shortcut (ch_in == ch_out), stride 1
    params2 = make_params(kp2, Cout, Cout)
    x2 = jax.random.normal(kx2, (N, Cout, H, W), jnp.float32)
    out2 = jax.block_until_ready(resblk_forward(x2, params2, stride=1))
    ref2 = jax.block_until_ready(ref_forward(x2, params2, 1))
    np.testing.assert_allclose(np.asarray(out2), np.asarray(ref2),
                               rtol=RTOL, atol=ATOL)

    print("KERNEL_OK")
</pallas_src>

<mosaic_0001>
module attributes {stable_mosaic.version = 11 : i64} {
  func.func @_conv1_kernel(%arg0: i32, %arg1: memref<1x16x16x128xbf16, #tpu.memory_space<vmem>>, %arg2: memref<9x128x128xbf16, #tpu.memory_space<vmem>>, %arg3: memref<128x128xbf16, #tpu.memory_space<vmem>>, %arg4: memref<1x256x128xbf16, #tpu.memory_space<vmem>>, %arg5: memref<1x256x128xbf16, #tpu.memory_space<vmem>>, %arg6: memref<1x2x128xf32, #tpu.memory_space<vmem>>, %arg7: memref<1x2x128xf32, #tpu.memory_space<vmem>>, %arg8: memref<18x18x128xf32, #tpu.memory_space<vmem>>, %arg9: memref<256x128xf32, #tpu.memory_space<vmem>>) attributes {dimension_semantics = [#tpu.dimension_semantics<parallel>], iteration_bounds = array<i64: 2>, scalar_prefetch = 0 : i64, scratch_operands = 2 : i64, tpu.core_type = #tpu.core_type<tc>, window_params = [{transform_indices = @transform_0, window_bounds = array<i64: 1, 16, 16, 128>}, {pipeline_mode = #tpu.pipeline_mode<synchronous>, transform_indices = @transform_1, window_bounds = array<i64: 9, 128, 128>}, {pipeline_mode = #tpu.pipeline_mode<synchronous>, transform_indices = @transform_2, window_bounds = array<i64: 128, 128>}, {transform_indices = @transform_3, window_bounds = array<i64: 1, 256, 128>}, {transform_indices = @transform_4, window_bounds = array<i64: 1, 256, 128>}, {transform_indices = @transform_5, window_bounds = array<i64: 1, 2, 128>}, {transform_indices = @transform_6, window_bounds = array<i64: 1, 2, 128>}]} {
    %cst = arith.constant 0.000000e+00 : f32
    %0 = vector.broadcast %cst : f32 to vector<1x18x128xf32>
    %cst_0 = arith.constant 0.000000e+00 : f32
    %1 = vector.broadcast %cst_0 : f32 to vector<18x1x128xf32>
    %c0 = arith.constant 0 : index
    %c0_1 = arith.constant 0 : index
    %c0_2 = arith.constant 0 : index
    %2 = vector.load %arg8[%c0, %c0_1, %c0_2] : memref<18x18x128xf32, #tpu.memory_space<vmem>>, vector<1x18x128xf32>
    tpu.vector_store %arg8[%c0, %c0_1, %c0_2], %0 {strides = array<i32>} : memref<18x18x128xf32, #tpu.memory_space<vmem>>, vector<1x18x128xf32>,
    %c17 = arith.constant 17 : index
    %c0_3 = arith.constant 0 : index
    %c0_4 = arith.constant 0 : index
    %3 = vector.load %arg8[%c17, %c0_3, %c0_4] : memref<18x18x128xf32, #tpu.memory_space<vmem>>, vector<1x18x128xf32>
    tpu.vector_store %arg8[%c17, %c0_3, %c0_4], %0 {strides = array<i32>} : memref<18x18x128xf32, #tpu.memory_space<vmem>>, vector<1x18x128xf32>,
    %c0_5 = arith.constant 0 : index
    %c0_6 = arith.constant 0 : index
    %c0_7 = arith.constant 0 : index
    %4 = vector.load %arg8[%c0_5, %c0_6, %c0_7] : memref<18x18x128xf32, #tpu.memory_space<vmem>>, vector<18x1x128xf32>
    tpu.vector_store %arg8[%c0_5, %c0_6, %c0_7], %1 {strides = array<i32>} : memref<18x18x128xf32, #tpu.memory_space<vmem>>, vector<18x1x128xf32>,
    %c0_8 = arith.constant 0 : index
    %c17_9 = arith.constant 17 : index
    %c0_10 = arith.constant 0 : index
    %5 = vector.load %arg8[%c0_8, %c17_9, %c0_10] : memref<18x18x128xf32, #tpu.memory_space<vmem>>, vector<18x1x128xf32>
    tpu.vector_store %arg8[%c0_8, %c17_9, %c0_10], %1 {strides = array<i32>} : memref<18x18x128xf32, #tpu.memory_space<vmem>>, vector<18x1x128xf32>,
    %c0_11 = arith.constant 0 : index
    %c0_12 = arith.constant 0 : index
    %c0_13 = arith.constant 0 : index
    %c0_14 = arith.constant 0 : index
    %6 = vector.load %arg1[%c0_11, %c0_12, %c0_13, %c0_14] : memref<1x16x16x128xbf16, #tpu.memory_space<vmem>>, vector<1x16x16x128xbf16>
    %7 = vector.shape_cast %6 : vector<1x16x16x128xbf16> to vector<16x16x128xbf16>
    %8 = arith.extf %7 : vector<16x16x128xbf16> to vector<16x16x128xf32>
    %c1 = arith.constant 1 : index
    %c1_15 = arith.constant 1 : index
    %c0_16 = arith.constant 0 : index
    %9 = vector.load %arg8[%c1, %c1_15, %c0_16] : memref<18x18x128xf32, #tpu.memory_space<vmem>>, vector<16x16x128xf32>
    tpu.vector_store %arg8[%c1, %c1_15, %c0_16], %8 {strides = array<i32>} : memref<18x18x128xf32, #tpu.memory_space<vmem>>, vector<16x16x128xf32>,
    %c0_17 = arith.constant 0 : index
    %c0_18 = arith.constant 0 : index
    %c0_19 = arith.constant 0 : index
    %10 = vector.load %arg8[%c0_17, %c0_18, %c0_19] : memref<18x18x128xf32, #tpu.memory_space<vmem>>, vector<16x16x128xf32>
    %11 = vector.shape_cast %10 : vector<16x16x128xf32> to vector<256x128xf32>
    %12 = arith.truncf %11 : vector<256x128xf32> to vector<256x128xbf16>
    %c0_20 = arith.constant 0 : index
    %c0_21 = arith.constant 0 : index
    %c0_22 = arith.constant 0 : index
    %13 = vector.load %arg2[%c0_20, %c0_21, %c0_22] : memref<9x128x128xbf16, #tpu.memory_space<vmem>>, vector<1x128x128xbf16>
    %14 = vector.shape_cast %13 : vector<1x128x128xbf16> to vector<128x128xbf16>
    %cst_23 = arith.constant dense<0.000000e+00> : vector<256x128xf32>
    %15 = tpu.matmul %12, %14, %cst_23 {dimension_numbers = #tpu.dot_dimension_numbers<[1], [0], [0], [1], [0, 0, 1, 1], [], []>} : vector<256x128xbf16>, vector<128x128xbf16>, vector<256x128xf32> -> vector<256x128xf32>
    %c0_24 = arith.constant 0 : index
    %c0_25 = arith.constant 0 : index
    %16 = vector.load %arg9[%c0_24, %c0_25] : memref<256x128xf32, #tpu.memory_space<vmem>>, vector<256x128xf32>
    tpu.vector_store %arg9[%c0_24, %c0_25], %15 {strides = array<i32>} : memref<256x128xf32, #tpu.memory_space<vmem>>, vector<256x128xf32>,
    %c0_26 = arith.constant 0 : index
    %c0_27 = arith.constant 0 : index
    %17 = vector.load %arg9[%c0_26, %c0_27] : memref<256x128xf32, #tpu.memory_space<vmem>>, vector<256x128xf32>
    %c0_28 = arith.constant 0 : index
    %c1_29 = arith.constant 1 : index
    %c0_30 = arith.constant 0 : index
    %18 = vector.load %arg8[%c0_28, %c1_29, %c0_30] : memref<18x18x128xf32, #tpu.memory_space<vmem>>, vector<16x16x128xf32>
    %19 = vector.shape_cast %18 : vector<16x16x128xf32> to vector<256x128xf32>
    %20 = arith.truncf %19 : vector<256x128xf32> to vector<256x128xbf16>
    %c1_31 = arith.constant 1 : index
    %c0_32 = arith.constant 0 : index
    %c0_33 = arith.constant 0 : index
    %21 = vector.load %arg2[%c1_31, %c0_32, %c0_33] : memref<9x128x128xbf16, #tpu.memory_space<vmem>>, vector<1x128x128xbf16>
    %22 = vector.shape_cast %21 : vector<1x128x128xbf16> to vector<128x128xbf16>
    %cst_34 = arith.constant dense<0.000000e+00> : vector<256x128xf32>
    %23 = tpu.matmul %20, %22, %cst_34 {dimension_numbers = #tpu.dot_dimension_numbers<[1], [0], [0], [1], [0, 0, 1, 1], [], []>} : vector<256x128xbf16>, vector<128x128xbf16>, vector<256x128xf32> -> vector<256x128xf32>
    %24 = arith.addf %17, %23 : vector<256x128xf32>
    %c0_35 = arith.constant 0 : index
    %c0_36 = arith.constant 0 : index
    %25 = vector.load %arg9[%c0_35, %c0_36] : memref<256x128xf32, #tpu.memory_space<vmem>>, vector<256x128xf32>
    tpu.vector_store %arg9[%c0_35, %c0_36], %24 {strides = array<i32>} : memref<256x128xf32, #tpu.memory_space<vmem>>, vector<256x128xf32>,
    %c0_37 = arith.constant 0 : index
    %c0_38 = arith.constant 0 : index
    %26 = vector.load %arg9[%c0_37, %c0_38] : memref<256x128xf32, #tpu.memory_space<vmem>>, vector<256x128xf32>
    %c0_39 = arith.constant 0 : index
    %c2 = arith.constant 2 : index
    %c0_40 = arith.constant 0 : index
    %27 = vector.load %arg8[%c0_39, %c2, %c0_40] : memref<18x18x128xf32, #tpu.memory_space<vmem>>, vector<16x16x128xf32>
    %28 = vector.shape_cast %27 : vector<16x16x128xf32> to vector<256x128xf32>
    %29 = arith.truncf %28 : vector<256x128xf32> to vector<256x128xbf16>
    %c2_41 = arith.constant 2 : index
    %c0_42 = arith.constant 0 : index
    %c0_43 = arith.constant 0 : index
    %30 = vector.load %arg2[%c2_41, %c0_42, %c0_43] : memref<9x128x128xbf16, #tpu.memory_space<vmem>>, vector<1x128x128xbf16>
    %31 = vector.shape_cast %30 : vector<1x128x128xbf16> to vector<128x128xbf16>
    %cst_44 = arith.constant dense<0.000000e+00> : vector<256x128xf32>
    %32 = tpu.matmul %29, %31, %cst_44 {dimension_numbers = #tpu.dot_dimension_numbers<[1], [0], [0], [1], [0, 0, 1, 1], [], []>} : vector<256x128xbf16>, vector<128x128xbf16>, vector<256x128xf32> -> vector<256x128xf32>
    %33 = arith.addf %26, %32 : vector<256x128xf32>
    %c0_45 = arith.constant 0 : index
    %c0_46 = arith.constant 0 : index
    %34 = vector.load %arg9[%c0_45, %c0_46] : memref<256x128xf32, #tpu.memory_space<vmem>>, vector<256x128xf32>
    tpu.vector_store %arg9[%c0_45, %c0_46], %33 {strides = array<i32>} : memref<256x128xf32, #tpu.memory_space<vmem>>, vector<256x128xf32>,
    %c0_47 = arith.constant 0 : index
    %c0_48 = arith.constant 0 : index
    %35 = vector.load %arg9[%c0_47, %c0_48] : memref<256x128xf32, #tpu.memory_space<vmem>>, vector<256x128xf32>
    %c1_49 = arith.constant 1 : index
    %c0_50 = arith.constant 0 : index
    %c0_51 = arith.constant 0 : index
    %36 = vector.load %arg8[%c1_49, %c0_50, %c0_51] : memref<18x18x128xf32, #tpu.memory_space<vmem>>, vector<16x16x128xf32>
    %37 = vector.shape_cast %36 : vector<16x16x128xf32> to vector<256x128xf32>
    %38 = arith.truncf %37 : vector<256x128xf32> to vector<256x128xbf16>
    %c3 = arith.constant 3 : index
    %c0_52 = arith.constant 0 : index
    %c0_53 = arith.constant 0 : index
    %39 = vector.load %arg2[%c3, %c0_52, %c0_53] : memref<9x128x128xbf16, #tpu.memory_space<vmem>>, vector<1x128x128xbf16>
    %40 = vector.shape_cast %39 : vector<1x128x128xbf16> to vector<128x128xbf16>
    %cst_54 = arith.constant dense<0.000000e+00> : vector<256x128xf32>
    %41 = tpu.matmul %38, %40, %cst_54 {dimension_numbers = #tpu.dot_dimension_numbers<[1], [0], [0], [1], [0, 0, 1, 1], [], []>} : vector<256x128xbf16>, vector<128x128xbf16>, vector<256x128xf32> -> vector<256x128xf32>
    %42 = arith.addf %35, %41 : vector<256x128xf32>
    %c0_55 = arith.constant 0 : index
    %c0_56 = arith.constant 0 : index
    %43 = vector.load %arg9[%c0_55, %c0_56] : memref<256x128xf32, #tpu.memory_space<vmem>>, vector<256x128xf32>
    tpu.vector_store %arg9[%c0_55, %c0_56], %42 {strides = array<i32>} : memref<256x128xf32, #tpu.memory_space<vmem>>, vector<256x128xf32>,
    %c0_57 = arith.constant 0 : index
    %c0_58 = arith.constant 0 : index
    %44 = vector.load %arg9[%c0_57, %c0_58] : memref<256x128xf32, #tpu.memory_space<vmem>>, vector<256x128xf32>
    %c1_59 = arith.constant 1 : index
    %c1_60 = arith.constant 1 : index
    %c0_61 = arith.constant 0 : index
    %45 = vector.load %arg8[%c1_59, %c1_60, %c0_61] : memref<18x18x128xf32, #tpu.memory_space<vmem>>, vector<16x16x128xf32>
    %46 = vector.shape_cast %45 : vector<16x16x128xf32> to vector<256x128xf32>
    %47 = arith.truncf %46 : vector<256x128xf32> to vector<256x128xbf16>
    %c4 = arith.constant 4 : index
    %c0_62 = arith.constant 0 : index
    %c0_63 = arith.constant 0 : index
    %48 = vector.load %arg2[%c4, %c0_62, %c0_63] : memref<9x128x128xbf16, #tpu.memory_space<vmem>>, vector<1x128x128xbf16>
    %49 = vector.shape_cast %48 : vector<1x128x128xbf16> to vector<128x128xbf16>
    %cst_64 = arith.constant dense<0.000000e+00> : vector<256x128xf32>
    %50 = tpu.matmul %47, %49, %cst_64 {dimension_numbers = #tpu.dot_dimension_numbers<[1], [0], [0], [1], [0, 0, 1, 1], [], []>} : vector<256x128xbf16>, vector<128x128xbf16>, vector<256x128xf32> -> vector<256x128xf32>
    %51 = arith.addf %44, %50 : vector<256x128xf32>
    %c0_65 = arith.constant 0 : index
    %c0_66 = arith.constant 0 : index
    %52 = vector.load %arg9[%c0_65, %c0_66] : memref<256x128xf32, #tpu.memory_space<vmem>>, vector<256x128xf32>
    tpu.vector_store %arg9[%c0_65, %c0_66], %51 {strides = array<i32>} : memref<256x128xf32, #tpu.memory_space<vmem>>, vector<256x128xf32>,
    %c0_67 = arith.constant 0 : index
    %c0_68 = arith.constant 0 : index
    %53 = vector.load %arg9[%c0_67, %c0_68] : memref<256x128xf32, #tpu.memory_space<vmem>>, vector<256x128xf32>
    %c1_69 = arith.constant 1 : index
    %c2_70 = arith.constant 2 : index
    %c0_71 = arith.constant 0 : index
    %54 = vector.load %arg8[%c1_69, %c2_70, %c0_71] : memref<18x18x128xf32, #tpu.memory_space<vmem>>, vector<16x16x128xf32>
    %55 = vector.shape_cast %54 : vector<16x16x128xf32> to vector<256x128xf32>
    %56 = arith.truncf %55 : vector<256x128xf32> to vector<256x128xbf16>
    %c5 = arith.constant 5 : index
    %c0_72 = arith.constant 0 : index
    %c0_73 = arith.constant 0 : index
    %57 = vector.load %arg2[%c5, %c0_72, %c0_73] : memref<9x128x128xbf16, #tpu.memory_space<vmem>>, vector<1x128x128xbf16>
    %58 = vector.shape_cast %57 : vector<1x128x128xbf16> to vector<128x128xbf16>
    %cst_74 = arith.constant dense<0.000000e+00> : vector<256x128xf32>
    %59 = tpu.matmul %56, %58, %cst_74 {dimension_numbers = #tpu.dot_dimension_numbers<[1], [0], [0], [1], [0, 0, 1, 1], [], []>} : vector<256x128xbf16>, vector<128x128xbf16>, vector<256x128xf32> -> vector<256x128xf32>
    %60 = arith.addf %53, %59 : vector<256x128xf32>
    %c0_75 = arith.constant 0 : index
    %c0_76 = arith.constant 0 : index
    %61 = vector.load %arg9[%c0_75, %c0_76] : memref<256x128xf32, #tpu.memory_space<vmem>>, vector<256x128xf32>
    tpu.vector_store %arg9[%c0_75, %c0_76], %60 {strides = array<i32>} : memref<256x128xf32, #tpu.memory_space<vmem>>, vector<256x128xf32>,
    %c0_77 = arith.constant 0 : index
    %c0_78 = arith.constant 0 : index
    %62 = vector.load %arg9[%c0_77, %c0_78] : memref<256x128xf32, #tpu.memory_space<vmem>>, vector<256x128xf32>
    %c2_79 = arith.constant 2 : index
    %c0_80 = arith.constant 0 : index
    %c0_81 = arith.constant 0 : index
    %63 = vector.load %arg8[%c2_79, %c0_80, %c0_81] : memref<18x18x128xf32, #tpu.memory_space<vmem>>, vector<16x16x128xf32>
    %64 = vector.shape_cast %63 : vector<16x16x128xf32> to vector<256x128xf32>
    %65 = arith.truncf %64 : vector<256x128xf32> to vector<256x128xbf16>
    %c6 = arith.constant 6 : index
    %c0_82 = arith.constant 0 : index
    %c0_83 = arith.constant 0 : index
    %66 = vector.load %arg2[%c6, %c0_82, %c0_83] : memref<9x128x128xbf16, #tpu.memory_space<vmem>>, vector<1x128x128xbf16>
    %67 = vector.shape_cast %66 : vector<1x128x128xbf16> to vector<128x128xbf16>
    %cst_84 = arith.constant dense<0.000000e+00> : vector<256x128xf32>
    %68 = tpu.matmul %65, %67, %cst_84 {dimension_numbers = #tpu.dot_dimension_numbers<[1], [0], [0], [1], [0, 0, 1, 1], [], []>} : vector<256x128xbf16>, vector<128x128xbf16>, vector<256x128xf32> -> vector<256x128xf32>
    %69 = arith.addf %62, %68 : vector<256x128xf32>
    %c0_85 = arith.constant 0 : index
    %c0_86 = arith.constant 0 : index
    %70 = vector.load %arg9[%c0_85, %c0_86] : memref<256x128xf32, #tpu.memory_space<vmem>>, vector<256x128xf32>
    tpu.vector_store %arg9[%c0_85, %c0_86], %69 {strides = array<i32>} : memref<256x128xf32, #tpu.memory_space<vmem>>, vector<256x128xf32>,
    %c0_87 = arith.constant 0 : index
    %c0_88 = arith.constant 0 : index
    %71 = vector.load %arg9[%c0_87, %c0_88] : memref<256x128xf32, #tpu.memory_space<vmem>>, vector<256x128xf32>
    %c2_89 = arith.constant 2 : index
    %c1_90 = arith.constant 1 : index
    %c0_91 = arith.constant 0 : index
    %72 = vector.load %arg8[%c2_89, %c1_90, %c0_91] : memref<18x18x128xf32, #tpu.memory_space<vmem>>, vector<16x16x128xf32>
    %73 = vector.shape_cast %72 : vector<16x16x128xf32> to vector<256x128xf32>
    %74 = arith.truncf %73 : vector<256x128xf32> to vector<256x128xbf16>
    %c7 = arith.constant 7 : index
    %c0_92 = arith.constant 0 : index
    %c0_93 = arith.constant 0 : index
    %75 = vector.load %arg2[%c7, %c0_92, %c0_93] : memref<9x128x128xbf16, #tpu.memory_space<vmem>>, vector<1x128x128xbf16>
    %76 = vector.shape_cast %75 : vector<1x128x128xbf16> to vector<128x128xbf16>
    %cst_94 = arith.constant dense<0.000000e+00> : vector<256x128xf32>
    %77 = tpu.matmul %74, %76, %cst_94 {dimension_numbers = #tpu.dot_dimension_numbers<[1], [0], [0], [1], [0, 0, 1, 1], [], []>} : vector<256x128xbf16>, vector<128x128xbf16>, vector<256x128xf32> -> vector<256x128xf32>
    %78 = arith.addf %71, %77 : vector<256x128xf32>
    %c0_95 = arith.constant 0 : index
    %c0_96 = arith.constant 0 : index
    %79 = vector.load %arg9[%c0_95, %c0_96] : memref<256x128xf32, #tpu.memory_space<vmem>>, vector<256x128xf32>
    tpu.vector_store %arg9[%c0_95, %c0_96], %78 {strides = array<i32>} : memref<256x128xf32, #tpu.memory_space<vmem>>, vector<256x128xf32>,
    %c0_97 = arith.constant 0 : index
    %c0_98 = arith.constant 0 : index
    %80 = vector.load %arg9[%c0_97, %c0_98] : memref<256x128xf32, #tpu.memory_space<vmem>>, vector<256x128xf32>
    %c2_99 = arith.constant 2 : index
    %c2_100 = arith.constant 2 : index
    %c0_101 = arith.constant 0 : index
    %81 = vector.load %arg8[%c2_99, %c2_100, %c0_101] : memref<18x18x128xf32, #tpu.memory_space<vmem>>, vector<16x16x128xf32>
    %82 = vector.shape_cast %81 : vector<16x16x128xf32> to vector<256x128xf32>
    %83 = arith.truncf %82 : vector<256x128xf32> to vector<256x128xbf16>
    %c8 = arith.constant 8 : index
    %c0_102 = arith.constant 0 : index
    %c0_103 = arith.constant 0 : index
    %84 = vector.load %arg2[%c8, %c0_102, %c0_103] : memref<9x128x128xbf16, #tpu.memory_space<vmem>>, vector<1x128x128xbf16>
    %85 = vector.shape_cast %84 : vector<1x128x128xbf16> to vector<128x128xbf16>
    %cst_104 = arith.constant dense<0.000000e+00> : vector<256x128xf32>
    %86 = tpu.matmul %83, %85, %cst_104 {dimension_numbers = #tpu.dot_dimension_numbers<[1], [0], [0], [1], [0, 0, 1, 1], [], []>} : vector<256x128xbf16>, vector<128x128xbf16>, vector<256x128xf32> -> vector<256x128xf32>
    %87 = arith.addf %80, %86 : vector<256x128xf32>
    %c0_105 = arith.constant 0 : index
    %c0_106 = arith.constant 0 : index
    %88 = vector.load %arg9[%c0_105, %c0_106] : memref<256x128xf32, #tpu.memory_space<vmem>>, vector<256x128xf32>
    tpu.vector_store %arg9[%c0_105, %c0_106], %87 {strides = array<i32>} : memref<256x128xf32, #tpu.memory_space<vmem>>, vector<256x128xf32>,
    %c0_107 = arith.constant 0 : index
    %c0_108 = arith.constant 0 : index
    %89 = vector.load %arg9[%c0_107, %c0_108] : memref<256x128xf32, #tpu.memory_space<vmem>>, vector<256x128xf32>
    %90 = arith.truncf %89 : vector<256x128xf32> to vector<256x128xbf16>
    %c0_109 = arith.constant 0 : index
    %c0_110 = arith.constant 0 : index
    %c0_111 = arith.constant 0 : index
    %91 = vector.load %arg4[%c0_109, %c0_110, %c0_111] : memref<1x256x128xbf16, #tpu.memory_space<vmem>>, vector<1x256x128xbf16>
    %92 = vector.shape_cast %91 : vector<1x256x128xbf16> to vector<256x128xbf16>
    %93 = vector.shape_cast %90 : vector<256x128xbf16> to vector<1x256x128xbf16>
    tpu.vector_store %arg4[%c0_109, %c0_110, %c0_111], %93 {strides = array<i32>} : memref<1x256x128xbf16, #tpu.memory_space<vmem>>, vector<1x256x128xbf16>,
    %cst_112 = arith.constant dense<0.000000e+00> : vector<128xf32>
    %94 = vector.multi_reduction <add>, %89, %cst_112 [0] : vector<256x128xf32> to vector<128xf32>
    %95 = vector.shape_cast %94 : vector<128xf32> to vector<1x128xf32>
    %c0_113 = arith.constant 0 : index
    %c0_114 = arith.constant 0 : index
    %c0_115 = arith.constant 0 : index
    %96 = vector.load %arg6[%c0_113, %c0_114, %c0_115] : memref<1x2x128xf32, #tpu.memory_space<vmem>>, vector<1x1x128xf32>
    %97 = vector.shape_cast %96 : vector<1x1x128xf32> to vector<1x128xf32>
    %98 = vector.shape_cast %95 : vector<1x128xf32> to vector<1x1x128xf32>
    tpu.vector_store %arg6[%c0_113, %c0_114, %c0_115], %98 {strides = array<i32>} : memref<1x2x128xf32, #tpu.memory_space<vmem>>, vector<1x1x128xf32>,
    %99 = arith.mulf %89, %89 : vector<256x128xf32>
    %cst_116 = arith.constant dense<0.000000e+00> : vector<128xf32>
    %100 = vector.multi_reduction <add>, %99, %cst_116 [0] : vector<256x128xf32> to vector<128xf32>
    %101 = vector.shape_cast %100 : vector<128xf32> to vector<1x128xf32>
    %c0_117 = arith.constant 0 : index
    %c1_118 = arith.constant 1 : index
    %c0_119 = arith.constant 0 : index
    %102 = vector.load %arg6[%c0_117, %c1_118, %c0_119] : memref<1x2x128xf32, #tpu.memory_space<vmem>>, vector<1x1x128xf32>
    %103 = vector.shape_cast %102 : vector<1x1x128xf32> to vector<1x128xf32>
    %104 = vector.shape_cast %101 : vector<1x128xf32> to vector<1x1x128xf32>
    tpu.vector_store %arg6[%c0_117, %c1_118, %c0_119], %104 {strides = array<i32>} : memref<1x2x128xf32, #tpu.memory_space<vmem>>, vector<1x1x128xf32>,
    %c1_120 = arith.constant 1 : index
    %c1_121 = arith.constant 1 : index
    %c0_122 = arith.constant 0 : index
    %105 = vector.load %arg8[%c1_120, %c1_121, %c0_122] : memref<18x18x128xf32, #tpu.memory_space<vmem>>, vector<16x16x128xf32>
    %106 = vector.shape_cast %105 : vector<16x16x128xf32> to vector<256x128xf32>
    %107 = arith.truncf %106 : vector<256x128xf32> to vector<256x128xbf16>
    %c0_123 = arith.constant 0 : index
    %c0_124 = arith.constant 0 : index
    %108 = vector.load %arg3[%c0_123, %c0_124] : memref<128x128xbf16, #tpu.memory_space<vmem>>, vector<128x128xbf16>
    %cst_125 = arith.constant dense<0.000000e+00> : vector<256x128xf32>
    %109 = tpu.matmul %107, %108, %cst_125 {dimension_numbers = #tpu.dot_dimension_numbers<[1], [0], [0], [1], [0, 0, 1, 1], [], []>} : vector<256x128xbf16>, vector<128x128xbf16>, vector<256x128xf32> -> vector<256x128xf32>
    %110 = arith.truncf %109 : vector<256x128xf32> to vector<256x128xbf16>
    %c0_126 = arith.constant 0 : index
    %c0_127 = arith.constant 0 : index
    %c0_128 = arith.constant 0 : index
    %111 = vector.load %arg5[%c0_126, %c0_127, %c0_128] : memref<1x256x128xbf16, #tpu.memory_space<vmem>>, vector<1x256x128xbf16>
    %112 = vector.shape_cast %111 : vector<1x256x128xbf16> to vector<256x128xbf16>
    %113 = vector.shape_cast %110 : vector<256x128xbf16> to vector<1x256x128xbf16>
    tpu.vector_store %arg5[%c0_126, %c0_127, %c0_128], %113 {strides = array<i32>} : memref<1x256x128xbf16, #tpu.memory_space<vmem>>, vector<1x256x128xbf16>,
    %cst_129 = arith.constant dense<0.000000e+00> : vector<128xf32>
    %114 = vector.multi_reduction <add>, %109, %cst_129 [0] : vector<256x128xf32> to vector<128xf32>
    %115 = vector.shape_cast %114 : vector<128xf32> to vector<1x128xf32>
    %c0_130 = arith.constant 0 : index
    %c0_131 = arith.constant 0 : index
    %c0_132 = arith.constant 0 : index
    %116 = vector.load %arg7[%c0_130, %c0_131, %c0_132] : memref<1x2x128xf32, #tpu.memory_space<vmem>>, vector<1x1x128xf32>
    %117 = vector.shape_cast %116 : vector<1x1x128xf32> to vector<1x128xf32>
    %118 = vector.shape_cast %115 : vector<1x128xf32> to vector<1x1x128xf32>
    tpu.vector_store %arg7[%c0_130, %c0_131, %c0_132], %118 {strides = array<i32>} : memref<1x2x128xf32, #tpu.memory_space<vmem>>, vector<1x1x128xf32>,
    %119 = arith.mulf %109, %109 : vector<256x128xf32>
    %cst_133 = arith.constant dense<0.000000e+00> : vector<128xf32>
    %120 = vector.multi_reduction <add>, %119, %cst_133 [0] : vector<256x128xf32> to vector<128xf32>
    %121 = vector.shape_cast %120 : vector<128xf32> to vector<1x128xf32>
    %c0_134 = arith.constant 0 : index
    %c1_135 = arith.constant 1 : index
    %c0_136 = arith.constant 0 : index
    %122 = vector.load %arg7[%c0_134, %c1_135, %c0_136] : memref<1x2x128xf32, #tpu.memory_space<vmem>>, vector<1x1x128xf32>
    %123 = vector.shape_cast %122 : vector<1x1x128xf32> to vector<1x128xf32>
    %124 = vector.shape_cast %121 : vector<1x128xf32> to vector<1x1x128xf32>
    tpu.vector_store %arg7[%c0_134, %c1_135, %c0_136], %124 {strides = array<i32>} : memref<1x2x128xf32, #tpu.memory_space<vmem>>, vector<1x1x128xf32>,
    return
  }
  func.func @transform_0(%arg0: i32) -> (i32, i32, i32, i32) {
    %c0_i32 = arith.constant 0 : i32
    %c0_i32_0 = arith.constant 0 : i32
    %c0_i32_1 = arith.constant 0 : i32
    %c0_i32_2 = arith.constant 0 : i32
    return %arg0, %c0_i32, %c0_i32_0, %c0_i32_1 : i32, i32, i32, i32
  }
  func.func @transform_1(%arg0: i32) -> (i32, i32, i32) {
    %c0_i32 = arith.constant 0 : i32
    %c0_i32_0 = arith.constant 0 : i32
    %c0_i32_1 = arith.constant 0 : i32
    %c0_i32_2 = arith.constant 0 : i32
    return %c0_i32, %c0_i32_0, %c0_i32_1 : i32, i32, i32
  }
  func.func @transform_2(%arg0: i32) -> (i32, i32) {
    %c0_i32 = arith.constant 0 : i32
    %c0_i32_0 = arith.constant 0 : i32
    %c0_i32_1 = arith.constant 0 : i32
    return %c0_i32, %c0_i32_0 : i32, i32
  }
  func.func @transform_3(%arg0: i32) -> (i32, i32, i32) {
    %c0_i32 = arith.constant 0 : i32
    %c0_i32_0 = arith.constant 0 : i32
    %c0_i32_1 = arith.constant 0 : i32
    return %arg0, %c0_i32, %c0_i32_0 : i32, i32, i32
  }
  func.func @transform_4(%arg0: i32) -> (i32, i32, i32) {
    %c0_i32 = arith.constant 0 : i32
    %c0_i32_0 = arith.constant 0 : i32
    %c0_i32_1 = arith.constant 0 : i32
    return %arg0, %c0_i32, %c0_i32_0 : i32, i32, i32
  }
  func.func @transform_5(%arg0: i32) -> (i32, i32, i32) {
    %c0_i32 = arith.constant 0 : i32
    %c0_i32_0 = arith.constant 0 : i32
    %c0_i32_1 = arith.constant 0 : i32
    return %arg0, %c0_i32, %c0_i32_0 : i32, i32, i32
  }
  func.func @transform_6(%arg0: i32) -> (i32, i32, i32) {
    %c0_i32 = arith.constant 0 : i32
    %c0_i32_0 = arith.constant 0 : i32
    %c0_i32_1 = arith.constant 0 : i32
    return %arg0, %c0_i32, %c0_i32_0 : i32, i32, i32
  }
}

module attributes {stable_mosaic.version = 11 : i64} {
  func.func @_bn_relu_conv2_kernel(%arg0: i32, %arg1: memref<1x256x128xbf16, #tpu.memory_space<vmem>>, %arg2: memref<9x128x128xbf16, #tpu.memory_space<vmem>>, %arg3: memref<2x128xf32, #tpu.memory_space<vmem>>, %arg4: memref<1x256x128xbf16, #tpu.memory_space<vmem>>, %arg5: memref<1x2x128xf32, #tpu.memory_space<vmem>>, %arg6: memref<18x18x128xf32, #tpu.memory_space<vmem>>, %arg7: memref<256x128xf32, #tpu.memory_space<vmem>>) attributes {dimension_semantics = [#tpu.dimension_semantics<parallel>], iteration_bounds = array<i64: 2>, scalar_prefetch = 0 : i64, scratch_operands = 2 : i64, tpu.core_type = #tpu.core_type<tc>, window_params = [{transform_indices = @transform_0, window_bounds = array<i64: 1, 256, 128>}, {pipeline_mode = #tpu.pipeline_mode<synchronous>, transform_indices = @transform_1, window_bounds = array<i64: 9, 128, 128>}, {pipeline_mode = #tpu.pipeline_mode<synchronous>, transform_indices = @transform_2, window_bounds = array<i64: 2, 128>}, {transform_indices = @transform_3, window_bounds = array<i64: 1, 256, 128>}, {transform_indices = @transform_4, window_bounds = array<i64: 1, 2, 128>}]} {
    %c0 = arith.constant 0 : index
    %c0_0 = arith.constant 0 : index
    %c0_1 = arith.constant 0 : index
    %0 = vector.load %arg1[%c0, %c0_0, %c0_1] : memref<1x256x128xbf16, #tpu.memory_space<vmem>>, vector<1x256x128xbf16>
    %1 = vector.shape_cast %0 : vector<1x256x128xbf16> to vector<256x128xbf16>
    %2 = arith.extf %1 : vector<256x128xbf16> to vector<256x128xf32>
    %c0_2 = arith.constant 0 : index
    %c0_3 = arith.constant 0 : index
    %3 = vector.load %arg3[%c0_2, %c0_3] : memref<2x128xf32, #tpu.memory_space<vmem>>, vector<1x128xf32>
    %4 = vector.broadcast %3 : vector<1x128xf32> to vector<256x128xf32>
    %5 = arith.mulf %2, %4 : vector<256x128xf32>
    %c1 = arith.constant 1 : index
    %c0_4 = arith.constant 0 : index
    %6 = vector.load %arg3[%c1, %c0_4] : memref<2x128xf32, #tpu.memory_space<vmem>>, vector<1x128xf32>
    %7 = vector.broadcast %6 : vector<1x128xf32> to vector<256x128xf32>
    %8 = arith.addf %5, %7 : vector<256x128xf32>
    %cst = arith.constant 0.000000e+00 : f32
    %9 = vector.broadcast %cst : f32 to vector<256x128xf32>
    %10 = arith.maximumf %8, %9 : vector<256x128xf32>
    %cst_5 = arith.constant 0.000000e+00 : f32
    %11 = vector.broadcast %cst_5 : f32 to vector<1x18x128xf32>
    %cst_6 = arith.constant 0.000000e+00 : f32
    %12 = vector.broadcast %cst_6 : f32 to vector<18x1x128xf32>
    %c0_7 = arith.constant 0 : index
    %c0_8 = arith.constant 0 : index
    %c0_9 = arith.constant 0 : index
    %13 = vector.load %arg6[%c0_7, %c0_8, %c0_9] : memref<18x18x128xf32, #tpu.memory_space<vmem>>, vector<1x18x128xf32>
    tpu.vector_store %arg6[%c0_7, %c0_8, %c0_9], %11 {strides = array<i32>} : memref<18x18x128xf32, #tpu.memory_space<vmem>>, vector<1x18x128xf32>,
    %c17 = arith.constant 17 : index
    %c0_10 = arith.constant 0 : index
    %c0_11 = arith.constant 0 : index
    %14 = vector.load %arg6[%c17, %c0_10, %c0_11] : memref<18x18x128xf32, #tpu.memory_space<vmem>>, vector<1x18x128xf32>
    tpu.vector_store %arg6[%c17, %c0_10, %c0_11], %11 {strides = array<i32>} : memref<18x18x128xf32, #tpu.memory_space<vmem>>, vector<1x18x128xf32>,
    %c0_12 = arith.constant 0 : index
    %c0_13 = arith.constant 0 : index
    %c0_14 = arith.constant 0 : index
    %15 = vector.load %arg6[%c0_12, %c0_13, %c0_14] : memref<18x18x128xf32, #tpu.memory_space<vmem>>, vector<18x1x128xf32>
    tpu.vector_store %arg6[%c0_12, %c0_13, %c0_14], %12 {strides = array<i32>} : memref<18x18x128xf32, #tpu.memory_space<vmem>>, vector<18x1x128xf32>,
    %c0_15 = arith.constant 0 : index
    %c17_16 = arith.constant 17 : index
    %c0_17 = arith.constant 0 : index
    %16 = vector.load %arg6[%c0_15, %c17_16, %c0_17] : memref<18x18x128xf32, #tpu.memory_space<vmem>>, vector<18x1x128xf32>
    tpu.vector_store %arg6[%c0_15, %c17_16, %c0_17], %12 {strides = array<i32>} : memref<18x18x128xf32, #tpu.memory_space<vmem>>, vector<18x1x128xf32>,
    %17 = vector.shape_cast %10 : vector<256x128xf32> to vector<16x16x128xf32>
    %c1_18 = arith.constant 1 : index
    %c1_19 = arith.constant 1 : index
    %c0_20 = arith.constant 0 : index
    %18 = vector.load %arg6[%c1_18, %c1_19, %c0_20] : memref<18x18x128xf32, #tpu.memory_space<vmem>>, vector<16x16x128xf32>
    tpu.vector_store %arg6[%c1_18, %c1_19, %c0_20], %17 {strides = array<i32>} : memref<18x18x128xf32, #tpu.memory_space<vmem>>, vector<16x16x128xf32>,
    %c0_21 = arith.constant 0 : index
    %c0_22 = arith.constant 0 : index
    %c0_23 = arith.constant 0 : index
    %19 = vector.load %arg6[%c0_21, %c0_22, %c0_23] : memref<18x18x128xf32, #tpu.memory_space<vmem>>, vector<16x16x128xf32>
    %20 = vector.shape_cast %19 : vector<16x16x128xf32> to vector<256x128xf32>
    %21 = arith.truncf %20 : vector<256x128xf32> to vector<256x128xbf16>
    %c0_24 = arith.constant 0 : index
    %c0_25 = arith.constant 0 : index
    %c0_26 = arith.constant 0 : index
    %22 = vector.load %arg2[%c0_24, %c0_25, %c0_26] : memref<9x128x128xbf16, #tpu.memory_space<vmem>>, vector<1x128x128xbf16>
    %23 = vector.shape_cast %22 : vector<1x128x128xbf16> to vector<128x128xbf16>
    %cst_27 = arith.constant dense<0.000000e+00> : vector<256x128xf32>
    %24 = tpu.matmul %21, %23, %cst_27 {dimension_numbers = #tpu.dot_dimension_numbers<[1], [0], [0], [1], [0, 0, 1, 1], [], []>} : vector<256x128xbf16>, vector<128x128xbf16>, vector<256x128xf32> -> vector<256x128xf32>
    %c0_28 = arith.constant 0 : index
    %c0_29 = arith.constant 0 : index
    %25 = vector.load %arg7[%c0_28, %c0_29] : memref<256x128xf32, #tpu.memory_space<vmem>>, vector<256x128xf32>
    tpu.vector_store %arg7[%c0_28, %c0_29], %24 {strides = array<i32>} : memref<256x128xf32, #tpu.memory_space<vmem>>, vector<256x128xf32>,
    %c0_30 = arith.constant 0 : index
    %c0_31 = arith.constant 0 : index
    %26 = vector.load %arg7[%c0_30, %c0_31] : memref<256x128xf32, #tpu.memory_space<vmem>>, vector<256x128xf32>
    %c0_32 = arith.constant 0 : index
    %c1_33 = arith.constant 1 : index
    %c0_34 = arith.constant 0 : index
    %27 = vector.load %arg6[%c0_32, %c1_33, %c0_34] : memref<18x18x128xf32, #tpu.memory_space<vmem>>, vector<16x16x128xf32>
    %28 = vector.shape_cast %27 : vector<16x16x128xf32> to vector<256x128xf32>
    %29 = arith.truncf %28 : vector<256x128xf32> to vector<256x128xbf16>
    %c1_35 = arith.constant 1 : index
    %c0_36 = arith.constant 0 : index
    %c0_37 = arith.constant 0 : index
    %30 = vector.load %arg2[%c1_35, %c0_36, %c0_37] : memref<9x128x128xbf16, #tpu.memory_space<vmem>>, vector<1x128x128xbf16>
    %31 = vector.shape_cast %30 : vector<1x128x128xbf16> to vector<128x128xbf16>
    %cst_38 = arith.constant dense<0.000000e+00> : vector<256x128xf32>
    %32 = tpu.matmul %29, %31, %cst_38 {dimension_numbers = #tpu.dot_dimension_numbers<[1], [0], [0], [1], [0, 0, 1, 1], [], []>} : vector<256x128xbf16>, vector<128x128xbf16>, vector<256x128xf32> -> vector<256x128xf32>
    %33 = arith.addf %26, %32 : vector<256x128xf32>
    %c0_39 = arith.constant 0 : index
    %c0_40 = arith.constant 0 : index
    %34 = vector.load %arg7[%c0_39, %c0_40] : memref<256x128xf32, #tpu.memory_space<vmem>>, vector<256x128xf32>
    tpu.vector_store %arg7[%c0_39, %c0_40], %33 {strides = array<i32>} : memref<256x128xf32, #tpu.memory_space<vmem>>, vector<256x128xf32>,
    %c0_41 = arith.constant 0 : index
    %c0_42 = arith.constant 0 : index
    %35 = vector.load %arg7[%c0_41, %c0_42] : memref<256x128xf32, #tpu.memory_space<vmem>>, vector<256x128xf32>
    %c0_43 = arith.constant 0 : index
    %c2 = arith.constant 2 : index
    %c0_44 = arith.constant 0 : index
    %36 = vector.load %arg6[%c0_43, %c2, %c0_44] : memref<18x18x128xf32, #tpu.memory_space<vmem>>, vector<16x16x128xf32>
    %37 = vector.shape_cast %36 : vector<16x16x128xf32> to vector<256x128xf32>
    %38 = arith.truncf %37 : vector<256x128xf32> to vector<256x128xbf16>
    %c2_45 = arith.constant 2 : index
    %c0_46 = arith.constant 0 : index
    %c0_47 = arith.constant 0 : index
    %39 = vector.load %arg2[%c2_45, %c0_46, %c0_47] : memref<9x128x128xbf16, #tpu.memory_space<vmem>>, vector<1x128x128xbf16>
    %40 = vector.shape_cast %39 : vector<1x128x128xbf16> to vector<128x128xbf16>
    %cst_48 = arith.constant dense<0.000000e+00> : vector<256x128xf32>
    %41 = tpu.matmul %38, %40, %cst_48 {dimension_numbers = #tpu.dot_dimension_numbers<[1], [0], [0], [1], [0, 0, 1, 1], [], []>} : vector<256x128xbf16>, vector<128x128xbf16>, vector<256x128xf32> -> vector<256x128xf32>
    %42 = arith.addf %35, %41 : vector<256x128xf32>
    %c0_49 = arith.constant 0 : index
    %c0_50 = arith.constant 0 : index
    %43 = vector.load %arg7[%c0_49, %c0_50] : memref<256x128xf32, #tpu.memory_space<vmem>>, vector<256x128xf32>
    tpu.vector_store %arg7[%c0_49, %c0_50], %42 {strides = array<i32>} : memref<256x128xf32, #tpu.memory_space<vmem>>, vector<256x128xf32>,
    %c0_51 = arith.constant 0 : index
    %c0_52 = arith.constant 0 : index
    %44 = vector.load %arg7[%c0_51, %c0_52] : memref<256x128xf32, #tpu.memory_space<vmem>>, vector<256x128xf32>
    %c1_53 = arith.constant 1 : index
    %c0_54 = arith.constant 0 : index
    %c0_55 = arith.constant 0 : index
    %45 = vector.load %arg6[%c1_53, %c0_54, %c0_55] : memref<18x18x128xf32, #tpu.memory_space<vmem>>, vector<16x16x128xf32>
    %46 = vector.shape_cast %45 : vector<16x16x128xf32> to vector<256x128xf32>
    %47 = arith.truncf %46 : vector<256x128xf32> to vector<256x128xbf16>
    %c3 = arith.constant 3 : index
    %c0_56 = arith.constant 0 : index
    %c0_57 = arith.constant 0 : index
    %48 = vector.load %arg2[%c3, %c0_56, %c0_57] : memref<9x128x128xbf16, #tpu.memory_space<vmem>>, vector<1x128x128xbf16>
    %49 = vector.shape_cast %48 : vector<1x128x128xbf16> to vector<128x128xbf16>
    %cst_58 = arith.constant dense<0.000000e+00> : vector<256x128xf32>
    %50 = tpu.matmul %47, %49, %cst_58 {dimension_numbers = #tpu.dot_dimension_numbers<[1], [0], [0], [1], [0, 0, 1, 1], [], []>} : vector<256x128xbf16>, vector<128x128xbf16>, vector<256x128xf32> -> vector<256x128xf32>
    %51 = arith.addf %44, %50 : vector<256x128xf32>
    %c0_59 = arith.constant 0 : index
    %c0_60 = arith.constant 0 : index
    %52 = vector.load %arg7[%c0_59, %c0_60] : memref<256x128xf32, #tpu.memory_space<vmem>>, vector<256x128xf32>
    tpu.vector_store %arg7[%c0_59, %c0_60], %51 {strides = array<i32>} : memref<256x128xf32, #tpu.memory_space<vmem>>, vector<256x128xf32>,
    %c0_61 = arith.constant 0 : index
    %c0_62 = arith.constant 0 : index
    %53 = vector.load %arg7[%c0_61, %c0_62] : memref<256x128xf32, #tpu.memory_space<vmem>>, vector<256x128xf32>
    %c1_63 = arith.constant 1 : index
    %c1_64 = arith.constant 1 : index
    %c0_65 = arith.constant 0 : index
    %54 = vector.load %arg6[%c1_63, %c1_64, %c0_65] : memref<18x18x128xf32, #tpu.memory_space<vmem>>, vector<16x16x128xf32>
    %55 = vector.shape_cast %54 : vector<16x16x128xf32> to vector<256x128xf32>
    %56 = arith.truncf %55 : vector<256x128xf32> to vector<256x128xbf16>
    %c4 = arith.constant 4 : index
    %c0_66 = arith.constant 0 : index
    %c0_67 = arith.constant 0 : index
    %57 = vector.load %arg2[%c4, %c0_66, %c0_67] : memref<9x128x128xbf16, #tpu.memory_space<vmem>>, vector<1x128x128xbf16>
    %58 = vector.shape_cast %57 : vector<1x128x128xbf16> to vector<128x128xbf16>
    %cst_68 = arith.constant dense<0.000000e+00> : vector<256x128xf32>
    %59 = tpu.matmul %56, %58, %cst_68 {dimension_numbers = #tpu.dot_dimension_numbers<[1], [0], [0], [1], [0, 0, 1, 1], [], []>} : vector<256x128xbf16>, vector<128x128xbf16>, vector<256x128xf32> -> vector<256x128xf32>
    %60 = arith.addf %53, %59 : vector<256x128xf32>
    %c0_69 = arith.constant 0 : index
    %c0_70 = arith.constant 0 : index
    %61 = vector.load %arg7[%c0_69, %c0_70] : memref<256x128xf32, #tpu.memory_space<vmem>>, vector<256x128xf32>
    tpu.vector_store %arg7[%c0_69, %c0_70], %60 {strides = array<i32>} : memref<256x128xf32, #tpu.memory_space<vmem>>, vector<256x128xf32>,
    %c0_71 = arith.constant 0 : index
    %c0_72 = arith.constant 0 : index
    %62 = vector.load %arg7[%c0_71, %c0_72] : memref<256x128xf32, #tpu.memory_space<vmem>>, vector<256x128xf32>
    %c1_73 = arith.constant 1 : index
    %c2_74 = arith.constant 2 : index
    %c0_75 = arith.constant 0 : index
    %63 = vector.load %arg6[%c1_73, %c2_74, %c0_75] : memref<18x18x128xf32, #tpu.memory_space<vmem>>, vector<16x16x128xf32>
    %64 = vector.shape_cast %63 : vector<16x16x128xf32> to vector<256x128xf32>
    %65 = arith.truncf %64 : vector<256x128xf32> to vector<256x128xbf16>
    %c5 = arith.constant 5 : index
    %c0_76 = arith.constant 0 : index
    %c0_77 = arith.constant 0 : index
    %66 = vector.load %arg2[%c5, %c0_76, %c0_77] : memref<9x128x128xbf16, #tpu.memory_space<vmem>>, vector<1x128x128xbf16>
    %67 = vector.shape_cast %66 : vector<1x128x128xbf16> to vector<128x128xbf16>
    %cst_78 = arith.constant dense<0.000000e+00> : vector<256x128xf32>
    %68 = tpu.matmul %65, %67, %cst_78 {dimension_numbers = #tpu.dot_dimension_numbers<[1], [0], [0], [1], [0, 0, 1, 1], [], []>} : vector<256x128xbf16>, vector<128x128xbf16>, vector<256x128xf32> -> vector<256x128xf32>
    %69 = arith.addf %62, %68 : vector<256x128xf32>
    %c0_79 = arith.constant 0 : index
    %c0_80 = arith.constant 0 : index
    %70 = vector.load %arg7[%c0_79, %c0_80] : memref<256x128xf32, #tpu.memory_space<vmem>>, vector<256x128xf32>
    tpu.vector_store %arg7[%c0_79, %c0_80], %69 {strides = array<i32>} : memref<256x128xf32, #tpu.memory_space<vmem>>, vector<256x128xf32>,
    %c0_81 = arith.constant 0 : index
    %c0_82 = arith.constant 0 : index
    %71 = vector.load %arg7[%c0_81, %c0_82] : memref<256x128xf32, #tpu.memory_space<vmem>>, vector<256x128xf32>
    %c2_83 = arith.constant 2 : index
    %c0_84 = arith.constant 0 : index
    %c0_85 = arith.constant 0 : index
    %72 = vector.load %arg6[%c2_83, %c0_84, %c0_85] : memref<18x18x128xf32, #tpu.memory_space<vmem>>, vector<16x16x128xf32>
    %73 = vector.shape_cast %72 : vector<16x16x128xf32> to vector<256x128xf32>
    %74 = arith.truncf %73 : vector<256x128xf32> to vector<256x128xbf16>
    %c6 = arith.constant 6 : index
    %c0_86 = arith.constant 0 : index
    %c0_87 = arith.constant 0 : index
    %75 = vector.load %arg2[%c6, %c0_86, %c0_87] : memref<9x128x128xbf16, #tpu.memory_space<vmem>>, vector<1x128x128xbf16>
    %76 = vector.shape_cast %75 : vector<1x128x128xbf16> to vector<128x128xbf16>
    %cst_88 = arith.constant dense<0.000000e+00> : vector<256x128xf32>
    %77 = tpu.matmul %74, %76, %cst_88 {dimension_numbers = #tpu.dot_dimension_numbers<[1], [0], [0], [1], [0, 0, 1, 1], [], []>} : vector<256x128xbf16>, vector<128x128xbf16>, vector<256x128xf32> -> vector<256x128xf32>
    %78 = arith.addf %71, %77 : vector<256x128xf32>
    %c0_89 = arith.constant 0 : index
    %c0_90 = arith.constant 0 : index
    %79 = vector.load %arg7[%c0_89, %c0_90] : memref<256x128xf32, #tpu.memory_space<vmem>>, vector<256x128xf32>
    tpu.vector_store %arg7[%c0_89, %c0_90], %78 {strides = array<i32>} : memref<256x128xf32, #tpu.memory_space<vmem>>, vector<256x128xf32>,
    %c0_91 = arith.constant 0 : index
    %c0_92 = arith.constant 0 : index
    %80 = vector.load %arg7[%c0_91, %c0_92] : memref<256x128xf32, #tpu.memory_space<vmem>>, vector<256x128xf32>
    %c2_93 = arith.constant 2 : index
    %c1_94 = arith.constant 1 : index
    %c0_95 = arith.constant 0 : index
    %81 = vector.load %arg6[%c2_93, %c1_94, %c0_95] : memref<18x18x128xf32, #tpu.memory_space<vmem>>, vector<16x16x128xf32>
    %82 = vector.shape_cast %81 : vector<16x16x128xf32> to vector<256x128xf32>
    %83 = arith.truncf %82 : vector<256x128xf32> to vector<256x128xbf16>
    %c7 = arith.constant 7 : index
    %c0_96 = arith.constant 0 : index
    %c0_97 = arith.constant 0 : index
    %84 = vector.load %arg2[%c7, %c0_96, %c0_97] : memref<9x128x128xbf16, #tpu.memory_space<vmem>>, vector<1x128x128xbf16>
    %85 = vector.shape_cast %84 : vector<1x128x128xbf16> to vector<128x128xbf16>
    %cst_98 = arith.constant dense<0.000000e+00> : vector<256x128xf32>
    %86 = tpu.matmul %83, %85, %cst_98 {dimension_numbers = #tpu.dot_dimension_numbers<[1], [0], [0], [1], [0, 0, 1, 1], [], []>} : vector<256x128xbf16>, vector<128x128xbf16>, vector<256x128xf32> -> vector<256x128xf32>
    %87 = arith.addf %80, %86 : vector<256x128xf32>
    %c0_99 = arith.constant 0 : index
    %c0_100 = arith.constant 0 : index
    %88 = vector.load %arg7[%c0_99, %c0_100] : memref<256x128xf32, #tpu.memory_space<vmem>>, vector<256x128xf32>
    tpu.vector_store %arg7[%c0_99, %c0_100], %87 {strides = array<i32>} : memref<256x128xf32, #tpu.memory_space<vmem>>, vector<256x128xf32>,
    %c0_101 = arith.constant 0 : index
    %c0_102 = arith.constant 0 : index
    %89 = vector.load %arg7[%c0_101, %c0_102] : memref<256x128xf32, #tpu.memory_space<vmem>>, vector<256x128xf32>
    %c2_103 = arith.constant 2 : index
    %c2_104 = arith.constant 2 : index
    %c0_105 = arith.constant 0 : index
    %90 = vector.load %arg6[%c2_103, %c2_104, %c0_105] : memref<18x18x128xf32, #tpu.memory_space<vmem>>, vector<16x16x128xf32>
    %91 = vector.shape_cast %90 : vector<16x16x128xf32> to vector<256x128xf32>
    %92 = arith.truncf %91 : vector<256x128xf32> to vector<256x128xbf16>
    %c8 = arith.constant 8 : index
    %c0_106 = arith.constant 0 : index
    %c0_107 = arith.constant 0 : index
    %93 = vector.load %arg2[%c8, %c0_106, %c0_107] : memref<9x128x128xbf16, #tpu.memory_space<vmem>>, vector<1x128x128xbf16>
    %94 = vector.shape_cast %93 : vector<1x128x128xbf16> to vector<128x128xbf16>
    %cst_108 = arith.constant dense<0.000000e+00> : vector<256x128xf32>
    %95 = tpu.matmul %92, %94, %cst_108 {dimension_numbers = #tpu.dot_dimension_numbers<[1], [0], [0], [1], [0, 0, 1, 1], [], []>} : vector<256x128xbf16>, vector<128x128xbf16>, vector<256x128xf32> -> vector<256x128xf32>
    %96 = arith.addf %89, %95 : vector<256x128xf32>
    %c0_109 = arith.constant 0 : index
    %c0_110 = arith.constant 0 : index
    %97 = vector.load %arg7[%c0_109, %c0_110] : memref<256x128xf32, #tpu.memory_space<vmem>>, vector<256x128xf32>
    tpu.vector_store %arg7[%c0_109, %c0_110], %96 {strides = array<i32>} : memref<256x128xf32, #tpu.memory_space<vmem>>, vector<256x128xf32>,
    %c0_111 = arith.constant 0 : index
    %c0_112 = arith.constant 0 : index
    %98 = vector.load %arg7[%c0_111, %c0_112] : memref<256x128xf32, #tpu.memory_space<vmem>>, vector<256x128xf32>
    %99 = arith.truncf %98 : vector<256x128xf32> to vector<256x128xbf16>
    %c0_113 = arith.constant 0 : index
    %c0_114 = arith.constant 0 : index
    %c0_115 = arith.constant 0 : index
    %100 = vector.load %arg4[%c0_113, %c0_114, %c0_115] : memref<1x256x128xbf16, #tpu.memory_space<vmem>>, vector<1x256x128xbf16>
    %101 = vector.shape_cast %100 : vector<1x256x128xbf16> to vector<256x128xbf16>
    %102 = vector.shape_cast %99 : vector<256x128xbf16> to vector<1x256x128xbf16>
    tpu.vector_store %arg4[%c0_113, %c0_114, %c0_115], %102 {strides = array<i32>} : memref<1x256x128xbf16, #tpu.memory_space<vmem>>, vector<1x256x128xbf16>,
    %cst_116 = arith.constant dense<0.000000e+00> : vector<128xf32>
    %103 = vector.multi_reduction <add>, %98, %cst_116 [0] : vector<256x128xf32> to vector<128xf32>
    %104 = vector.shape_cast %103 : vector<128xf32> to vector<1x128xf32>
    %c0_117 = arith.constant 0 : index
    %c0_118 = arith.constant 0 : index
    %c0_119 = arith.constant 0 : index
    %105 = vector.load %arg5[%c0_117, %c0_118, %c0_119] : memref<1x2x128xf32, #tpu.memory_space<vmem>>, vector<1x1x128xf32>
    %106 = vector.shape_cast %105 : vector<1x1x128xf32> to vector<1x128xf32>
    %107 = vector.shape_cast %104 : vector<1x128xf32> to vector<1x1x128xf32>
    tpu.vector_store %arg5[%c0_117, %c0_118, %c0_119], %107 {strides = array<i32>} : memref<1x2x128xf32, #tpu.memory_space<vmem>>, vector<1x1x128xf32>,
    %108 = arith.mulf %98, %98 : vector<256x128xf32>
    %cst_120 = arith.constant dense<0.000000e+00> : vector<128xf32>
    %109 = vector.multi_reduction <add>, %108, %cst_120 [0] : vector<256x128xf32> to vector<128xf32>
    %110 = vector.shape_cast %109 : vector<128xf32> to vector<1x128xf32>
    %c0_121 = arith.constant 0 : index
    %c1_122 = arith.constant 1 : index
    %c0_123 = arith.constant 0 : index
    %111 = vector.load %arg5[%c0_121, %c1_122, %c0_123] : memref<1x2x128xf32, #tpu.memory_space<vmem>>, vector<1x1x128xf32>
    %112 = vector.shape_cast %111 : vector<1x1x128xf32> to vector<1x128xf32>
    %113 = vector.shape_cast %110 : vector<1x128xf32> to vector<1x1x128xf32>
    tpu.vector_store %arg5[%c0_121, %c1_122, %c0_123], %113 {strides = array<i32>} : memref<1x2x128xf32, #tpu.memory_space<vmem>>, vector<1x1x128xf32>,
    return
  }
  func.func @transform_0(%arg0: i32) -> (i32, i32, i32) {
    %c0_i32 = arith.constant 0 : i32
    %c0_i32_0 = arith.constant 0 : i32
    %c0_i32_1 = arith.constant 0 : i32
    return %arg0, %c0_i32, %c0_i32_0 : i32, i32, i32
  }
  func.func @transform_1(%arg0: i32) -> (i32, i32, i32) {
    %c0_i32 = arith.constant 0 : i32
    %c0_i32_0 = arith.constant 0 : i32
    %c0_i32_1 = arith.constant 0 : i32
    %c0_i32_2 = arith.constant 0 : i32
    return %c0_i32, %c0_i32_0, %c0_i32_1 : i32, i32, i32
  }
  func.func @transform_2(%arg0: i32) -> (i32, i32) {
    %c0_i32 = arith.constant 0 : i32
    %c0_i32_0 = arith.constant 0 : i32
    %c0_i32_1 = arith.constant 0 : i32
    return %c0_i32, %c0_i32_0 : i32, i32
  }
  func.func @transform_3(%arg0: i32) -> (i32, i32, i32) {
    %c0_i32 = arith.constant 0 : i32
    %c0_i32_0 = arith.constant 0 : i32
    %c0_i32_1 = arith.constant 0 : i32
    return %arg0, %c0_i32, %c0_i32_0 : i32, i32, i32
  }
  func.func @transform_4(%arg0: i32) -> (i32, i32, i32) {
    %c0_i32 = arith.constant 0 : i32
    %c0_i32_0 = arith.constant 0 : i32
    %c0_i32_1 = arith.constant 0 : i32
    return %arg0, %c0_i32, %c0_i32_0 : i32, i32, i32
  }
}

module attributes {stable_mosaic.version = 11 : i64} {
  func.func @_bn_add_kernel(%arg0: i32, %arg1: memref<1x256x128xbf16, #tpu.memory_space<vmem>>, %arg2: memref<1x256x128xbf16, #tpu.memory_space<vmem>>, %arg3: memref<4x128xf32, #tpu.memory_space<vmem>>, %arg4: memref<1x256x128xf32, #tpu.memory_space<vmem>>) attributes {dimension_semantics = [#tpu.dimension_semantics<parallel>], iteration_bounds = array<i64: 2>, scalar_prefetch = 0 : i64, scratch_operands = 0 : i64, tpu.core_type = #tpu.core_type<tc>, window_params = [{transform_indices = @transform_0, window_bounds = array<i64: 1, 256, 128>}, {transform_indices = @transform_1, window_bounds = array<i64: 1, 256, 128>}, {pipeline_mode = #tpu.pipeline_mode<synchronous>, transform_indices = @transform_2, window_bounds = array<i64: 4, 128>}, {transform_indices = @transform_3, window_bounds = array<i64: 1, 256, 128>}]} {
    %c0 = arith.constant 0 : index
    %c0_0 = arith.constant 0 : index
    %c0_1 = arith.constant 0 : index
    %0 = vector.load %arg1[%c0, %c0_0, %c0_1] : memref<1x256x128xbf16, #tpu.memory_space<vmem>>, vector<1x256x128xbf16>
    %1 = vector.shape_cast %0 : vector<1x256x128xbf16> to vector<256x128xbf16>
    %2 = arith.extf %1 : vector<256x128xbf16> to vector<256x128xf32>
    %c0_2 = arith.constant 0 : index
    %c0_3 = arith.constant 0 : index
    %c0_4 = arith.constant 0 : index
    %3 = vector.load %arg2[%c0_2, %c0_3, %c0_4] : memref<1x256x128xbf16, #tpu.memory_space<vmem>>, vector<1x256x128xbf16>
    %4 = vector.shape_cast %3 : vector<1x256x128xbf16> to vector<256x128xbf16>
    %5 = arith.extf %4 : vector<256x128xbf16> to vector<256x128xf32>
    %c0_5 = arith.constant 0 : index
    %c0_6 = arith.constant 0 : index
    %6 = vector.load %arg3[%c0_5, %c0_6] : memref<4x128xf32, #tpu.memory_space<vmem>>, vector<1x128xf32>
    %7 = vector.broadcast %6 : vector<1x128xf32> to vector<256x128xf32>
    %8 = arith.mulf %2, %7 : vector<256x128xf32>
    %c1 = arith.constant 1 : index
    %c0_7 = arith.constant 0 : index
    %9 = vector.load %arg3[%c1, %c0_7] : memref<4x128xf32, #tpu.memory_space<vmem>>, vector<1x128xf32>
    %10 = vector.broadcast %9 : vector<1x128xf32> to vector<256x128xf32>
    %11 = arith.addf %8, %10 : vector<256x128xf32>
    %c2 = arith.constant 2 : index
    %c0_8 = arith.constant 0 : index
    %12 = vector.load %arg3[%c2, %c0_8] : memref<4x128xf32, #tpu.memory_space<vmem>>, vector<1x128xf32>
    %13 = vector.broadcast %12 : vector<1x128xf32> to vector<256x128xf32>
    %14 = arith.mulf %5, %13 : vector<256x128xf32>
    %15 = arith.addf %11, %14 : vector<256x128xf32>
    %c3 = arith.constant 3 : index
    %c0_9 = arith.constant 0 : index
    %16 = vector.load %arg3[%c3, %c0_9] : memref<4x128xf32, #tpu.memory_space<vmem>>, vector<1x128xf32>
    %17 = vector.broadcast %16 : vector<1x128xf32> to vector<256x128xf32>
    %18 = arith.addf %15, %17 : vector<256x128xf32>
    %c0_10 = arith.constant 0 : index
    %c0_11 = arith.constant 0 : index
    %c0_12 = arith.constant 0 : index
    %19 = vector.load %arg4[%c0_10, %c0_11, %c0_12] : memref<1x256x128xf32, #tpu.memory_space<vmem>>, vector<1x256x128xf32>
    %20 = vector.shape_cast %19 : vector<1x256x128xf32> to vector<256x128xf32>
    %21 = vector.shape_cast %18 : vector<256x128xf32> to vector<1x256x128xf32>
    tpu.vector_store %arg4[%c0_10, %c0_11, %c0_12], %21 {strides = array<i32>} : memref<1x256x128xf32, #tpu.memory_space<vmem>>, vector<1x256x128xf32>,
    return
  }
  func.func @transform_0(%arg0: i32) -> (i32, i32, i32) {
    %c0_i32 = arith.constant 0 : i32
    %c0_i32_0 = arith.constant 0 : i32
    %c0_i32_1 = arith.constant 0 : i32
    return %arg0, %c0_i32, %c0_i32_0 : i32, i32, i32
  }
  func.func @transform_1(%arg0: i32) -> (i32, i32, i32) {
    %c0_i32 = arith.constant 0 : i32
    %c0_i32_0 = arith.constant 0 : i32
    %c0_i32_1 = arith.constant 0 : i32
    return %arg0, %c0_i32, %c0_i32_0 : i32, i32, i32
  }
  func.func @transform_2(%arg0: i32) -> (i32, i32) {
    %c0_i32 = arith.constant 0 : i32
    %c0_i32_0 = arith.constant 0 : i32
    %c0_i32_1 = arith.constant 0 : i32
    return %c0_i32, %c0_i32_0 : i32, i32
  }
  func.func @transform_3(%arg0: i32) -> (i32, i32, i32) {
    %c0_i32 = arith.constant 0 : i32
    %c0_i32_0 = arith.constant 0 : i32
    %c0_i32_1 = arith.constant 0 : i32
    return %arg0, %c0_i32, %c0_i32_0 : i32, i32, i32
  }
}

</mosaic_0001>

<bundles_post_ra>
// kernel: resblk_forward.5
= control target key start
LH: loop header
LB: loop body
LE: loop exit
PB: predicated region body
PF: predicated region fallthrough
CT: control target
= control target key end

     0   :  { %8 = vsyncpa [#allocation3], 0  ;;  %s1602_s0 = inlined_call_operand.hbm [shape: bf16[2,256,128], index: 0, kind: input, shape index: {}]   ;;  %s1603_s1 = inlined_call_operand.hbm [shape: bf16[2,256,128], index: 1, kind: input, shape index: {}]   ;;  %s1604_s2 = inlined_call_operand.hbm [shape: f32[4,128], index: 2, kind: input, shape index: {}]   ;;  %s1605_s3 = inlined_call_operand.hbm [shape: f32[2,256,128], index: 3, kind: output, shape index: {}]  }
   0x1   :  { %10 = vsyncpa [#allocation3 + $0x1], 0 }
   0x2   :  { %11 = vsyncpa [#allocation6], 0 }
   0x3   :  { %13 = vsyncpa [#allocation6 + $0x1], 0 }
   0x4   :  { %14 = vsyncpa [#allocation4], 0 }
   0x5   :  { %16 = vsyncpa [#allocation4 + $0x1], 0  ;;  %s1143_s12 = smov 0   ;;  %s1145_s13 = smov 0  }
   0x6   :  { %s1147_s14 = smov 0   ;;  %s1149_s15 = smov 0  }
   0x7 LB: > { %s1164_s16 = sadd.s32 4294967295, %s1113_s15   ;;  %s700_s17 = sadd.s32 4294967294, %s1113_s15   ;;  %s1113_s15 = sphi %s1149_s15, %s1630_s15   ;;  %s1109_s14 = sphi %s1147_s14, %s1629_s14   ;;  %s1105_s13 = sphi %s1145_s13, %s1628_s13   ;;  %s1101_s12 = sphi %s1143_s12, %s1627_s12  }
   0x8   : > { %s1168_s18 = sadd.s32 1, %s1113_s15   ;;  %s29_s19 = sadd.s32 1, %s1109_s14 }
   0x9   : > { %s26_s20 = ssub.s32 %s1113_s15, %s1168_s18  ;;  %p36_p0 = scmp.ne.s32.totalorder %s1109_s14, %s1105_s13 }
   0xa   : > { %p27_p1 = scmp.eq.s32.totalorder %s26_s20, 0  ;;  %p37_p2 = scmp.eq.s32.totalorder %s1113_s15, 0 }
   0xb   : > { %p42_p3 = scmp.ne.s32.totalorder %s1105_s13, %s1101_s12  ;;  %p1606_p4 = scmp.eq.s32.totalorder %s1164_s16, 0 }
   0xc   : > { %s1180_s21 = scalar_select %p27_p1, %s1109_s14, %s29_s19  }
   0xd   : > { %p1182_p5 = por %p37_p2, %p36_p0  ;;  %p1188_p6 = por %p1606_p4, %p42_p3 }
   0xe   : > { %p113_p7 = scmp.eq.s32.totalorder %s1164_s16, 1  ;;  %p119_p8 = scmp.eq.s32.totalorder %s700_s17, 1 }
   0xf   : > { %s1612_s23 = scalar_select %p1188_p6, 1, 0 }
  0x10   : > { %p701_p9 = scmp.ge.s32.totalorder %s1113_s15, 1  ;;  %p126_p10 = scmp.lt.s32.totalorder %s1113_s15, 3 }
  0x11   : > { %p1195_p11 = por %p113_p7, %p36_p0  ;;  %p1199_p12 = por %p119_p8, %p42_p3 }
  0x12   : > { %p1203_p13 = pnand %p701_p9, %p126_p10  ;;  %s1115_s27 = smov [#allocation7]  }
  0x13   : > { %s1613_s24 = scalar_select %p1195_p11, 1, 0 }
  0x14   : > { %s1614_s25 = scalar_select %p1199_p12, 1, 0 }
  0x15   : > { %s1615_s26 = scalar_select %p1203_p13, 1, 0 }
  0x16   : > { %p895_p2 = pneg %p1203_p13  ;;  %s139_s28 = sshll.u32 %s1115_s27, 4  ;;  %s140_s28 = int_to_ptr.vmem [resolvable:$true] %s139_s28 }
  0x17   : > { %p911_p4 = scmp.lt.s32.totalorder %s1113_s15, 2  ;;  %p1616_p0 = scmp.eq.s32.totalorder %s1164_s16, 0 }
  0x18   : > { %s150_s30 = sand.u32 1, %s1109_s14   ;;  %s951_s8 = scalar_lea.hbm %s1604_s2, 64 }
  0x19   : > { %p1213_p7 = pnand %p895_p2, %p1616_p0  ;;  %p1220_p3 = pnand %p911_p4, %p1182_p5 }
  0x1a   : > { %s1224_s5 = sshll.u32 %s150_s30, 7  ;;  %p952_p8 = scmp.ne.s32.totalorder %s1604_s2, %s951_s8 }
  0x1b   : > { %s1618_s4 = scalar_select %p1220_p3, 1, 0 }
  0x1c   : > { %p953_p9 = pneg %p1213_p7  ;;  %p958_p4 = scmp.lt.u32.totalorder %s951_s8, %s1604_s2 }
  0x1e   : > { %p954_p10 = pnand %p953_p9, %p952_p8 }
  0x20   : > { %p955_p2 = pneg %p954_p10 }
  0x22   : > { %p960_p5 = pnand %p958_p4, %p955_p2 }
  0x24   : > { %963 = shalt.err (!%p960_p5)
}
  0x25   : > { %s964_s19 = scalar_lea.vmem %s140_s28, 64  ;;  %p972_p11 = scmp.lt.s32.totalorder %s140_s28, %s140_s28 }
  0x26   : > { %p965_p0 = scmp.ne.s32.totalorder %s140_s28, %s964_s19  ;;  %p973_p6 = scmp.lt.s32.totalorder %s964_s19, %s964_s19 }
  0x28   : > { %p967_p1 = pnand %p965_p0, %p953_p9  ;;  %p974_p13 = por %p973_p6, %p972_p11 }
  0x2a   : > { %p968_p12 = pneg %p967_p1 }
  0x2c   : > { %p975_p3 = pnand %p974_p13, %p968_p12 }
  0x2e   : > { %978 = shalt.err (!%p975_p3)
}
  0x2f   : > { %898 = dma.hbm_to_vmem [thread:$0]  (!%p1213_p7), %s1604_s2, 64, %s140_s28, [#allocation6]  }
  0x30   : > { %s724_s27 = sshll.u32 %s1113_s15, 11  ;;  %s154_s6 = scalar_lea.vmem [#allocation2], %s1224_s5 }
  0x31   : > { %s161_s7 = sshll.u32 %s154_s6, 4  ;;  %s1249_s10 = scalar_lea.hbm %s1602_s0, %s724_s27  ;;  %s1251_s7 = int_to_ptr.vmem [resolvable:$true] %s161_s7 }
  0x32   : > { %s1253_s29 = scalar_lea.sflag [#allocation3], %s150_s30  ;;  %s979_s11 = scalar_lea.hbm %s1249_s10, 2048 }
  0x33   : > { %p980_p6 = scmp.ne.s32.totalorder %s1249_s10, %s979_s11  ;;  %p1619_p11 = scmp.ne.s32.totalorder %s1618_s4, 0 }
  0x34   : > { %s984_s19 = scalar_lea.hbm %s1602_s0, 4096  ;;  %p985_p7 = scmp.lt.u32.totalorder %s1249_s10, %s1602_s0 }
  0x35   : > { %p981_p12 = pneg %p1619_p11  ;;  %p986_p3 = scmp.lt.u32.totalorder %s984_s19, %s979_s11 }
  0x36   : > { %p988_p9 = scmp.lt.u32.totalorder %s979_s11, %s1249_s10 }
  0x37   : > { %p982_p13 = pnand %p981_p12, %p980_p6  ;;  %p987_p8 = por %p986_p3, %p985_p7 }
  0x39   : > { %p983_p1 = pneg %p982_p13  ;;  %p989_p10 = por %p988_p9, %p987_p8 }
  0x3b   : > { %p990_p2 = pnand %p989_p10, %p983_p1 }
  0x3d   : > { %993 = shalt.err (!%p990_p2)
}
  0x3e   : > { %s994_s30 = scalar_lea.vmem %s1251_s7, 2048  ;;  %s1116_s6 = smov [#allocation2]  }
  0x3f   : > { %p995_p4 = scmp.ne.s32.totalorder %s1251_s7, %s994_s30  ;;  %s999_s8 = sshll.u32 %s1116_s6, 4  ;;  %s1000_s8 = int_to_ptr.vmem [resolvable:$false] %s999_s8 }
  0x40   : > { %s1001_s9 = scalar_lea.vmem %s1000_s8, 4096  ;;  %p1002_p6 = scmp.lt.s32.totalorder %s1251_s7, %s1000_s8 }
  0x41   : > { %p997_p5 = pnand %p995_p4, %p981_p12  ;;  %p1003_p13 = scmp.lt.s32.totalorder %s1001_s9, %s994_s30 }
  0x43   : > { %p998_p0 = pneg %p997_p5  ;;  %p1004_p7 = por %p1003_p13, %p1002_p6 }
  0x45   : > { %p1005_p3 = pnand %p1004_p7, %p998_p0 }
  0x47   : > { %1008 = shalt.err (!%p1005_p3)
}
  0x48   : > { %s1117_s11 = smov 64   ;;  %s1118_s28 = smov 4  }
  0x49   : > { %902 = dma.hbm_to_vmem [thread:$0]  (!%p1619_p11), %s1249_s10, 2048, %s1251_s7, %s1253_s29, %s1117_s11, %s1117_s11, %s1118_s28  }
  0x4a   : > { %s1289_s20 = scalar_lea.hbm %s1603_s1, %s724_s27  ;;  %s175_s22 = scalar_lea.vmem [#allocation5], %s1224_s5 }
  0x4b   : > { %s182_s30 = sshll.u32 %s175_s22, 4  ;;  %s171_s6 = sand.u32 1, %s1113_s15   ;;  %s1293_s30 = int_to_ptr.vmem [resolvable:$true] %s182_s30 }
  0x4c   : > { %s1295_s8 = scalar_lea.sflag [#allocation6], %s171_s6  ;;  %s1009_s9 = scalar_lea.hbm %s1289_s20, 2048 }
  0x4d   : > { %p1010_p1 = scmp.ne.s32.totalorder %s1289_s20, %s1009_s9  ;;  %s1014_s10 = scalar_lea.hbm %s1603_s1, 4096 }
  0x4e   : > { %p1015_p10 = scmp.lt.u32.totalorder %s1289_s20, %s1603_s1  ;;  %p1016_p2 = scmp.lt.u32.totalorder %s1014_s10, %s1009_s9 }
  0x4f   : > { %p1012_p8 = pnand %p1010_p1, %p981_p12  ;;  %p1018_p5 = scmp.lt.u32.totalorder %s1009_s9, %s1289_s20 }
  0x50   : > { %p1017_p4 = por %p1016_p2, %p1015_p10 }
  0x51   : > { %p1013_p9 = pneg %p1012_p8 }
  0x52   : > { %p1019_p0 = por %p1018_p5, %p1017_p4 }
  0x54   : > { %p1020_p6 = pnand %p1019_p0, %p1013_p9 }
  0x56   : > { %1023 = shalt.err (!%p1020_p6)
}
  0x57   : > { %s1024_s5 = scalar_lea.vmem %s1293_s30, 2048  ;;  %s1119_s19 = smov [#allocation5]  }
  0x58   : > { %p1025_p13 = scmp.ne.s32.totalorder %s1293_s30, %s1024_s5  ;;  %s1029_s22 = sshll.u32 %s1119_s19, 4  ;;  %s1030_s22 = int_to_ptr.vmem [resolvable:$false] %s1029_s22 }
  0x59   : > { %s1031_s6 = scalar_lea.vmem %s1030_s22, 4096  ;;  %p1032_p1 = scmp.lt.s32.totalorder %s1293_s30, %s1030_s22 }
  0x5a   : > { %p1027_p7 = pnand %p1025_p13, %p981_p12  ;;  %p1033_p8 = scmp.lt.s32.totalorder %s1031_s6, %s1024_s5 }
  0x5c   : > { %p1028_p3 = pneg %p1027_p7  ;;  %p1034_p10 = por %p1033_p8, %p1032_p1 }
  0x5e   : > { %p1035_p2 = pnand %p1034_p10, %p1028_p3 }
  0x60   : > { %1038 = shalt.err (!%p1035_p2)
}
  0x61   : > { %905 = dma.hbm_to_vmem [thread:$0]  (!%p1619_p11), %s1289_s20, 2048, %s1293_s30, %s1295_s8, %s1117_s11, %s1117_s11, %s1118_s28  }
  0x62   : > { %p1620_p12 = scmp.ne.s32.totalorder %s1615_s26, 0 }
  0x63   : > { %s1327_s9 = sand.u32 (!%p1620_p12), 1, %s1105_s13   ;;  %p1621_p9 = scmp.ne.s32.totalorder (!%p1620_p12), %s1612_s23, 0 }
  0x64   : > { %194 = sbr.rel (%p1620_p12) target bundleno = 191 (0xbf), region = 32  ;;  %s711_s7 = sshll.u32 (!%p1620_p12), %s1327_s9, 7 }
  0x65   : > { %s197_s27 = scalar_lea.sflag (!%p1620_p12), [#allocation3], %s1327_s9  ;;  %s1331_s10 = scalar_lea.vmem (!%p1620_p12), [#allocation2], %s711_s7 }
  0x6b   : > { %1084 = dma.done.wait (%p1621_p9), %s197_s27, 2048  }
  0x6c   : > { %1086 = vsyncadd (%p1621_p9), %s197_s27, 4294965248  ;;  %s205_s4 = sand.u32 1, %s1164_s16   ;;  %s1338_s11 = scalar_lea.vmem [#allocation5], %s711_s7 }
  0x6d   : > { %s206_s26 = scalar_lea.sflag [#allocation6], %s205_s4 }
  0x6e   : > { %1088 = dma.done.wait (%p1621_p9), %s206_s26, 2048  }
  0x6f   : > { %1090 = vsyncadd (%p1621_p9), %s206_s26, 4294965248  ;;  %p1622_p11 = scmp.eq.s32.totalorder %s1164_s16, 0 }
  0x71   : > { %1092 = dma.done.wait (%p1622_p11), [#allocation6], 64   ;;  %p1623_p4 = pmov %p1622_p11 }
  0x72   : > { %v728_v0 = vld [vmem:[%s1331_s10] sm:$0xff]   ;;  %v855_v9 = vld [vmem:[%s1331_s10 + $0x8] sm:$0xff]   ;;  %v856_v11 = vld [vmem:[%s1331_s10 + $0x10] sm:$0xff]   ;;  %s714_s23 = sshll.u32 %s1327_s9, 8  ;;  %s726_s20 = sshll.u32 %s1164_s16, 12 }
  0x73   : > { %1094 = vsyncadd (%p1623_p4), [#allocation6], 4294967232  ;;  %v792_v1 = vld [vmem:[%s1338_s11] sm:$0xff]   ;;  %v729_v3 = vunpack.c.l.bf16 %v728_v0  ;;  %v730_v7 = vunpack.c.h.bf16 %v728_v0  ;;  %v870_v10 = vld [vmem:[%s1338_s11 + $0x8] sm:$0xff]   ;;  %v733_v17 = vunpack.c.l.bf16 %v855_v9  ;;  %v734_v19 = vunpack.c.h.bf16 %v855_v9  ;;  %s1384_s28 = scalar_lea.vmem [#allocation8], %s714_s23  ;;  %s1553_s17 = scalar_lea.hbm %s1605_s3, %s726_s20 }
  0x74   : > { %v1350_v2 = vld [vmem:[#allocation7] ss:$0 sm:$0xff]  ;;  %v793_v4 = vunpack.c.l.bf16 %v792_v1  ;;  %v1352_v5 = vld [vmem:[#allocation7 + $0x1] ss:$0 sm:$0xff]  ;;  %v1354_v6 = vld [vmem:[#allocation7 + $0x2] ss:$0 sm:$0xff]  ;;  %v794_v8 = vunpack.c.h.bf16 %v792_v1  ;;  %v797_v18 = vunpack.c.l.bf16 %v870_v10  ;;  %v798_v20 = vunpack.c.h.bf16 %v870_v10 }
  0x75   : > { %v374_v12 = vmul.f32 %v729_v3, %v1350_v2  ;;  %v375_v14 = vmul.f32 %v730_v7, %v1350_v2  ;;  %v871_v16 = vld [vmem:[%s1338_s11 + $0x10] sm:$0xff]   ;;  %v737_v23 = vunpack.c.l.bf16 %v856_v11  ;;  %v1367_v25 = vld [vmem:[#allocation7 + $0x3] ss:$0 sm:$0xff]  ;;  %v376_v26 = vmul.f32 %v733_v17, %v1350_v2  ;;  %v857_v30 = vld [vmem:[%s1331_s10 + $0x18] sm:$0xff]   ;;  %s595_s30 = sshll.u32 %s1384_s28, 4  ;;  %s582_s16 = scalar_lea.sflag [#allocation4], %s1327_s9  ;;  %s1555_s30 = int_to_ptr.vmem [resolvable:$true] %s595_s30 }
  0x76   : > { %v448_v13 = vmul.f32 %v793_v4, %v1354_v6  ;;  %v449_v15 = vmul.f32 %v794_v8, %v1354_v6  ;;  %v801_v24 = vunpack.c.l.bf16 %v871_v16  ;;  %v450_v27 = vmul.f32 %v797_v18, %v1354_v6  ;;  %v872_v39 = vld [vmem:[%s1338_s11 + $0x18] sm:$0xff]   ;;  %v858_v52 = vld [vmem:[%s1331_s10 + $0x20] sm:$0xff]   ;;  %v859_v62 = vld [vmem:[%s1331_s10 + $0x28] sm:$0xff]   ;;  %s1039_s5 = scalar_lea.vmem %s1555_s30, 4096  ;;  %p1624_p0 = scmp.ne.s32.totalorder %s1613_s24, 0 }
  0x77   : > { %v411_v21 = vadd.f32 %v1352_v5, %v374_v12  ;;  %v412_v22 = vadd.f32 %v1352_v5, %v375_v14  ;;  %v377_v28 = vmul.f32 %v734_v19, %v1350_v2  ;;  %v451_v29 = vmul.f32 %v798_v20, %v1354_v6  ;;  %v873_v53 = vld [vmem:[%s1338_s11 + $0x20] sm:$0xff]   ;;  %v874_v10 = vld [vmem:[%s1338_s11 + $0x28] sm:$0xff]   ;;  %p1040_p5 = scmp.ne.s32.totalorder %s1555_s30, %s1039_s5  ;;  %s1120_s19 = smov [#allocation8]  }
  0x78   : > { %v378_v33 = vmul.f32 %v737_v23, %v1350_v2  ;;  %v452_v34 = vmul.f32 %v801_v24, %v1354_v6  ;;  %v413_v35 = vadd.f32 %v1352_v5, %v376_v26  ;;  %v738_v37 = vunpack.c.h.bf16 %v856_v11  ;;  %v875_v24 = vld [vmem:[%s1338_s11 + $0x30] sm:$0xff]   ;;  %s1043_s22 = sshll.u32 %s1120_s19, 4  ;;  %s1044_s22 = int_to_ptr.vmem [resolvable:$false] %s1043_s22 }
  0x79   : > { %v480_v31 = vadd.f32 %v448_v13, %v411_v21  ;;  %v481_v32 = vadd.f32 %v449_v15, %v412_v22  ;;  %v414_v36 = vadd.f32 %v1352_v5, %v377_v28  ;;  %v802_v38 = vunpack.c.h.bf16 %v871_v16  ;;  %v860_v15 = vld [vmem:[%s1331_s10 + $0x30] sm:$0xff]   ;;  %p1041_p6 = pnand %p1040_p5, %p1624_p0  ;;  %s1045_s6 = scalar_lea.vmem %s1044_s22, 8192 }
  0x7a   : > { %v415_v42 = vadd.f32 %v1352_v5, %v378_v33  ;;  %v741_v43 = vunpack.c.l.bf16 %v857_v30  ;;  %v482_v44 = vadd.f32 %v450_v27, %v413_v35  ;;  %v379_v46 = vmul.f32 %v738_v37, %v1350_v2  ;;  %p1046_p7 = scmp.lt.s32.totalorder %s1555_s30, %s1044_s22  ;;  %p1047_p3 = scmp.lt.s32.totalorder %s1045_s6, %s1039_s5 }
  0x7b   : > { %v517_v40 = vadd.f32 %v1367_v25, %v480_v31  ;;  %v518_v41 = vadd.f32 %v1367_v25, %v481_v32  ;;  %v483_v45 = vadd.f32 %v451_v29, %v414_v36  ;;  %v453_v47 = vmul.f32 %v802_v38, %v1354_v6  ;;  %v861_v38 = vld [vmem:[%s1331_s10 + $0x38] sm:$0xff]   ;;  %p1042_p13 = pneg %p1041_p6 }
  0x7c   : > { %v484_v48 = vadd.f32 %v452_v34, %v415_v42  ;;  %v805_v49 = vunpack.c.l.bf16 %v872_v39  ;;  %v380_v50 = vmul.f32 %v741_v43, %v1350_v2  ;;  %v742_v51 = vunpack.c.h.bf16 %v857_v30  ;;  %v876_v43 = vld [vmem:[%s1338_s11 + $0x38] sm:$0xff]   ;;  %p1048_p1 = por %p1047_p3, %p1046_p7 }
  0x7d   : > { %549 = vst [vmem:[%s1384_s28] sm:$0xff] %v517_v40  ;;  %550 = vst [vmem:[%s1384_s28 + $0x8] sm:$0xff] %v518_v41  ;;  %v519_v54 = vadd.f32 %v1367_v25, %v482_v44  ;;  %v520_v55 = vadd.f32 %v1367_v25, %v483_v45  ;;  %v416_v56 = vadd.f32 %v1352_v5, %v379_v46  ;;  %v806_v57 = vunpack.c.h.bf16 %v872_v39 }
  0x7e   : > { %v521_v58 = vadd.f32 %v1367_v25, %v484_v48  ;;  %v417_v59 = vadd.f32 %v1352_v5, %v380_v50  ;;  %v454_v60 = vmul.f32 %v805_v49, %v1354_v6  ;;  %v381_v61 = vmul.f32 %v742_v51, %v1350_v2  ;;  %p1049_p8 = pnand %p1048_p1, %p1042_p13 }
  0x7f   : > { %551 = vst [vmem:[%s1384_s28 + $0x10] sm:$0xff] %v519_v54  ;;  %552 = vst [vmem:[%s1384_s28 + $0x18] sm:$0xff] %v520_v55  ;;  %v485_v63 = vadd.f32 %v453_v47, %v416_v56  ;;  %v455_v0 = vmul.f32 %v806_v57, %v1354_v6  ;;  %v745_v1 = vunpack.c.l.bf16 %v858_v52  ;;  %v809_v3 = vunpack.c.l.bf16 %v873_v53  ;;  %v877_v57 = vld [vmem:[%s1338_s11 + $0x40] sm:$0xff]  }
  0x80   : > { %553 = vst [vmem:[%s1384_s28 + $0x20] sm:$0xff] %v521_v58  ;;  %v486_v4 = vadd.f32 %v454_v60, %v417_v59  ;;  %v418_v7 = vadd.f32 %v1352_v5, %v381_v61  ;;  %v746_v8 = vunpack.c.h.bf16 %v858_v52  ;;  %v810_v9 = vunpack.c.h.bf16 %v873_v53  ;;  %v862_v52 = vld [vmem:[%s1331_s10 + $0x40] sm:$0xff]  }
  0x81   : > { %v522_v11 = vadd.f32 %v1367_v25, %v485_v63  ;;  %v382_v12 = vmul.f32 %v745_v1, %v1350_v2  ;;  %v456_v13 = vmul.f32 %v809_v3, %v1354_v6  ;;  %v749_v14 = vunpack.c.l.bf16 %v859_v62  ;;  %v863_v3 = vld [vmem:[%s1331_s10 + $0x48] sm:$0xff]  }
  0x82   : > { %v523_v16 = vadd.f32 %v1367_v25, %v486_v4  ;;  %v487_v17 = vadd.f32 %v455_v0, %v418_v7  ;;  %v383_v18 = vmul.f32 %v746_v8, %v1350_v2  ;;  %v457_v19 = vmul.f32 %v810_v9, %v1354_v6 }
  0x83   : > { %554 = vst [vmem:[%s1384_s28 + $0x28] sm:$0xff] %v522_v11  ;;  %v419_v20 = vadd.f32 %v1352_v5, %v382_v12  ;;  %v813_v21 = vunpack.c.l.bf16 %v874_v10  ;;  %v384_v22 = vmul.f32 %v749_v14, %v1350_v2  ;;  %v750_v23 = vunpack.c.h.bf16 %v859_v62  ;;  %v878_v14 = vld [vmem:[%s1338_s11 + $0x48] sm:$0xff]  }
  0x84   : > { %555 = vst [vmem:[%s1384_s28 + $0x30] sm:$0xff] %v523_v16  ;;  %v524_v26 = vadd.f32 %v1367_v25, %v487_v17  ;;  %v420_v27 = vadd.f32 %v1352_v5, %v383_v18  ;;  %v814_v28 = vunpack.c.h.bf16 %v874_v10  ;;  %v753_v29 = vunpack.c.l.bf16 %v860_v15 }
  0x85   : > { %v488_v30 = vadd.f32 %v456_v13, %v419_v20  ;;  %v421_v31 = vadd.f32 %v1352_v5, %v384_v22  ;;  %v458_v32 = vmul.f32 %v813_v21, %v1354_v6  ;;  %v385_v33 = vmul.f32 %v750_v23, %v1350_v2  ;;  %v864_v23 = vld [vmem:[%s1331_s10 + $0x50] sm:$0xff]  }
  0x86   : > { %556 = vst [vmem:[%s1384_s28 + $0x38] sm:$0xff] %v524_v26  ;;  %v489_v34 = vadd.f32 %v457_v19, %v420_v27  ;;  %v459_v35 = vmul.f32 %v814_v28, %v1354_v6  ;;  %v817_v36 = vunpack.c.l.bf16 %v875_v24  ;;  %v386_v37 = vmul.f32 %v753_v29, %v1350_v2  ;;  %v879_v29 = vld [vmem:[%s1338_s11 + $0x50] sm:$0xff]  }
  0x87   : > { %v525_v39 = vadd.f32 %v1367_v25, %v488_v30  ;;  %v490_v40 = vadd.f32 %v458_v32, %v421_v31  ;;  %v422_v41 = vadd.f32 %v1352_v5, %v385_v33  ;;  %v754_v42 = vunpack.c.h.bf16 %v860_v15 }
  0x88   : > { %v526_v44 = vadd.f32 %v1367_v25, %v489_v34  ;;  %v423_v45 = vadd.f32 %v1352_v5, %v386_v37  ;;  %v460_v46 = vmul.f32 %v817_v36, %v1354_v6  ;;  %v818_v47 = vunpack.c.h.bf16 %v875_v24 }
  0x89   : > { %557 = vst [vmem:[%s1384_s28 + $0x40] sm:$0xff] %v525_v39  ;;  %v527_v48 = vadd.f32 %v1367_v25, %v490_v40  ;;  %v491_v49 = vadd.f32 %v459_v35, %v422_v41  ;;  %v387_v50 = vmul.f32 %v754_v42, %v1350_v2  ;;  %v757_v51 = vunpack.c.l.bf16 %v861_v38 }
  0x8a   : > { %558 = vst [vmem:[%s1384_s28 + $0x48] sm:$0xff] %v526_v44  ;;  %v492_v53 = vadd.f32 %v460_v46, %v423_v45  ;;  %v461_v54 = vmul.f32 %v818_v47, %v1354_v6  ;;  %v821_v55 = vunpack.c.l.bf16 %v876_v43  ;;  %v758_v56 = vunpack.c.h.bf16 %v861_v38  ;;  %v865_v38 = vld [vmem:[%s1331_s10 + $0x58] sm:$0xff]  }
  0x8b   : > { %559 = vst [vmem:[%s1384_s28 + $0x50] sm:$0xff] %v527_v48  ;;  %v528_v58 = vadd.f32 %v1367_v25, %v491_v49  ;;  %v424_v59 = vadd.f32 %v1352_v5, %v387_v50  ;;  %v388_v60 = vmul.f32 %v757_v51, %v1350_v2  ;;  %v822_v61 = vunpack.c.h.bf16 %v876_v43  ;;  %v880_v47 = vld [vmem:[%s1338_s11 + $0x58] sm:$0xff]  }
  0x8c   : > { %v529_v62 = vadd.f32 %v1367_v25, %v492_v53  ;;  %v462_v63 = vmul.f32 %v821_v55, %v1354_v6  ;;  %v389_v0 = vmul.f32 %v758_v56, %v1350_v2  ;;  %v761_v1 = vunpack.c.l.bf16 %v862_v52  ;;  %v866_v56 = vld [vmem:[%s1331_s10 + $0x60] sm:$0xff]  }
  0x8d   : > { %560 = vst [vmem:[%s1384_s28 + $0x58] sm:$0xff] %v528_v58  ;;  %v493_v4 = vadd.f32 %v461_v54, %v424_v59  ;;  %v425_v7 = vadd.f32 %v1352_v5, %v388_v60  ;;  %v463_v8 = vmul.f32 %v822_v61, %v1354_v6  ;;  %v825_v9 = vunpack.c.l.bf16 %v877_v57  ;;  %v881_v61 = vld [vmem:[%s1338_s11 + $0x60] sm:$0xff]  }
  0x8e   : > { %561 = vst [vmem:[%s1384_s28 + $0x60] sm:$0xff] %v529_v62  ;;  %v426_v10 = vadd.f32 %v1352_v5, %v389_v0  ;;  %v390_v11 = vmul.f32 %v761_v1, %v1350_v2  ;;  %v762_v12 = vunpack.c.h.bf16 %v862_v52  ;;  %v826_v13 = vunpack.c.h.bf16 %v877_v57 }
  0x8f   : > { %v530_v15 = vadd.f32 %v1367_v25, %v493_v4  ;;  %v494_v16 = vadd.f32 %v462_v63, %v425_v7  ;;  %v464_v17 = vmul.f32 %v825_v9, %v1354_v6  ;;  %v765_v18 = vunpack.c.l.bf16 %v863_v3  ;;  %v867_v9 = vld [vmem:[%s1331_s10 + $0x68] sm:$0xff]  }
  0x90   : > { %v495_v19 = vadd.f32 %v463_v8, %v426_v10  ;;  %v427_v20 = vadd.f32 %v1352_v5, %v390_v11  ;;  %v391_v21 = vmul.f32 %v762_v12, %v1350_v2  ;;  %v465_v22 = vmul.f32 %v826_v13, %v1354_v6 }
  0x91   : > { %562 = vst [vmem:[%s1384_s28 + $0x68] sm:$0xff] %v530_v15  ;;  %v531_v24 = vadd.f32 %v1367_v25, %v494_v16  ;;  %v829_v26 = vunpack.c.l.bf16 %v878_v14  ;;  %v392_v27 = vmul.f32 %v765_v18, %v1350_v2  ;;  %v766_v28 = vunpack.c.h.bf16 %v863_v3  ;;  %v882_v18 = vld [vmem:[%s1338_s11 + $0x68] sm:$0xff]  }
  0x92   : > { %v532_v30 = vadd.f32 %v1367_v25, %v495_v19  ;;  %v496_v31 = vadd.f32 %v464_v17, %v427_v20  ;;  %v428_v32 = vadd.f32 %v1352_v5, %v391_v21  ;;  %v830_v33 = vunpack.c.h.bf16 %v878_v14 }
  0x93   : > { %563 = vst [vmem:[%s1384_s28 + $0x70] sm:$0xff] %v531_v24  ;;  %v429_v34 = vadd.f32 %v1352_v5, %v392_v27  ;;  %v466_v35 = vmul.f32 %v829_v26, %v1354_v6  ;;  %v393_v36 = vmul.f32 %v766_v28, %v1350_v2  ;;  %v769_v37 = vunpack.c.l.bf16 %v864_v23  ;;  %v868_v28 = vld [vmem:[%s1331_s10 + $0x70] sm:$0xff]  }
  0x94   : > { %564 = vst [vmem:[%s1384_s28 + $0x78] sm:$0xff] %v532_v30  ;;  %v533_v39 = vadd.f32 %v1367_v25, %v496_v31  ;;  %v497_v40 = vadd.f32 %v465_v22, %v428_v32  ;;  %v467_v41 = vmul.f32 %v830_v33, %v1354_v6  ;;  %v833_v42 = vunpack.c.l.bf16 %v879_v29  ;;  %v883_v33 = vld [vmem:[%s1338_s11 + $0x70] sm:$0xff]  }
  0x95   : > { %v498_v43 = vadd.f32 %v466_v35, %v429_v34  ;;  %v430_v44 = vadd.f32 %v1352_v5, %v393_v36  ;;  %v394_v45 = vmul.f32 %v769_v37, %v1350_v2  ;;  %v770_v46 = vunpack.c.h.bf16 %v864_v23 }
  0x96   : > { %565 = vst [vmem:[%s1384_s28 + $0x80] sm:$0xff] %v533_v39  ;;  %v534_v48 = vadd.f32 %v1367_v25, %v497_v40  ;;  %v468_v49 = vmul.f32 %v833_v42, %v1354_v6  ;;  %v834_v50 = vunpack.c.h.bf16 %v879_v29  ;;  %v773_v51 = vunpack.c.l.bf16 %v865_v38  ;;  %v869_v42 = vld [vmem:[%s1331_s10 + $0x78] sm:$0xff]  }
  0x97   : > { %v535_v52 = vadd.f32 %v1367_v25, %v498_v43  ;;  %v499_v53 = vadd.f32 %v467_v41, %v430_v44  ;;  %v431_v54 = vadd.f32 %v1352_v5, %v394_v45  ;;  %v395_v55 = vmul.f32 %v770_v46, %v1350_v2 }
  0x98   : > { %566 = vst [vmem:[%s1384_s28 + $0x88] sm:$0xff] %v534_v48  ;;  %v469_v57 = vmul.f32 %v834_v50, %v1354_v6  ;;  %v837_v58 = vunpack.c.l.bf16 %v880_v47  ;;  %v396_v59 = vmul.f32 %v773_v51, %v1350_v2  ;;  %v774_v60 = vunpack.c.h.bf16 %v865_v38  ;;  %v884_v51 = vld [vmem:[%s1338_s11 + $0x78] sm:$0xff]  }
  0x99   : > { %567 = vst [vmem:[%s1384_s28 + $0x90] sm:$0xff] %v535_v52  ;;  %v536_v62 = vadd.f32 %v1367_v25, %v499_v53  ;;  %v500_v63 = vadd.f32 %v468_v49, %v431_v54  ;;  %v432_v0 = vadd.f32 %v1352_v5, %v395_v55  ;;  %v838_v1 = vunpack.c.h.bf16 %v880_v47 }
  0x9a   : > { %v433_v3 = vadd.f32 %v1352_v5, %v396_v59  ;;  %v470_v4 = vmul.f32 %v837_v58, %v1354_v6  ;;  %v397_v7 = vmul.f32 %v774_v60, %v1350_v2  ;;  %v777_v8 = vunpack.c.l.bf16 %v866_v56 }
  0x9b   : > { %568 = vst [vmem:[%s1384_s28 + $0x98] sm:$0xff] %v536_v62  ;;  %v537_v10 = vadd.f32 %v1367_v25, %v500_v63  ;;  %v501_v11 = vadd.f32 %v469_v57, %v432_v0  ;;  %v471_v12 = vmul.f32 %v838_v1, %v1354_v6  ;;  %v841_v13 = vunpack.c.l.bf16 %v881_v61 }
  0x9c   : > { %v502_v14 = vadd.f32 %v470_v4, %v433_v3  ;;  %v434_v15 = vadd.f32 %v1352_v5, %v397_v7  ;;  %v398_v16 = vmul.f32 %v777_v8, %v1350_v2  ;;  %v778_v17 = vunpack.c.h.bf16 %v866_v56 }
  0x9d   : > { %569 = vst [vmem:[%s1384_s28 + $0xa0] sm:$0xff] %v537_v10  ;;  %v538_v19 = vadd.f32 %v1367_v25, %v501_v11  ;;  %v472_v20 = vmul.f32 %v841_v13, %v1354_v6  ;;  %v842_v21 = vunpack.c.h.bf16 %v881_v61  ;;  %v781_v22 = vunpack.c.l.bf16 %v867_v9 }
  0x9e   : > { %v539_v23 = vadd.f32 %v1367_v25, %v502_v14  ;;  %v503_v24 = vadd.f32 %v471_v12, %v434_v15  ;;  %v435_v26 = vadd.f32 %v1352_v5, %v398_v16  ;;  %v399_v27 = vmul.f32 %v778_v17, %v1350_v2 }
  0x9f   : > { %570 = vst [vmem:[%s1384_s28 + $0xa8] sm:$0xff] %v538_v19  ;;  %v473_v29 = vmul.f32 %v842_v21, %v1354_v6  ;;  %v845_v30 = vunpack.c.l.bf16 %v882_v18  ;;  %v400_v31 = vmul.f32 %v781_v22, %v1350_v2  ;;  %v782_v32 = vunpack.c.h.bf16 %v867_v9 }
  0xa0   : > { %571 = vst [vmem:[%s1384_s28 + $0xb0] sm:$0xff] %v539_v23  ;;  %v540_v34 = vadd.f32 %v1367_v25, %v503_v24  ;;  %v504_v35 = vadd.f32 %v472_v20, %v435_v26  ;;  %v436_v36 = vadd.f32 %v1352_v5, %v399_v27  ;;  %v846_v37 = vunpack.c.h.bf16 %v882_v18 }
  0xa1   : > { %v437_v38 = vadd.f32 %v1352_v5, %v400_v31  ;;  %v474_v39 = vmul.f32 %v845_v30, %v1354_v6  ;;  %v401_v40 = vmul.f32 %v782_v32, %v1350_v2  ;;  %v785_v41 = vunpack.c.l.bf16 %v868_v28 }
  0xa2   : > { %572 = vst [vmem:[%s1384_s28 + $0xb8] sm:$0xff] %v540_v34  ;;  %v541_v43 = vadd.f32 %v1367_v25, %v504_v35  ;;  %v505_v44 = vadd.f32 %v473_v29, %v436_v36  ;;  %v475_v45 = vmul.f32 %v846_v37, %v1354_v6  ;;  %v849_v46 = vunpack.c.l.bf16 %v883_v33 }
  0xa3   : > { %v506_v47 = vadd.f32 %v474_v39, %v437_v38  ;;  %v438_v48 = vadd.f32 %v1352_v5, %v401_v40  ;;  %v402_v49 = vmul.f32 %v785_v41, %v1350_v2  ;;  %v786_v50 = vunpack.c.h.bf16 %v868_v28 }
  0xa4   : > { %573 = vst [vmem:[%s1384_s28 + $0xc0] sm:$0xff] %v541_v43  ;;  %v542_v52 = vadd.f32 %v1367_v25, %v505_v44  ;;  %v476_v53 = vmul.f32 %v849_v46, %v1354_v6  ;;  %v850_v54 = vunpack.c.h.bf16 %v883_v33  ;;  %v789_v55 = vunpack.c.l.bf16 %v869_v42 }
  0xa5   : > { %v543_v56 = vadd.f32 %v1367_v25, %v506_v47  ;;  %v507_v57 = vadd.f32 %v475_v45, %v438_v48  ;;  %v439_v58 = vadd.f32 %v1352_v5, %v402_v49  ;;  %v403_v59 = vmul.f32 %v786_v50, %v1350_v2 }
  0xa6   : > { %574 = vst [vmem:[%s1384_s28 + $0xc8] sm:$0xff] %v542_v52  ;;  %v477_v60 = vmul.f32 %v850_v54, %v1354_v6  ;;  %v853_v61 = vunpack.c.l.bf16 %v884_v51  ;;  %v404_v62 = vmul.f32 %v789_v55, %v1350_v2  ;;  %v790_v63 = vunpack.c.h.bf16 %v869_v42 }
  0xa7   : > { %575 = vst [vmem:[%s1384_s28 + $0xd0] sm:$0xff] %v543_v56  ;;  %v544_v0 = vadd.f32 %v1367_v25, %v507_v57  ;;  %v508_v1 = vadd.f32 %v476_v53, %v439_v58  ;;  %v440_v3 = vadd.f32 %v1352_v5, %v403_v59  ;;  %v854_v4 = vunpack.c.h.bf16 %v884_v51 }
  0xa8   : > { %v441_v7 = vadd.f32 %v1352_v5, %v404_v62  ;;  %v478_v8 = vmul.f32 %v853_v61, %v1354_v6  ;;  %v405_v9 = vmul.f32 %v790_v63, %v1350_v2 }
  0xa9   : > { %576 = vst [vmem:[%s1384_s28 + $0xd8] sm:$0xff] %v544_v0  ;;  %v545_v10 = vadd.f32 %v1367_v25, %v508_v1  ;;  %v509_v11 = vadd.f32 %v477_v60, %v440_v3  ;;  %v479_v12 = vmul.f32 %v854_v4, %v1354_v6 }
  0xaa   : > { %v510_v13 = vadd.f32 %v478_v8, %v441_v7  ;;  %v442_v14 = vadd.f32 %v1352_v5, %v405_v9 }
  0xab   : > { %577 = vst [vmem:[%s1384_s28 + $0xe0] sm:$0xff] %v545_v10  ;;  %v546_v15 = vadd.f32 %v1367_v25, %v509_v11 }
  0xac   : > { %v547_v2 = vadd.f32 %v1367_v25, %v510_v13  ;;  %v511_v16 = vadd.f32 %v479_v12, %v442_v14 }
  0xad   : > { %578 = vst [vmem:[%s1384_s28 + $0xe8] sm:$0xff] %v546_v15 }
  0xae   : > { %579 = vst [vmem:[%s1384_s28 + $0xf0] sm:$0xff] %v547_v2  ;;  %v548_v5 = vadd.f32 %v1367_v25, %v511_v16 }
  0xb0   : > { %580 = vst [vmem:[%s1384_s28 + $0xf8] sm:$0xff] %v548_v5 }
  0xb1   : > { %1052 = shalt.err (!%p1049_p8)
}
  0xb2   : > { %s1053_s7 = scalar_lea.hbm %s1553_s17, 4096  ;;  %s1057_s4 = scalar_lea.hbm %s1605_s3, 8192 }
  0xb3   : > { %p1054_p10 = scmp.ne.s32.totalorder %s1553_s17, %s1053_s7  ;;  %p1058_p9 = scmp.lt.u32.totalorder %s1553_s17, %s1605_s3 }
  0xb4   : > { %p1059_p11 = scmp.lt.u32.totalorder %s1057_s4, %s1053_s7  ;;  %p1061_p5 = scmp.lt.u32.totalorder %s1053_s7, %s1553_s17 }
  0xb5   : > { %p1055_p2 = pnand %p1054_p10, %p1624_p0 }
  0xb6   : > { %p1060_p4 = por %p1059_p11, %p1058_p9 }
  0xb7   : > { %p1056_p12 = pneg %p1055_p2 }
  0xb8   : > { %p1062_p6 = por %p1061_p5, %p1060_p4 }
  0xba   : > { %p1063_p13 = pnand %p1062_p6, %p1056_p12 }
  0xbc   : > { %1066 = shalt.err (!%p1063_p13)
}
  0xbd   : > { %s1121_s23 = smov 128   ;;  %s1122_s28 = smov 8  }
  0xbe   : > { %893 = dma.vmem_to_hbm [thread:$0]  (%p1624_p0), %s1555_s30, 4096, %s1553_s17, %s582_s16, %s1121_s23, %s1121_s23, %s1122_s28  }
  0xbf PF: > { %s610_s20 = sand.u32 1, %s1101_s12   ;;  %p1625_p7 = scmp.ne.s32.totalorder %s1614_s25, 0 }
  0xc0   : > { %p1626_p3 = scmp.ge.s32.totalorder %s1113_s15, 2  ;;  %s611_s8 = scalar_lea.sflag [#allocation4], %s610_s20 }
  0xc2   : > { %p907_p1 = pnand %p1626_p3, %p1625_p7 }
  0xc4   : > { %1096 = dma.done.wait (!%p907_p1), %s611_s8, 4096  }
  0xc5   : > { %1098 = vsyncadd (!%p907_p1), %s611_s8, 4294963200  ;;  %p19_p8 = scmp.ge.s32.totalorder %s1168_s18, 4   ;;  %s1627_s12 = smov %s1105_s13 }
  0xc6   : > { %s1628_s13 = smov %s1109_s14  ;;  %s1629_s14 = smov %s1180_s21 }
  0xc7   : > { %s1630_s15 = smov %s1168_s18  ;;  %21 = sbr.rel (!%p19_p8) target bundleno = 7 (0x7), region = 94 }
  0xce   :  { %616 = vsyncpa [#allocation3], 1 }
  0xcf   :  { %618 = vsyncpa [#allocation3 + $0x1], 1 }
  0xd0   :  { %619 = vsyncpa [#allocation6], 1 }
  0xd1   :  { %621 = vsyncpa [#allocation6 + $0x1], 1 }
  0xd2   :  { %622 = vsyncpa [#allocation4], 1 }
  0xd3   :  { %624 = vsyncpa [#allocation4 + $0x1], 1 }

// kernel: resblk_forward.4
= control target key start
LH: loop header
LB: loop body
LE: loop exit
PB: predicated region body
PF: predicated region fallthrough
CT: control target
= control target key end

     0   :  { %10 = vsyncpa [#allocation5], 0  ;;  %s6626_s0 = inlined_call_operand.hbm [shape: bf16[2,256,128], index: 0, kind: input, shape index: {}]   ;;  %s6627_s1 = inlined_call_operand.hbm [shape: bf16[9,128,128], index: 1, kind: input, shape index: {}]   ;;  %s6628_s2 = inlined_call_operand.hbm [shape: f32[2,128], index: 2, kind: input, shape index: {}]   ;;  %s6629_s3 = inlined_call_operand.hbm [shape: bf16[2,256,128], index: 3, kind: output, shape index: {0}]   ;;  %s6630_s4 = inlined_call_operand.hbm [shape: f32[2,2,128], index: 4, kind: output, shape index: {1}]  }
   0x1   :  { %12 = vsyncpa [#allocation5 + $0x1], 0 }
   0x2   :  { %13 = vsyncpa [#allocation8], 0 }
   0x3   :  { %14 = vsyncpa [#allocation6], 0 }
   0x4   :  { %16 = vsyncpa [#allocation6 + $0x1], 0 }
   0x5   :  { %17 = vsyncpa [#allocation12], 0 }
   0x6   :  { %19 = vsyncpa [#allocation12 + $0x1], 0  ;;  %s5861_s15 = smov 0   ;;  %s5863_s16 = smov 0  }
   0x7   :  { %s5865_s17 = smov 0   ;;  %s5867_s18 = smov 0  }
   0x8 LB: > { %s5882_s19 = sadd.s32 4294967295, %s5824_s18   ;;  %s4223_s20 = sadd.s32 4294967294, %s5824_s18   ;;  %s5824_s18 = sphi %s5867_s18, %s6650_s18   ;;  %s5820_s17 = sphi %s5865_s17, %s6649_s17   ;;  %s5816_s16 = sphi %s5863_s16, %s6648_s16   ;;  %s5812_s15 = sphi %s5861_s15, %s6647_s15  }
   0x9   : > { %p45_p0 = scmp.ne.s32.totalorder %s5816_s16, %s5812_s15  ;;  %p6631_p1 = scmp.eq.s32.totalorder %s5882_s19, 0 }
   0xa   : > { %p117_p3 = scmp.eq.s32.totalorder %s4223_s20, 1  ;;  %p4224_p5 = scmp.ge.s32.totalorder %s5824_s18, 1 }
   0xb   : > { %p5891_p4 = por %p6631_p1, %p45_p0  ;;  %p150_p7 = scmp.lt.s32.totalorder %s5824_s18, 3 }
   0xc   : > { %p5896_p6 = por %p117_p3, %p45_p0  ;;  %s5826_s24 = smov [#allocation7]  }
   0xd   : > { %s6634_s21 = scalar_select %p5891_p4, 1, 0 }
   0xe   : > { %s6635_s22 = scalar_select %p5896_p6, 1, 0 }
   0xf   : > { %p5901_p8 = pnand %p4224_p5, %p150_p7  ;;  %s162_s25 = sshll.u32 %s5826_s24, 4  ;;  %s5905_s25 = int_to_ptr.vmem [resolvable:$true] %s162_s25 }
  0x10   : > { %s5827_s27 = smov [#allocation9]   ;;  %s5636_s5 = scalar_lea.hbm %s6627_s1, 9216 }
  0x11   : > { %p5492_p9 = pneg %p5901_p8  ;;  %s176_s28 = sshll.u32 %s5827_s27, 4  ;;  %s5916_s28 = int_to_ptr.vmem [resolvable:$true] %s176_s28 }
  0x12   : > { %p5637_p12 = scmp.ne.s32.totalorder %s6627_s1, %s5636_s5  ;;  %p5643_p5 = scmp.lt.u32.totalorder %s5636_s5, %s6627_s1 }
  0x13   : > { %p5912_p11 = pnand %p5492_p9, %p6631_p1 }
  0x15   : > { %p5638_p13 = pneg %p5912_p11 }
  0x17   : > { %p5639_p0 = pnand %p5638_p13, %p5637_p12 }
  0x19   : > { %p5640_p3 = pneg %p5639_p0 }
  0x1b   : > { %p5645_p7 = pnand %p5643_p5, %p5640_p3 }
  0x1d   : > { %5648 = shalt.err (!%p5645_p7)
}
  0x1e   : > { %s5649_s10 = scalar_lea.vmem %s5905_s25, 9216  ;;  %p5657_p2 = scmp.lt.s32.totalorder %s5905_s25, %s5905_s25 }
  0x1f   : > { %p5650_p9 = scmp.ne.s32.totalorder %s5905_s25, %s5649_s10  ;;  %p5658_p12 = scmp.lt.s32.totalorder %s5649_s10, %s5649_s10 }
  0x21   : > { %p5652_p10 = pnand %p5650_p9, %p5638_p13  ;;  %p5659_p0 = por %p5658_p12, %p5657_p2 }
  0x23   : > { %p5653_p1 = pneg %p5652_p10 }
  0x25   : > { %p5660_p6 = pnand %p5659_p0, %p5653_p1 }
  0x27   : > { %5663 = shalt.err (!%p5660_p6)
}
  0x28   : > { %s5828_s11 = smov 64   ;;  %s5829_s12 = smov 4  }
  0x29   : > { %5495 = dma.hbm_to_vmem [thread:$0]  (!%p5912_p11), %s6627_s1, 9216, %s5905_s25, [#allocation8], %s5828_s11, %s5828_s11, %s5829_s12  }
  0x2a   : > { %s5664_s27 = scalar_lea.hbm %s6628_s2, 32 }
  0x2b   : > { %p5665_p1 = scmp.ne.s32.totalorder %s6628_s2, %s5664_s27  ;;  %p5671_p10 = scmp.lt.u32.totalorder %s5664_s27, %s6628_s2 }
  0x2d   : > { %p5667_p2 = pnand %p5665_p1, %p5638_p13 }
  0x2f   : > { %p5668_p6 = pneg %p5667_p2 }
  0x31   : > { %p5673_p3 = pnand %p5671_p10, %p5668_p6 }
  0x33   : > { %5676 = shalt.err (!%p5673_p3)
}
  0x34   : > { %s5677_s25 = scalar_lea.vmem %s5916_s28, 32  ;;  %p5685_p12 = scmp.lt.s32.totalorder %s5916_s28, %s5916_s28 }
  0x35   : > { %p5678_p5 = scmp.ne.s32.totalorder %s5916_s28, %s5677_s25  ;;  %p5686_p0 = scmp.lt.s32.totalorder %s5677_s25, %s5677_s25 }
  0x37   : > { %p5680_p7 = pnand %p5678_p5, %p5638_p13  ;;  %p5687_p1 = por %p5686_p0, %p5685_p12 }
  0x39   : > { %p5681_p9 = pneg %p5680_p7 }
  0x3b   : > { %p5688_p2 = pnand %p5687_p1, %p5681_p9 }
  0x3d   : > { %5691 = shalt.err (!%p5688_p2)
}
  0x3e   : > { %5498 = dma.hbm_to_vmem [thread:$0]  (!%p5912_p11), %s6628_s2, 32, %s5916_s28, [#allocation8]  }
  0x3f   : > { %s5974_s9 = sadd.s32 1, %s5824_s18   ;;  %s32_s26 = sadd.s32 1, %s5820_s17 }
  0x40   : > { %s29_s10 = ssub.s32 %s5824_s18, %s5974_s9  ;;  %p39_p13 = scmp.ne.s32.totalorder %s5820_s17, %s5816_s16 }
  0x41   : > { %p30_p6 = scmp.eq.s32.totalorder %s29_s10, 0  ;;  %p40_p10 = scmp.eq.s32.totalorder %s5824_s18, 0 }
  0x42   : > { %p6638_p3 = scmp.eq.s32.totalorder %s5882_s19, 1  ;;  %p5512_p7 = scmp.lt.s32.totalorder %s5824_s18, 2 }
  0x43   : > { %s5990_s14 = scalar_select %p30_p6, %s5820_s17, %s32_s26  }
  0x44   : > { %p5984_p5 = por %p6638_p3, %p39_p13  ;;  %p41_p9 = por %p40_p10, %p39_p13 }
  0x45   : > { %s187_s20 = sand.u32 1, %s5820_s17   ;;  %s4350_s28 = sshll.u32 %s5824_s18, 11 }
  0x46   : > { %s6639_s13 = scalar_select %p5984_p5, 1, 0 }
  0x47   : > { %s4228_s24 = sshll.u32 %s187_s20, 7  ;;  %s5997_s30 = scalar_lea.hbm %s6626_s0, %s4350_s28 }
  0x48   : > { %s191_s5 = scalar_lea.vmem [#allocation4], %s4228_s24  ;;  %p6001_p11 = pnand %p5512_p7, %p41_p9 }
  0x49   : > { %s198_s6 = sshll.u32 %s191_s5, 4  ;;  %s6005_s7 = scalar_lea.sflag [#allocation5], %s187_s20  ;;  %s5999_s6 = int_to_ptr.vmem [resolvable:$true] %s198_s6 }
  0x4a   : > { %s5692_s8 = scalar_lea.hbm %s5997_s30, 2048  ;;  %p5694_p0 = pneg %p6001_p11 }
  0x4b   : > { %p5693_p12 = scmp.ne.s32.totalorder %s5997_s30, %s5692_s8  ;;  %s5697_s24 = scalar_lea.hbm %s6626_s0, 4096 }
  0x4c   : > { %p5698_p13 = scmp.lt.u32.totalorder %s5997_s30, %s6626_s0  ;;  %p5699_p6 = scmp.lt.u32.totalorder %s5697_s24, %s5692_s8 }
  0x4d   : > { %p5695_p1 = pnand %p5694_p0, %p5693_p12  ;;  %p5701_p3 = scmp.lt.u32.totalorder %s5692_s8, %s5997_s30 }
  0x4e   : > { %p5700_p10 = por %p5699_p6, %p5698_p13 }
  0x4f   : > { %p5696_p2 = pneg %p5695_p1 }
  0x50   : > { %p5702_p7 = por %p5701_p3, %p5700_p10 }
  0x52   : > { %p5703_p9 = pnand %p5702_p7, %p5696_p2 }
  0x54   : > { %5706 = shalt.err (!%p5703_p9)
}
  0x55   : > { %s5707_s20 = scalar_lea.vmem %s5999_s6, 2048  ;;  %s5830_s29 = smov [#allocation4]  }
  0x56   : > { %p5708_p12 = scmp.ne.s32.totalorder %s5999_s6, %s5707_s20  ;;  %s5712_s5 = sshll.u32 %s5830_s29, 4  ;;  %s5713_s5 = int_to_ptr.vmem [resolvable:$false] %s5712_s5 }
  0x57   : > { %s5714_s26 = scalar_lea.vmem %s5713_s5, 4096  ;;  %p5715_p4 = scmp.lt.s32.totalorder %s5999_s6, %s5713_s5 }
  0x58   : > { %p5710_p1 = pnand %p5708_p12, %p5694_p0  ;;  %p5716_p13 = scmp.lt.s32.totalorder %s5714_s26, %s5707_s20 }
  0x5a   : > { %p5711_p5 = pneg %p5710_p1  ;;  %p5717_p6 = por %p5716_p13, %p5715_p4 }
  0x5c   : > { %p5718_p10 = pnand %p5717_p6, %p5711_p5 }
  0x5e   : > { %5721 = shalt.err (!%p5718_p10)
}
  0x5f   : > { %5502 = dma.hbm_to_vmem [thread:$0]  (!%p6001_p11), %s5997_s30, 2048, %s5999_s6, %s6005_s7, %s5828_s11, %s5828_s11, %s5829_s12  }
  0x60   : > { %210 = sbr.rel (%p5901_p8) target bundleno = 683 (0x2ab), region = 32  ;;  %s6039_s8 = sand.u32 (!%p5901_p8), 1, %s5816_s16  }
  0x61   : > { %s4232_s10 = sshll.u32 (!%p5901_p8), %s6039_s8, 7  ;;  %s213_s24 = scalar_lea.sflag (!%p5901_p8), [#allocation5], %s6039_s8 }
  0x62   : > { %s6045_s25 = scalar_lea.vmem (!%p5901_p8), [#allocation4], %s4232_s10  ;;  %p6641_p4 = scmp.ne.s32.totalorder (!%p5901_p8), %s6634_s21, 0 }
  0x67   : > { %5795 = dma.done.wait (%p6641_p4), %s213_s24, 2048  }
  0x68   : > { %5797 = vsyncadd (%p6641_p4), %s213_s24, 4294965248  ;;  %p6642_p5 = scmp.eq.s32.totalorder %s5882_s19, 0 }
  0x6a   : > { %5799 = dma.done.wait (%p6642_p5), [#allocation8], 9248   ;;  %p6643_p8 = pmov %p6642_p5 }
  0x6b   : > { %v5831_v0 = vmov 0.0   ;;  %v5555_v1 = vld [vmem:[#allocation7] sm:$0xff]   ;;  %v5557_v3 = vld [vmem:[#allocation7 + $0x8] sm:$0xff]   ;;  %v5559_v5 = vld [vmem:[#allocation7 + $0x10] sm:$0xff]   ;;  %s6522_s21 = scalar_lea.vmem [#allocation10], %s4232_s10  ;;  %s4383_s23 = sshll.u32 %s5882_s19, 11 }
  0x6c   : > { %5801 = vsyncadd (%p6643_p8), [#allocation8], 4294958048  ;;  %425 = vst [vmem:[#allocation2] sm:$0xff] %v5831_v0  ;;  %v5556_v2 = vld [vmem:[#allocation7 + $0x100] sm:$0xff]   ;;  %4774 = vmatprep.subr.bf16.mxu1 %v5555_v1  ;;  %v5558_v4 = vld [vmem:[#allocation7 + $0x108] sm:$0xff]   ;;  %s4086_s11 = sshll.u32 %s6522_s21, 4  ;;  %s6547_s6 = scalar_lea.hbm %s6629_s3, %s4383_s23  ;;  %s6549_s11 = int_to_ptr.vmem [resolvable:$true] %s4086_s11 }
  0x6d   : > { %426 = vst [vmem:[#allocation2 + $0x8] sm:$0xff] %v5831_v0  ;;  %427 = vst [vmem:[#allocation2 + $0x10] sm:$0x3] %v5831_v0  ;;  %4966 = vmatprep.subr.bf16.mxu0 %v5556_v2  ;;  %4775 = vmatpush3.bf16.msra.mxu1 %v5555_v1  ;;  %v5560_v6 = vld [vmem:[#allocation7 + $0x110] sm:$0xff]   ;;  %v5561_v7 = vld [vmem:[#allocation7 + $0x18] sm:$0xff]   ;;  %s4068_s7 = scalar_lea.sflag [#allocation6], %s6039_s8 }
  0x6e   : > { %429 = vst [vmem:[#allocation2 + $0x198] sm:$0xff] %v5831_v0  ;;  %430 = vst [vmem:[#allocation2 + $0x1a0] sm:$0xff] %v5831_v0  ;;  %4967 = vmatpush3.bf16.msra.mxu0 %v5556_v2  ;;  %4776 = vmatprep.subr.bf16.mxu1 %v5557_v3  ;;  %v5562_v8 = vld [vmem:[#allocation7 + $0x118] sm:$0xff]   ;;  %v5563_v9 = vld [vmem:[#allocation7 + $0x20] sm:$0xff]   ;;  %s5722_s28 = scalar_lea.vmem %s6549_s11, 2048  ;;  %p6644_p0 = scmp.ne.s32.totalorder %s6639_s13, 0 }
  0x6f   : > { %431 = vst [vmem:[#allocation2 + $0x1a8] sm:$0x3] %v5831_v0  ;;  %433 = vst [vmem:[#allocation2 + $0x18] sm:$0x1] %v5831_v0  ;;  %4968 = vmatprep.subr.bf16.mxu0 %v5558_v4  ;;  %v5564_v10 = vld [vmem:[#allocation7 + $0x120] sm:$0xff]   ;;  %v5565_v11 = vld [vmem:[#allocation7 + $0x28] sm:$0xff]   ;;  %p5723_p11 = scmp.ne.s32.totalorder %s6549_s11, %s5722_s28 }
  0x70   : > { %434 = vst [vmem:[#allocation2 + $0x30] sm:$0x1] %v5831_v0  ;;  %435 = vst [vmem:[#allocation2 + $0x48] sm:$0x1] %v5831_v0  ;;  %v4385_v13 = vld [vmem:[%s6045_s25] sm:$0xff]   ;;  %v5566_v15 = vld [vmem:[#allocation7 + $0x128] sm:$0xff]  }
  0x71   : > { %436 = vst [vmem:[#allocation2 + $0x60] sm:$0x1] %v5831_v0  ;;  %437 = vst [vmem:[#allocation2 + $0x78] sm:$0x1] %v5831_v0  ;;  %4777 = vmatpush3.bf16.msra.mxu1 %v5557_v3  ;;  %v6098_v14 = vld [vmem:[#allocation9] ss:$0 sm:$0xff]  ;;  %v4386_v17 = vunpack.c.l.bf16 %v4385_v13  ;;  %v4387_v18 = vunpack.c.h.bf16 %v4385_v13  ;;  %p5724_p2 = pnand %p5723_p11, %p6644_p0 }
  0x72   : > { %438 = vst [vmem:[#allocation2 + $0x90] sm:$0x1] %v5831_v0  ;;  %439 = vst [vmem:[#allocation2 + $0xa8] sm:$0x1] %v5831_v0  ;;  %4969 = vmatpush3.bf16.msra.mxu0 %v5558_v4  ;;  %4778 = vmatprep.subr.bf16.mxu1 %v5559_v5  ;;  %v6101_v19 = vld [vmem:[#allocation9 + $0x1] ss:$0 sm:$0xff] }
  0x73   : > { %440 = vst [vmem:[#allocation2 + $0xc0] sm:$0x1] %v5831_v0  ;;  %441 = vst [vmem:[#allocation2 + $0xd8] sm:$0x1] %v5831_v0  ;;  %4970 = vmatprep.subr.bf16.mxu0 %v5560_v6  ;;  %v4528_v20 = vld [vmem:[%s6045_s25 + $0x8] sm:$0xff]   ;;  %v324_v21 = vmul.f32 %v4386_v17, %v6098_v14  ;;  %v325_v22 = vmul.f32 %v4387_v18, %v6098_v14  ;;  %v5567_v25 = vld [vmem:[#allocation7 + $0x30] sm:$0xff]   ;;  %p5725_p3 = pneg %p5724_p2 }
  0x74   : > { %442 = vst [vmem:[#allocation2 + $0xf0] sm:$0x1] %v5831_v0  ;;  %443 = vst [vmem:[#allocation2 + $0x108] sm:$0x1] %v5831_v0  ;;  %v4390_v23 = vunpack.c.l.bf16 %v4528_v20  ;;  %v4391_v24 = vunpack.c.h.bf16 %v4528_v20  ;;  %v4529_v26 = vld [vmem:[%s6045_s25 + $0x10] sm:$0xff]   ;;  %v4530_v34 = vld [vmem:[%s6045_s25 + $0x18] sm:$0xff]  }
  0x75   : > { %444 = vst [vmem:[#allocation2 + $0x120] sm:$0x1] %v5831_v0  ;;  %445 = vst [vmem:[#allocation2 + $0x138] sm:$0x1] %v5831_v0  ;;  %4779 = vmatpush3.bf16.msra.mxu1 %v5559_v5  ;;  %v5568_v27 = vld [vmem:[#allocation7 + $0x130] sm:$0xff]   ;;  %v361_v28 = vadd.f32 %v6101_v19, %v324_v21  ;;  %v362_v29 = vadd.f32 %v6101_v19, %v325_v22  ;;  %v4394_v32 = vunpack.c.l.bf16 %v4529_v26  ;;  %v4395_v33 = vunpack.c.h.bf16 %v4529_v26  ;;  %v5569_v35 = vld [vmem:[#allocation7 + $0x38] sm:$0xff]  }
  0x76   : > { %446 = vst [vmem:[#allocation2 + $0x150] sm:$0x1] %v5831_v0  ;;  %447 = vst [vmem:[#allocation2 + $0x168] sm:$0x1] %v5831_v0  ;;  %4971 = vmatpush3.bf16.msra.mxu0 %v5560_v6  ;;  %4780 = vmatprep.subr.bf16.mxu1 %v5561_v7  ;;  %v326_v30 = vmul.f32 %v4390_v23, %v6098_v14  ;;  %v327_v31 = vmul.f32 %v4391_v24, %v6098_v14  ;;  %v4398_v42 = vunpack.c.l.bf16 %v4530_v34  ;;  %v4531_v44 = vld [vmem:[%s6045_s25 + $0x20] sm:$0xff]   ;;  %v5570_v45 = vld [vmem:[#allocation7 + $0x138] sm:$0xff]  }
  0x77   : > { %448 = vst [vmem:[#allocation2 + $0x180] sm:$0x1] %v5831_v0  ;;  %451 = vst [vmem:[#allocation2 + $0x29] sm:$0x1] %v5831_v0  ;;  %4972 = vmatprep.subr.bf16.mxu0 %v5562_v8  ;;  %v393_v36 = vmax.f32 %v361_v28, 0.0  ;;  %v394_v37 = vmax.f32 %v362_v29, 0.0  ;;  %v328_v40 = vmul.f32 %v4394_v32, %v6098_v14  ;;  %v329_v41 = vmul.f32 %v4395_v33, %v6098_v14 }
  0x78   : > { %452 = vst [vmem:[#allocation2 + $0x41] sm:$0x1] %v5831_v0  ;;  %453 = vst [vmem:[#allocation2 + $0x59] sm:$0x1] %v5831_v0  ;;  %v363_v38 = vadd.f32 %v6101_v19, %v326_v30  ;;  %v364_v39 = vadd.f32 %v6101_v19, %v327_v31  ;;  %v4399_v43 = vunpack.c.h.bf16 %v4530_v34  ;;  %v4402_v49 = vunpack.c.l.bf16 %v4531_v44  ;;  %v4532_v50 = vld [vmem:[%s6045_s25 + $0x28] sm:$0xff]   ;;  %v5571_v55 = vld [vmem:[#allocation7 + $0x40] sm:$0xff]  }
  0x79   : > { %454 = vst [vmem:[#allocation2 + $0x71] sm:$0x1] %v5831_v0  ;;  %455 = vst [vmem:[#allocation2 + $0x89] sm:$0x1] %v5831_v0  ;;  %4781 = vmatpush3.bf16.msra.mxu1 %v5561_v7  ;;  %v6117_v46 = vpack.c.bf16 %v394_v37, %v393_v36  ;;  %v365_v51 = vadd.f32 %v6101_v19, %v328_v40  ;;  %v366_v52 = vadd.f32 %v6101_v19, %v329_v41  ;;  %v5572_v59 = vld [vmem:[#allocation7 + $0x140] sm:$0xff]   ;;  %v4534_v5 = vld [vmem:[%s6045_s25 + $0x38] sm:$0xff]  }
  0x7a   : > { %456 = vst [vmem:[#allocation2 + $0xa1] sm:$0x1] %v5831_v0  ;;  %457 = vst [vmem:[#allocation2 + $0xb9] sm:$0x1] %v5831_v0  ;;  %4973 = vmatpush3.bf16.msra.mxu0 %v5562_v8  ;;  %4782 = vmatprep.subr.bf16.mxu1 %v5563_v9  ;;  %v395_v47 = vmax.f32 %v363_v38, 0.0  ;;  %v396_v48 = vmax.f32 %v364_v39, 0.0  ;;  %v330_v53 = vmul.f32 %v4398_v42, %v6098_v14  ;;  %v4403_v56 = vunpack.c.h.bf16 %v4531_v44 }
  0x7b   : > { %458 = vst [vmem:[#allocation2 + $0xd1] sm:$0x1] %v5831_v0  ;;  %459 = vst [vmem:[#allocation2 + $0xe9] sm:$0x1] %v5831_v0  ;;  %4974 = vmatprep.subr.bf16.mxu0 %v5564_v10  ;;  %v331_v54 = vmul.f32 %v4399_v43, %v6098_v14  ;;  %4982 = vmatprep.mubr.bf16.mxu0 %v6117_v46  ;;  %v332_v57 = vmul.f32 %v4402_v49, %v6098_v14  ;;  %v4406_v58 = vunpack.c.l.bf16 %v4532_v50  ;;  %v5573_v17 = vld [vmem:[#allocation7 + $0x148] sm:$0xff]   ;;  %v4535_v28 = vld [vmem:[%s6045_s25 + $0x40] sm:$0xff]  }
  0x7c   : > { %460 = vst [vmem:[#allocation2 + $0x101] sm:$0x1] %v5831_v0  ;;  %461 = vst [vmem:[#allocation2 + $0x119] sm:$0x1] %v5831_v0  ;;  %v397_v60 = vmax.f32 %v365_v51, 0.0  ;;  %v398_v61 = vmax.f32 %v366_v52, 0.0  ;;  %v6127_v62 = vadd.f32 %v6101_v19, %v330_v53  ;;  %v333_v1 = vmul.f32 %v4403_v56, %v6098_v14 }
  0x7d   : > { %462 = vst [vmem:[#allocation2 + $0x131] sm:$0x1] %v5831_v0  ;;  %463 = vst [vmem:[#allocation2 + $0x149] sm:$0x1] %v5831_v0  ;;  %4783 = vmatpush3.bf16.msra.mxu1 %v5563_v9  ;;  %v6130_v63 = vadd.f32 %v6101_v19, %v331_v54  ;;  %v6135_v2 = vadd.f32 %v6101_v19, %v332_v57  ;;  %v4407_v3 = vunpack.c.h.bf16 %v4532_v50  ;;  %v4414_v22 = vunpack.c.l.bf16 %v4534_v5  ;;  %v5574_v24 = vld [vmem:[#allocation7 + $0x48] sm:$0xff]   ;;  %v4537_v54 = vld [vmem:[%s6045_s25 + $0x50] sm:$0xff]  }
  0x7e   : > { %464 = vst [vmem:[#allocation2 + $0x161] sm:$0x1] %v5831_v0  ;;  %465 = vst [vmem:[#allocation2 + $0x179] sm:$0x1] %v5831_v0  ;;  %4975 = vmatpush3.bf16.msra.mxu0 %v5564_v10  ;;  %4784 = vmatprep.subr.bf16.mxu1 %v5565_v11  ;;  %v334_v4 = vmul.f32 %v4406_v58, %v6098_v14  ;;  %v6139_v6 = vpack.c.bf16 %v396_v48, %v395_v47  ;;  %v399_v7 = vmax.f32 %v6127_v62, 0.0  ;;  %v4536_v42 = vld [vmem:[%s6045_s25 + $0x48] sm:$0xff]  }
  0x7f   : > { %466 = vst [vmem:[#allocation2 + $0x191] sm:$0x1] %v5831_v0  ;;  %432 = vst [vmem:[#allocation2] sm:$0x1] %v5831_v0  ;;  %4976 = vmatprep.subr.bf16.mxu0 %v5566_v15  ;;  %v400_v8 = vmax.f32 %v6130_v63, 0.0  ;;  %v6144_v10 = vadd.f32 %v6101_v19, %v333_v1  ;;  %v6151_v18 = vpack.c.bf16 %v398_v61, %v397_v60  ;;  %v4415_v33 = vunpack.c.h.bf16 %v4534_v5  ;;  %s5832_s27 = smov [#allocation10]  }
  0x80   : > { %449 = vst [vmem:[#allocation2 + $0x198] sm:$0x1] %v5831_v0  ;;  %450 = vst [vmem:[#allocation2 + $0x11] sm:$0x1] %v5831_v0  ;;  %v6149_v13 = vadd.f32 %v6101_v19, %v334_v4  ;;  %v338_v34 = vmul.f32 %v4414_v22, %v6098_v14  ;;  %v4419_v49 = vunpack.c.h.bf16 %v4535_v28  ;;  %v4426_v4 = vunpack.c.l.bf16 %v4537_v54  ;;  %s5726_s20 = sshll.u32 %s5832_s27, 4  ;;  %s5727_s20 = int_to_ptr.vmem [resolvable:$false] %s5726_s20 }
  0x81   : > { %467 = vst [vmem:[#allocation2 + $0x1a9] sm:$0x1] %v5831_v0  ;;  %4785 = vmatpush3.bf16.msra.mxu1 %v5565_v11  ;;  %469 = vst [vmem:[#allocation2 + $0x19] sm:$0xff] %v393_v36  ;;  %v401_v11 = vmax.f32 %v6135_v2, 0.0  ;;  %v339_v40 = vmul.f32 %v4415_v33, %v6098_v14  ;;  %s5728_s29 = scalar_lea.vmem %s5727_s20, 4096  ;;  %p5729_p7 = scmp.lt.s32.totalorder %s6549_s11, %s5727_s20 }
  0x82   : > { %4977 = vmatpush3.bf16.msra.mxu0 %v5566_v15  ;;  %4786 = vmatprep.subr.bf16.mxu1 %v5567_v25  ;;  %470 = vst [vmem:[#allocation2 + $0x21] sm:$0xff] %v394_v37  ;;  %471 = vst [vmem:[#allocation2 + $0x31] sm:$0xff] %v395_v47  ;;  %v5575_v37 = vld [vmem:[#allocation7 + $0x150] sm:$0xff]   ;;  %v6179_v41 = vadd.f32 %v6101_v19, %v338_v34  ;;  %v341_v58 = vmul.f32 %v4419_v49, %v6098_v14  ;;  %p5730_p9 = scmp.lt.s32.totalorder %s5728_s29, %s5722_s28 }
  0x83   : > { %4978 = vmatprep.subr.bf16.mxu0 %v5568_v27  ;;  %472 = vst [vmem:[#allocation2 + $0x39] sm:$0xff] %v396_v48  ;;  %473 = vst [vmem:[#allocation2 + $0x49] sm:$0xff] %v397_v60  ;;  %v5577_v47 = vld [vmem:[#allocation7 + $0x50] sm:$0xff]   ;;  %v4418_v48 = vunpack.c.l.bf16 %v4535_v28  ;;  %v6194_v52 = vadd.f32 %v6101_v19, %v339_v40  ;;  %v4423_v60 = vunpack.c.h.bf16 %v4536_v42 }
  0x84   : > { %474 = vst [vmem:[#allocation2 + $0x51] sm:$0xff] %v398_v61  ;;  %475 = vst [vmem:[#allocation2 + $0x61] sm:$0xff] %v399_v7  ;;  %v407_v53 = vmax.f32 %v6179_v41, 0.0  ;;  %p5731_p12 = por %p5730_p9, %p5729_p7 }
  0x85   : > { %4787 = vmatpush3.bf16.msra.mxu1 %v5567_v25  ;;  %476 = vst [vmem:[#allocation2 + $0x69] sm:$0xff] %v400_v8  ;;  %v402_v25 = vmax.f32 %v6144_v10, 0.0  ;;  %477 = vst [vmem:[#allocation2 + $0x79] sm:$0xff] %v401_v11  ;;  %v340_v57 = vmul.f32 %v4418_v48, %v6098_v14  ;;  %v408_v63 = vmax.f32 %v6194_v52, 0.0  ;;  %v343_v5 = vmul.f32 %v4423_v60, %v6098_v14  ;;  %v5580_v10 = vld [vmem:[#allocation7 + $0x58] sm:$0xff]  }
  0x86   : > { %v501_v12 = vld [vmem:[#allocation2] sm:$0xff]  ;;  %4979 = vmatpush3.bf16.msra.mxu0 %v5568_v27  ;;  %4788 = vmatprep.subr.bf16.mxu1 %v5569_v35  ;;  %v403_v27 = vmax.f32 %v6149_v13, 0.0  ;;  %483 = vst [vmem:[#allocation2 + $0xc1] sm:$0xff] %v407_v53  ;;  %p5732_p1 = pnand %p5731_p12, %p5725_p3 }
  0x87   : > { %v533_v16 = vpack.c.bf16 %v5831_v0, %v501_v12  ;;  %v4533_v0 = vld [vmem:[%s6045_s25 + $0x30] sm:$0xff]   ;;  %4980 = vmatprep.subr.bf16.mxu0 %v5570_v45  ;;  %v335_v12 = vmul.f32 %v4407_v3, %v6098_v14  ;;  %478 = vst [vmem:[#allocation2 + $0x81] sm:$0xff] %v402_v25  ;;  %v6204_v62 = vpack.c.bf16 %v402_v25, %v401_v11  ;;  %484 = vst [vmem:[#allocation2 + $0xc9] sm:$0xff] %v408_v63 }
  0x88   : > { %v4410_v9 = vunpack.c.l.bf16 %v4533_v0  ;;  %v503_v15 = vld [vmem:[#allocation2 + $0x18] sm:$0xff]  ;;  %v4411_v20 = vunpack.c.h.bf16 %v4533_v0  ;;  %479 = vst [vmem:[#allocation2 + $0x91] sm:$0xff] %v403_v27  ;;  %v5576_v0 = vld [vmem:[#allocation7 + $0x158] sm:$0xff]   ;;  %v6210_v1 = vadd.f32 %v6101_v19, %v340_v57  ;;  %v6213_v3 = vadd.f32 %v6101_v19, %v341_v58 }
  0x89   : > { %4790 = vmatprep.mubr.bf16.mxu1 %v533_v16  ;;  %4789 = vmatpush3.bf16.msra.mxu1 %v5569_v35  ;;  %v504_v16 = vld [vmem:[#allocation2 + $0x20] sm:$0xff]  ;;  %v6158_v26 = vadd.f32 %v6101_v19, %v335_v12  ;;  %v505_v29 = vld [vmem:[#allocation2 + $0x30] sm:$0xff] }
  0x8a   : > { %4981 = vmatpush3.bf16.msra.mxu0 %v5570_v45  ;;  %4822 = vmatprep.subr.bf16.mxu1 %v5571_v55  ;;  %v336_v21 = vmul.f32 %v4410_v9, %v6098_v14  ;;  %v534_v23 = vpack.c.bf16 %v504_v16, %v503_v15  ;;  %v506_v30 = vld [vmem:[#allocation2 + $0x38] sm:$0xff]  ;;  %v337_v31 = vmul.f32 %v4411_v20, %v6098_v14  ;;  %v507_v43 = vld [vmem:[#allocation2 + $0x48] sm:$0xff]  ;;  %v5578_v9 = vld [vmem:[#allocation7 + $0x160] sm:$0xff]   ;;  %v409_v11 = vmax.f32 %v6210_v1, 0.0 }
  0x8b   : > { %5014 = vmatprep.subr.bf16.mxu0 %v5572_v59  ;;  %v6168_v35 = vpack.c.bf16 %v506_v30, %v505_v29  ;;  %v404_v36 = vmax.f32 %v6158_v26, 0.0  ;;  %v508_v44 = vld [vmem:[#allocation2 + $0x50] sm:$0xff]  ;;  %v6183_v45 = vpack.c.bf16 %v400_v8, %v399_v7  ;;  %v4427_v7 = vunpack.c.h.bf16 %v4537_v54  ;;  %v4538_v16 = vld [vmem:[%s6045_s25 + $0x58] sm:$0xff]  }
  0x8c   : > { %v6164_v32 = vadd.f32 %v6101_v19, %v336_v21  ;;  %4791 = vmatmul.mubr.bf16.vlgmr.msra.gmra.mrb[0].mxu1 %v534_v23  ;;  %v6174_v38 = vadd.f32 %v6101_v19, %v337_v31  ;;  %v6188_v50 = vpack.c.bf16 %v508_v44, %v507_v43  ;;  %v510_v56 = vld [vmem:[#allocation2 + $0x68] sm:$0xff]  ;;  %v511_v8 = vld [vmem:[#allocation2 + $0x78] sm:$0xff]  ;;  %v410_v12 = vmax.f32 %v6213_v3, 0.0  ;;  %485 = vst [vmem:[#allocation2 + $0xd9] sm:$0xff] %v409_v11 }
  0x8d   : > { %4983 = vmatmul.mubr.bf16.vlgmr.msra.gmra.mrb[0].mxu0 %v6139_v6  ;;  %4823 = vmatpush3.bf16.msra.mxu1 %v5571_v55  ;;  %480 = vst [vmem:[#allocation2 + $0x99] sm:$0xff] %v404_v36  ;;  %v509_v55 = vld [vmem:[#allocation2 + $0x60] sm:$0xff]  ;;  %v6229_v20 = vadd.f32 %v6101_v19, %v343_v5  ;;  %v344_v21 = vmul.f32 %v4426_v4, %v6098_v14  ;;  %v4430_v23 = vunpack.c.l.bf16 %v4538_v16  ;;  %v4431_v33 = vunpack.c.h.bf16 %v4538_v16  ;;  %v4540_v44 = vld [vmem:[%s6045_s25 + $0x68] sm:$0xff]   ;;  %v5582_v3 = vld [vmem:[#allocation7 + $0x178] sm:$0xff]  }
  0x8e   : > { %5015 = vmatpush3.bf16.msra.mxu0 %v5572_v59  ;;  %v405_v39 = vmax.f32 %v6164_v32, 0.0  ;;  %4794 = vmatprep.mubr.bf16.mxu1 %v6168_v35  ;;  %v406_v51 = vmax.f32 %v6174_v38, 0.0  ;;  %v4422_v59 = vunpack.c.l.bf16 %v4536_v42  ;;  %v6200_v61 = vpack.c.bf16 %v510_v56, %v509_v55  ;;  %486 = vst [vmem:[#allocation2 + $0xe1] sm:$0xff] %v410_v12  ;;  %v4541_v55 = vld [vmem:[%s6045_s25 + $0x70] sm:$0xff]   ;;  %v5583_v56 = vld [vmem:[#allocation7 + $0x60] sm:$0xff]  }
  0x8f   : > { %5016 = vmatprep.subr.bf16.mxu0 %v5573_v17  ;;  %4986 = vmatprep.mubr.bf16.mxu0 %v6151_v18  ;;  %v345_v22 = vmul.f32 %v4427_v7, %v6098_v14  ;;  %v6239_v25 = vpack.c.bf16 %v404_v36, %v403_v27  ;;  %v513_v28 = vld [vmem:[#allocation2 + $0x90] sm:$0xff]  ;;  %v412_v13 = vmax.f32 %v6229_v20, 0.0  ;;  %v6252_v26 = vadd.f32 %v6101_v19, %v344_v21  ;;  %v517_v21 = vld [vmem:[#allocation2 + $0xc0] sm:$0xff] }
  0x90   : > { %4824 = vmatprep.subr.bf16.mxu1 %v5574_v24  ;;  %481 = vst [vmem:[#allocation2 + $0xa9] sm:$0xff] %v405_v39  ;;  %482 = vst [vmem:[#allocation2 + $0xb1] sm:$0xff] %v406_v51  ;;  %v342_v2 = vmul.f32 %v4422_v59, %v6098_v14  ;;  %v6243_v30 = vpack.c.bf16 %v406_v51, %v405_v39  ;;  %v346_v32 = vmul.f32 %v4430_v23, %v6098_v14  ;;  %v6284_v59 = vld [vmem:[#allocation7 + $0x68] sm:$0xff]  }
  0x91   : > { %4825 = vmatpush3.bf16.msra.mxu1 %v5574_v24  ;;  %v4539_v24 = vld [vmem:[%s6045_s25 + $0x60] sm:$0xff]   ;;  %v6255_v27 = vadd.f32 %v6101_v19, %v345_v22  ;;  %v347_v36 = vmul.f32 %v4431_v33, %v6098_v14  ;;  %488 = vst [vmem:[#allocation2 + $0xf9] sm:$0xff] %v412_v13  ;;  %v413_v40 = vmax.f32 %v6252_v26, 0.0  ;;  %v4438_v54 = vunpack.c.l.bf16 %v4540_v44  ;;  %v518_v22 = vld [vmem:[#allocation2 + $0xc8] sm:$0xff] }
  0x92   : > { %5017 = vmatpush3.bf16.msra.mxu0 %v5573_v17  ;;  %4826 = vmatprep.subr.bf16.mxu1 %v5577_v47  ;;  %v6224_v15 = vadd.f32 %v6101_v19, %v342_v2  ;;  %v512_v17 = vld [vmem:[#allocation2 + $0x80] sm:$0xff]  ;;  %v4435_v38 = vunpack.c.h.bf16 %v4539_v24  ;;  %v6270_v43 = vadd.f32 %v6101_v19, %v346_v32  ;;  %v4439_v58 = vunpack.c.h.bf16 %v4540_v44  ;;  %v5584_v26 = vld [vmem:[#allocation7 + $0x180] sm:$0xff]  }
  0x93   : > { %5018 = vmatprep.subr.bf16.mxu0 %v5575_v37  ;;  %v6258_v34 = vpack.c.bf16 %v512_v17, %v511_v8  ;;  %v414_v42 = vmax.f32 %v6255_v27, 0.0  ;;  %v384_v48 = vadd.f32 %v6101_v19, %v347_v36  ;;  %489 = vst [vmem:[#allocation2 + $0x109] sm:$0xff] %v413_v40  ;;  %v350_v4 = vmul.f32 %v4438_v54, %v6098_v14  ;;  %v5581_v17 = vld [vmem:[#allocation7 + $0x170] sm:$0xff]   ;;  %v519_v27 = vld [vmem:[#allocation2 + $0xd8] sm:$0xff] }
  0x94   : > { %4795 = vmatmul.mubr.bf16.gmra.mrb[4].mxu1 %v6188_v50  ;;  %v514_v29 = vld [vmem:[#allocation2 + $0x98] sm:$0xff]  ;;  %v411_v31 = vmax.f32 %v6224_v15, 0.0  ;;  %v349_v51 = vmul.f32 %v4435_v38, %v6098_v14  ;;  %v415_v57 = vmax.f32 %v6270_v43, 0.0  ;;  %v351_v8 = vmul.f32 %v4439_v58, %v6098_v14  ;;  %v2319_v33 = vld [vmem:[#allocation2 + $0x22] sm:$0xff] }
  0x95   : > { %4987 = vmatmul.mubr.bf16.gmra.mrb[4].mxu0 %v6183_v45  ;;  %4798 = vmatprep.mubr.bf16.mxu1 %v6200_v61  ;;  %v6263_v39 = vpack.c.bf16 %v514_v29, %v513_v28  ;;  %490 = vst [vmem:[#allocation2 + $0x111] sm:$0xff] %v414_v42  ;;  %v416_v60 = vmax.f32 %v384_v48, 0.0  ;;  %v4443_v16 = vunpack.c.h.bf16 %v4541_v55  ;;  %v6297_v28 = vpack.c.bf16 %v408_v63, %v407_v53  ;;  %v2318_v29 = vld [vmem:[#allocation2 + $0x1a] sm:$0xff] }
  0x96   : > { %5019 = vmatpush3.bf16.msra.mxu0 %v5575_v37  ;;  %4990 = vmatprep.mubr.bf16.mxu0 %v6204_v62  ;;  %487 = vst [vmem:[#allocation2 + $0xf1] sm:$0xff] %v411_v31  ;;  %v4434_v37 = vunpack.c.l.bf16 %v4539_v24  ;;  %v386_v2 = vadd.f32 %v6101_v19, %v349_v51  ;;  %491 = vst [vmem:[#allocation2 + $0x121] sm:$0xff] %v415_v57  ;;  %v388_v32 = vadd.f32 %v6101_v19, %v351_v8  ;;  %v5587_v51 = vld [vmem:[#allocation7 + $0x70] sm:$0xff]  }
  0x97   : > { %5020 = vmatprep.subr.bf16.mxu0 %v5576_v0  ;;  %4827 = vmatpush3.bf16.msra.mxu1 %v5577_v47  ;;  %v5579_v47 = vld [vmem:[#allocation7 + $0x168] sm:$0xff]   ;;  %v515_v5 = vld [vmem:[#allocation2 + $0xa8] sm:$0xff]  ;;  %v516_v7 = vld [vmem:[#allocation2 + $0xb0] sm:$0xff]  ;;  %492 = vst [vmem:[#allocation2 + $0x129] sm:$0xff] %v416_v60  ;;  %v6308_v41 = vpack.c.bf16 %v410_v12, %v409_v11  ;;  %v6314_v52 = vpack.c.bf16 %v412_v13, %v411_v31 }
  0x98   : > { %4828 = vmatprep.subr.bf16.mxu1 %v5580_v10  ;;  %v348_v49 = vmul.f32 %v4434_v37, %v6098_v14  ;;  %v418_v24 = vmax.f32 %v386_v2, 0.0  ;;  %v353_v37 = vmul.f32 %v4443_v16, %v6098_v14  ;;  %v6302_v38 = vpack.c.bf16 %v516_v7, %v515_v5  ;;  %v2320_v31 = vld [vmem:[#allocation2 + $0x32] sm:$0xff]  ;;  %v2321_v13 = vld [vmem:[#allocation2 + $0x3a] sm:$0xff]  ;;  %v2324_v5 = vld [vmem:[#allocation2 + $0x62] sm:$0xff] }
  0x99   : > { %v6316_v53 = vpack.c.bf16 %v518_v22, %v517_v21  ;;  %v420_v63 = vmax.f32 %v388_v32, 0.0  ;;  %v6321_v11 = vpack.c.bf16 %v2319_v33, %v2318_v29  ;;  %v6327_v12 = vpack.c.bf16 %v414_v42, %v413_v40  ;;  %v520_v40 = vld [vmem:[#allocation2 + $0xe0] sm:$0xff]  ;;  %v2325_v7 = vld [vmem:[#allocation2 + $0x6a] sm:$0xff] }
  0x9a   : > { %5021 = vmatpush3.bf16.msra.mxu0 %v5576_v0  ;;  %v385_v0 = vadd.f32 %v6101_v19, %v348_v49  ;;  %494 = vst [vmem:[#allocation2 + $0x141] sm:$0xff] %v418_v24  ;;  %v390_v1 = vadd.f32 %v6101_v19, %v353_v37  ;;  %v6329_v15 = vpack.c.bf16 %v416_v60, %v415_v57  ;;  %v2323_v57 = vld [vmem:[#allocation2 + $0x52] sm:$0xff]  ;;  %v2326_v8 = vld [vmem:[#allocation2 + $0x7a] sm:$0xff]  ;;  %v5589_v16 = vld [vmem:[#allocation7 + $0x78] sm:$0xff]  }
  0x9b   : > { %5022 = vmatprep.subr.bf16.mxu0 %v5578_v9  ;;  %4829 = vmatpush3.bf16.msra.mxu1 %v5580_v10  ;;  %v4442_v10 = vunpack.c.l.bf16 %v4541_v55  ;;  %496 = vst [vmem:[#allocation2 + $0x159] sm:$0xff] %v420_v63  ;;  %v6342_v58 = vpack.c.bf16 %v520_v40, %v519_v27  ;;  %v6344_v60 = vpack.c.bf16 %v2321_v13, %v2320_v31  ;;  %v6352_v21 = vld [vmem:[#allocation7 + $0x80] sm:$0xff]  }
  0x9c   : > { %4799 = vmatmul.mubr.bf16.gmra.mrb[8].mxu1 %v6258_v34  ;;  %v417_v23 = vmax.f32 %v385_v0, 0.0  ;;  %4830 = vmatprep.subr.bf16.mxu1 %v5583_v56  ;;  %v422_v48 = vmax.f32 %v390_v1, 0.0  ;;  %v524_v22 = vld [vmem:[#allocation2 + $0x110] sm:$0xff]  ;;  %v5590_v1 = vld [vmem:[#allocation7 + $0x198] sm:$0xff]  }
  0x9d   : > { %4991 = vmatmul.mubr.bf16.gmra.mrb[8].mxu0 %v6239_v25  ;;  %4802 = vmatprep.mubr.bf16.mxu1 %v6263_v39  ;;  %v352_v36 = vmul.f32 %v4442_v10, %v6098_v14  ;;  %v521_v54 = vld [vmem:[#allocation2 + $0xf0] sm:$0xff]  ;;  %v522_v55 = vld [vmem:[#allocation2 + $0xf8] sm:$0xff]  ;;  %v2327_v10 = vld [vmem:[#allocation2 + $0x82] sm:$0xff] }
  0x9e   : > { %5023 = vmatpush3.bf16.msra.mxu0 %v5578_v9  ;;  %4994 = vmatprep.mubr.bf16.mxu0 %v6243_v30  ;;  %v387_v9 = vadd.f32 %v6101_v19, %v350_v4  ;;  %493 = vst [vmem:[#allocation2 + $0x139] sm:$0xff] %v417_v23  ;;  %v6331_v20 = vpack.c.bf16 %v418_v24, %v417_v23  ;;  %498 = vst [vmem:[#allocation2 + $0x171] sm:$0xff] %v422_v48  ;;  %v5586_v4 = vld [vmem:[#allocation7 + $0x188] sm:$0xff]   ;;  %v525_v23 = vld [vmem:[#allocation2 + $0x120] sm:$0xff] }
  0x9f   : > { %5024 = vmatprep.subr.bf16.mxu0 %v5579_v47  ;;  %4831 = vmatpush3.bf16.msra.mxu1 %v5583_v56  ;;  %v389_v44 = vadd.f32 %v6101_v19, %v352_v36  ;;  %v2322_v56 = vld [vmem:[#allocation2 + $0x4a] sm:$0xff]  ;;  %v6346_v0 = vpack.c.bf16 %v522_v55, %v521_v54  ;;  %v6359_v36 = vpack.c.bf16 %v2325_v7, %v2324_v5  ;;  %v2328_v13 = vld [vmem:[#allocation2 + $0x92] sm:$0xff]  ;;  %v2332_v7 = vld [vmem:[#allocation2 + $0xc2] sm:$0xff] }
  0xa0   : > { %v419_v43 = vmax.f32 %v387_v9, 0.0  ;;  %4832 = vmatprep.subr.bf16.mxu1 %v6284_v59  ;;  %v6348_v2 = vpack.c.bf16 %v2323_v57, %v2322_v56  ;;  %v526_v24 = vld [vmem:[#allocation2 + $0x128] sm:$0xff]  ;;  %v6361_v37 = vpack.c.bf16 %v2327_v10, %v2326_v8  ;;  %v2331_v40 = vld [vmem:[#allocation2 + $0xb2] sm:$0xff] }
  0xa1   : > { %v4542_v9 = vld [vmem:[%s6045_s25 + $0x78] sm:$0xff]   ;;  %v5594_v10 = vld [vmem:[#allocation7 + $0x1a8] sm:$0xff]  }
  0xa2   : > { %5025 = vmatpush3.bf16.msra.mxu0 %v5579_v47  ;;  %495 = vst [vmem:[#allocation2 + $0x151] sm:$0xff] %v419_v43  ;;  %v421_v47 = vmax.f32 %v389_v44, 0.0  ;;  %v6333_v49 = vpack.c.bf16 %v420_v63, %v419_v43  ;;  %v4446_v29 = vunpack.c.l.bf16 %v4542_v9  ;;  %v4447_v33 = vunpack.c.h.bf16 %v4542_v9  ;;  %v2330_v27 = vld [vmem:[#allocation2 + $0xaa] sm:$0xff]  ;;  %v5596_v9 = vld [vmem:[#allocation7 + $0x1b0] sm:$0xff]  }
  0xa3   : > { %5026 = vmatprep.subr.bf16.mxu0 %v5581_v17  ;;  %4833 = vmatpush3.bf16.msra.mxu1 %v6284_v59  ;;  %v523_v59 = vld [vmem:[#allocation2 + $0x108] sm:$0xff]  ;;  %v6363_v43 = vpack.c.bf16 %v526_v24, %v525_v23  ;;  %v6390_v5 = vpack.c.bf16 %v2331_v40, %v2330_v27  ;;  %v2334_v23 = vld [vmem:[#allocation2 + $0xda] sm:$0xff] }
  0xa4   : > { %4803 = vmatmul.mubr.bf16.gmra.mrb[12].mxu1 %v6302_v38  ;;  %497 = vst [vmem:[#allocation2 + $0x169] sm:$0xff] %v421_v47  ;;  %v6338_v42 = vpack.c.bf16 %v422_v48, %v421_v47  ;;  %4834 = vmatprep.subr.bf16.mxu1 %v5587_v51  ;;  %v6357_v32 = vpack.c.bf16 %v524_v22, %v523_v59  ;;  %v2329_v47 = vld [vmem:[#allocation2 + $0x9a] sm:$0xff]  ;;  %v2333_v8 = vld [vmem:[#allocation2 + $0xca] sm:$0xff]  ;;  %v2335_v24 = vld [vmem:[#allocation2 + $0xe2] sm:$0xff] }
  0xa5   : > { %4995 = vmatmul.mubr.bf16.gmra.mrb[12].mxu0 %v6297_v28  ;;  %4806 = vmatprep.mubr.bf16.mxu1 %v6316_v53  ;;  %v354_v63 = vmul.f32 %v4446_v29, %v6098_v14  ;;  %v355_v44 = vmul.f32 %v4447_v33, %v6098_v14  ;;  %v528_v31 = vld [vmem:[#allocation2 + $0x140] sm:$0xff]  ;;  %v6386_v57 = vpack.c.bf16 %v2329_v47, %v2328_v13  ;;  %v2338_v13 = vld [vmem:[#allocation2 + $0x10a] sm:$0xff]  ;;  %v2339_v47 = vld [vmem:[#allocation2 + $0x112] sm:$0xff] }
  0xa6   : > { %5027 = vmatpush3.bf16.msra.mxu0 %v5581_v17  ;;  %5030 = vmatprep.mubr.bf16.mxu0 %v6321_v11  ;;  %v5588_v17 = vld [vmem:[#allocation7 + $0x190] sm:$0xff]   ;;  %v6398_v33 = vpack.c.bf16 %v2333_v8, %v2332_v7  ;;  %v6409_v40 = vpack.c.bf16 %v2339_v47, %v2338_v13  ;;  %v2341_v7 = vld [vmem:[#allocation2 + $0x12a] sm:$0xff] }
  0xa7   : > { %5028 = vmatprep.subr.bf16.mxu0 %v5582_v3  ;;  %4835 = vmatpush3.bf16.msra.mxu1 %v5587_v51  ;;  %v6369_v48 = vadd.f32 %v6101_v19, %v354_v63  ;;  %v838_v59 = vld [vmem:[#allocation2 + $0x1] sm:$0xff] }
  0xa8   : > { %4836 = vmatprep.subr.bf16.mxu1 %v5589_v16  ;;  %v2342_v8 = vld [vmem:[#allocation2 + $0x13a] sm:$0xff] }
  0xa9   : > { %v529_v51 = vld [vmem:[#allocation2 + $0x150] sm:$0xff]  ;;  %v423_v14 = vmax.f32 %v6369_v48, 0.0  ;;  %v530_v55 = vld [vmem:[#allocation2 + $0x158] sm:$0xff] }
  0xaa   : > { %5029 = vmatpush3.bf16.msra.mxu0 %v5582_v3  ;;  %v527_v3 = vld [vmem:[#allocation2 + $0x138] sm:$0xff] }
  0xab   : > { %5062 = vmatprep.subr.bf16.mxu0 %v5584_v26  ;;  %4837 = vmatpush3.bf16.msra.mxu1 %v5589_v16  ;;  %499 = vst [vmem:[#allocation2 + $0x181] sm:$0xff] %v423_v14  ;;  %v6384_v56 = vpack.c.bf16 %v528_v31, %v527_v3  ;;  %v531_v16 = vld [vmem:[#allocation2 + $0x168] sm:$0xff]  ;;  %v532_v22 = vld [vmem:[#allocation2 + $0x170] sm:$0xff]  ;;  %v2337_v31 = vld [vmem:[#allocation2 + $0xfa] sm:$0xff] }
  0xac   : > { %4807 = vmatmul.mubr.bf16.gmra.mrb[16].mxu1 %v6342_v58  ;;  %4870 = vmatprep.subr.bf16.mxu1 %v6352_v21  ;;  %v6396_v29 = vpack.c.bf16 %v532_v22, %v531_v16  ;;  %v2336_v3 = vld [vmem:[#allocation2 + $0xf2] sm:$0xff]  ;;  %v5595_v16 = vld [vmem:[#allocation7 + $0x90] sm:$0xff]   ;;  %v2346_v22 = vld [vmem:[#allocation2 + $0x16a] sm:$0xff] }
  0xad   : > { %5031 = vmatmul.mubr.bf16.vlgmr.msra.gmra.mrb[0].mxu0 %v6344_v60  ;;  %4810 = vmatprep.mubr.bf16.mxu1 %v6346_v0  ;;  %v6407_v27 = vpack.c.bf16 %v2337_v31, %v2336_v3  ;;  %v5603_v31 = vld [vmem:[#allocation7 + $0xb0] sm:$0xff]   ;;  %v5602_v48 = vld [vmem:[#allocation7 + $0x1c8] sm:$0xff]  }
  0xae   : > { %5063 = vmatpush3.bf16.msra.mxu0 %v5584_v26  ;;  %5034 = vmatprep.mubr.bf16.mxu0 %v6348_v2  ;;  %v6372_v26 = vadd.f32 %v6101_v19, %v355_v44  ;;  %v5592_v19 = vld [vmem:[#allocation7 + $0x1a0] sm:$0xff]   ;;  %v6400_v44 = vpack.c.bf16 %v2335_v24, %v2334_v23 }
  0xaf   : > { %5064 = vmatprep.subr.bf16.mxu0 %v5586_v4  ;;  %v2347_v23 = vld [vmem:[#allocation2 + $0x172] sm:$0xff] }
  0xb0   : > { %v424_v54 = vmax.f32 %v6372_v26, 0.0  ;;  %v5599_v24 = vld [vmem:[#allocation7 + $0xa0] sm:$0xff]  }
  0xb2   : > { %5065 = vmatpush3.bf16.msra.mxu0 %v5586_v4  ;;  %500 = vst [vmem:[#allocation2 + $0x189] sm:$0xff] %v424_v54  ;;  %v6388_v4 = vpack.c.bf16 %v530_v55, %v529_v51  ;;  %v6405_v51 = vld [vmem:[#allocation7 + $0x1c0] sm:$0xff]   ;;  %v5593_v55 = vld [vmem:[#allocation7 + $0x88] sm:$0xff]   ;;  %v6437_v3 = vpack.c.bf16 %v424_v54, %v423_v14  ;;  %v5621_v54 = vld [vmem:[#allocation7 + $0xf8] sm:$0xff]  }
  0xb3   : > { %5066 = vmatprep.subr.bf16.mxu0 %v5588_v17 }
  0xb4   : > { %4811 = vmatmul.mubr.bf16.gmra.mrb[20].mxu1 %v6357_v32 }
  0xb5   : > { %5035 = vmatmul.mubr.bf16.gmra.mrb[4].mxu0 %v6359_v36  ;;  %4814 = vmatprep.mubr.bf16.mxu1 %v6363_v43 }
  0xb6   : > { %5038 = vmatprep.mubr.bf16.mxu0 %v6361_v37  ;;  %5067 = vmatpush3.bf16.msra.mxu0 %v5588_v17  ;;  %v839_v17 = vld [vmem:[#allocation2 + $0x9] sm:$0xff] }
  0xb7   : > { %5068 = vmatprep.subr.bf16.mxu0 %v5590_v1  ;;  %v870_v63 = vpack.c.bf16 %v839_v17, %v838_v59 }
  0xba   : > { %5069 = vmatpush3.bf16.msra.mxu0 %v5590_v1  ;;  %v5598_v1 = vld [vmem:[#allocation7 + $0x1b8] sm:$0xff]  }
  0xbb   : > { %5070 = vmatprep.subr.bf16.mxu0 %v5592_v19 }
  0xbc   : > { %4815 = vmatmul.mubr.bf16.gmra.mrb[24].mxu1 %v6384_v56 }
  0xbd   : > { %5039 = vmatmul.mubr.bf16.gmra.mrb[8].mxu0 %v6386_v57  ;;  %4818 = vmatprep.mubr.bf16.mxu1 %v6388_v4 }
  0xbe   : > { %5042 = vmatprep.mubr.bf16.mxu0 %v6390_v5  ;;  %5071 = vmatpush3.bf16.msra.mxu0 %v5592_v19  ;;  %v2340_v19 = vld [vmem:[#allocation2 + $0x122] sm:$0xff] }
  0xbf   : > { %5072 = vmatprep.subr.bf16.mxu0 %v5594_v10  ;;  %v6417_v59 = vpack.c.bf16 %v2341_v7, %v2340_v19  ;;  %v3067_v19 = vld [vmem:[#allocation2 + $0x91] sm:$0xff]  ;;  %v3068_v7 = vld [vmem:[#allocation2 + $0x99] sm:$0xff] }
  0xc2   : > { %5073 = vmatpush3.bf16.msra.mxu0 %v5594_v10  ;;  %v2343_v10 = vld [vmem:[#allocation2 + $0x142] sm:$0xff] }
  0xc3   : > { %5074 = vmatprep.subr.bf16.mxu0 %v5596_v9  ;;  %v6419_v17 = vpack.c.bf16 %v2343_v10, %v2342_v8  ;;  %v5620_v8 = vld [vmem:[#allocation7 + $0x210] sm:$0xff]  }
  0xc4   : > { %4819 = vmatmul.mubr.bf16.gmra.mrb[28].mxu1 %v6396_v29 }
  0xc5   : > { %5043 = vmatmul.mubr.bf16.gmra.mrb[12].mxu0 %v6398_v33  ;;  %4838 = vmatprep.mubr.bf16.mxu1 %v870_v63  ;;  %v6427_v63 = vpack.c.bf16 %v2347_v23, %v2346_v22  ;;  %v5623_v22 = vld [vmem:[#allocation7 + $0x220] sm:$0xff]  }
  0xc6   : > { %5046 = vmatprep.mubr.bf16.mxu0 %v6400_v44  ;;  %5075 = vmatpush3.bf16.msra.mxu0 %v5596_v9 }
  0xc7   : > { %5076 = vmatprep.subr.bf16.mxu0 %v5598_v1 }
  0xca   : > { %5077 = vmatpush3.bf16.msra.mxu0 %v5598_v1  ;;  %v2349_v1 = vld [vmem:[#allocation2 + $0x18a] sm:$0xff] }
  0xcb   : > { %5110 = vmatprep.subr.bf16.mxu0 %v6405_v51 }
  0xcc   : > { %4839 = vmatmul.mubr.bf16.vlgmr.msra.gmra.mrb[0].mxu1 %v6117_v46  ;;  %v5597_v46 = vld [vmem:[#allocation7 + $0x98] sm:$0xff]  }
  0xcd   : > { %5047 = vmatmul.mubr.bf16.gmra.mrb[16].mxu0 %v6407_v27  ;;  %4871 = vmatpush3.bf16.msra.mxu1 %v6352_v21  ;;  %v2345_v21 = vld [vmem:[#allocation2 + $0x15a] sm:$0xff] }
  0xce   : > { %4842 = vmatprep.mubr.bf16.mxu1 %v6139_v6  ;;  %5050 = vmatprep.mubr.bf16.mxu0 %v6409_v40  ;;  %v2344_v6 = vld [vmem:[#allocation2 + $0x152] sm:$0xff] }
  0xcf   : > { %4872 = vmatprep.subr.bf16.mxu1 %v5593_v55  ;;  %v6425_v9 = vpack.c.bf16 %v2345_v21, %v2344_v6  ;;  %v3071_v6 = vld [vmem:[#allocation2 + $0xc1] sm:$0xff]  ;;  %v3072_v21 = vld [vmem:[#allocation2 + $0xc9] sm:$0xff] }
  0xd1   : > { %4873 = vmatpush3.bf16.msra.mxu1 %v5593_v55  ;;  %v6474_v55 = vld [vmem:[#allocation7 + $0x100] sm:$0xff]  }
  0xd2   : > { %4874 = vmatprep.subr.bf16.mxu1 %v5595_v16 }
  0xd4   : > { %4843 = vmatmul.mubr.bf16.gmra.mrb[4].mxu1 %v6151_v18  ;;  %v5601_v18 = vld [vmem:[#allocation7 + $0xa8] sm:$0xff]  }
  0xd5   : > { %5051 = vmatmul.mubr.bf16.gmra.mrb[20].mxu0 %v6417_v59  ;;  %4846 = vmatprep.mubr.bf16.mxu1 %v6183_v45  ;;  %v2348_v45 = vld [vmem:[#allocation2 + $0x182] sm:$0xff] }
  0xd6   : > { %5054 = vmatprep.mubr.bf16.mxu0 %v6419_v17  ;;  %4875 = vmatpush3.bf16.msra.mxu1 %v5595_v16  ;;  %v2365_v13 = vpack.c.bf16 %v2349_v1, %v2348_v45  ;;  %v3095_v16 = vpack.c.bf16 %v3068_v7, %v3067_v19  ;;  %v1578_v45 = vld [vmem:[#allocation2 + $0x18] sm:$0xff]  ;;  %v1579_v1 = vld [vmem:[#allocation2 + $0x20] sm:$0xff] }
  0xd7   : > { %4876 = vmatprep.subr.bf16.mxu1 %v5597_v46  ;;  %v3089_v19 = vld [vmem:[#allocation2 + $0x199] sm:$0xff]  ;;  %v3090_v7 = vld [vmem:[#allocation2 + $0x1a1] sm:$0xff] }
  0xda   : > { %4877 = vmatpush3.bf16.msra.mxu1 %v5597_v46  ;;  %v5622_v46 = vld [vmem:[#allocation7 + $0x218] sm:$0xff]  }
  0xdb   : > { %4878 = vmatprep.subr.bf16.mxu1 %v5599_v24 }
  0xdc   : > { %4847 = vmatmul.mubr.bf16.gmra.mrb[8].mxu1 %v6204_v62  ;;  %v5605_v62 = vld [vmem:[#allocation7 + $0xb8] sm:$0xff]  }
  0xdd   : > { %5055 = vmatmul.mubr.bf16.gmra.mrb[24].mxu0 %v6425_v9  ;;  %4850 = vmatprep.mubr.bf16.mxu1 %v6239_v25  ;;  %v5607_v25 = vld [vmem:[#allocation7 + $0xc0] sm:$0xff]  }
  0xde   : > { %5058 = vmatprep.mubr.bf16.mxu0 %v6427_v63  ;;  %4879 = vmatpush3.bf16.msra.mxu1 %v5599_v24  ;;  %v3097_v24 = vpack.c.bf16 %v3072_v21, %v3071_v6  ;;  %v3106_v6 = vpack.c.bf16 %v3090_v7, %v3089_v19  ;;  %v3449_v19 = vld [vmem:[#allocation2 + $0x122] sm:$0xff]  ;;  %v3450_v7 = vld [vmem:[#allocation2 + $0x12a] sm:$0xff] }
  0xdf   : > { %4880 = vmatprep.subr.bf16.mxu1 %v5601_v18 }
  0xe2   : > { %4881 = vmatpush3.bf16.msra.mxu1 %v5601_v18  ;;  %v5624_v18 = vld [vmem:[#allocation7 + $0x228] sm:$0xff]  }
  0xe3   : > { %4882 = vmatprep.subr.bf16.mxu1 %v5603_v31 }
  0xe4   : > { %4851 = vmatmul.mubr.bf16.gmra.mrb[12].mxu1 %v6243_v30  ;;  %v5604_v30 = vld [vmem:[#allocation7 + $0x1d0] sm:$0xff]  }
  0xe5   : > { %5059 = vmatmul.mubr.bf16.gmra.mrb[28].mxu0 %v2365_v13  ;;  %4854 = vmatprep.mubr.bf16.mxu1 %v6297_v28  ;;  %v5610_v28 = vld [vmem:[#allocation7 + $0x1e8] sm:$0xff]  }
  0xe6   : > { %5078 = vmatprep.mubr.bf16.mxu0 %v6168_v35  ;;  %4883 = vmatpush3.bf16.msra.mxu1 %v5603_v31  ;;  %v5606_v35 = vld [vmem:[#allocation7 + $0x1d8] sm:$0xff]   ;;  %v3075_v31 = vld [vmem:[#allocation2 + $0xf1] sm:$0xff]  ;;  %v3076_v13 = vld [vmem:[#allocation2 + $0xf9] sm:$0xff] }
  0xe7   : > { %4884 = vmatprep.subr.bf16.mxu1 %v5605_v62 }
  0xea   : > { %4885 = vmatpush3.bf16.msra.mxu1 %v5605_v62  ;;  %v5625_v62 = vld [vmem:[#allocation7 + $0x230] sm:$0xff]  }
  0xeb   : > { %4918 = vmatprep.subr.bf16.mxu1 %v5607_v25 }
  0xec   : > { %4855 = vmatmul.mubr.bf16.gmra.mrb[16].mxu1 %v6308_v41  ;;  %v5612_v41 = vld [vmem:[#allocation7 + $0x1f0] sm:$0xff]  }
  0xed   : > { %5079 = vmatmul.mubr.bf16.vlgmr.msra.gmra.mrb[0].mxu0 %v6188_v50  ;;  %4858 = vmatprep.mubr.bf16.mxu1 %v6314_v52  ;;  %v5608_v50 = vld [vmem:[#allocation7 + $0x1e0] sm:$0xff]   ;;  %v5614_v52 = vld [vmem:[#allocation7 + $0x1f8] sm:$0xff]  }
  0xee   : > { %5111 = vmatpush3.bf16.msra.mxu0 %v6405_v51  ;;  %5082 = vmatprep.mubr.bf16.mxu0 %v6200_v61  ;;  %v1208_v61 = vld [vmem:[#allocation2 + $0x2] sm:$0xff]  ;;  %v5618_v51 = vld [vmem:[#allocation7 + $0x208] sm:$0xff]  }
  0xef   : > { %5112 = vmatprep.subr.bf16.mxu0 %v5602_v48 }
  0xf2   : > { %5113 = vmatpush3.bf16.msra.mxu0 %v5602_v48  ;;  %v1610_v48 = vpack.c.bf16 %v1579_v1, %v1578_v45  ;;  %v3433_v45 = vld [vmem:[#allocation2 + $0x62] sm:$0xff]  ;;  %v3434_v1 = vld [vmem:[#allocation2 + $0x6a] sm:$0xff] }
  0xf3   : > { %5114 = vmatprep.subr.bf16.mxu0 %v5604_v30 }
  0xf4   : > { %4859 = vmatmul.mubr.bf16.gmra.mrb[20].mxu1 %v6327_v12  ;;  %v5611_v12 = vld [vmem:[#allocation7 + $0xd0] sm:$0xff]  }
  0xf5   : > { %5083 = vmatmul.mubr.bf16.gmra.mrb[4].mxu0 %v6258_v34  ;;  %4862 = vmatprep.mubr.bf16.mxu1 %v6329_v15  ;;  %v1209_v34 = vld [vmem:[#allocation2 + $0xa] sm:$0xff] }
  0xf6   : > { %5086 = vmatprep.mubr.bf16.mxu0 %v6263_v39  ;;  %5115 = vmatpush3.bf16.msra.mxu0 %v5604_v30  ;;  %v1240_v39 = vpack.c.bf16 %v1209_v34, %v1208_v61  ;;  %v5613_v15 = vld [vmem:[#allocation7 + $0xd8] sm:$0xff]   ;;  %v6485_v30 = vpack.c.bf16 %v3076_v13, %v3075_v31  ;;  %v1583_v34 = vld [vmem:[#allocation2 + $0x50] sm:$0xff] }
  0xf7   : > { %5116 = vmatprep.subr.bf16.mxu0 %v5606_v35  ;;  %v1582_v61 = vld [vmem:[#allocation2 + $0x48] sm:$0xff] }
  0xf8   : > { %v5635_v31 = vld [vmem:[#allocation7 + $0x138] sm:$0xff]  }
  0xfa   : > { %5117 = vmatpush3.bf16.msra.mxu0 %v5606_v35  ;;  %v1581_v35 = vld [vmem:[#allocation2 + $0x38] sm:$0xff] }
  0xfb   : > { %5118 = vmatprep.subr.bf16.mxu0 %v5608_v50 }
  0xfc   : > { %4863 = vmatmul.mubr.bf16.gmra.mrb[24].mxu1 %v6331_v20  ;;  %v2718_v20 = vld [vmem:[#allocation2 + $0x188] sm:$0xff] }
  0xfd   : > { %5087 = vmatmul.mubr.bf16.gmra.mrb[8].mxu0 %v6302_v38  ;;  %4866 = vmatprep.mubr.bf16.mxu1 %v6333_v49  ;;  %v5616_v38 = vld [vmem:[#allocation7 + $0x200] sm:$0xff]  }
  0xfe   : > { %5090 = vmatprep.mubr.bf16.mxu0 %v6316_v53  ;;  %5119 = vmatpush3.bf16.msra.mxu0 %v5608_v50  ;;  %v5609_v53 = vld [vmem:[#allocation7 + $0xc8] sm:$0xff]   ;;  %v5615_v49 = vld [vmem:[#allocation7 + $0xe0] sm:$0xff]  }
  0xff   : > { %5120 = vmatprep.subr.bf16.mxu0 %v5610_v28  ;;  %v3077_v50 = vld [vmem:[#allocation2 + $0x109] sm:$0xff] }
 0x102   : > { %5121 = vmatpush3.bf16.msra.mxu0 %v5610_v28  ;;  %v3078_v28 = vld [vmem:[#allocation2 + $0x111] sm:$0xff] }
 0x103   : > { %5122 = vmatprep.subr.bf16.mxu0 %v5612_v41 }
 0x104   : > { %4867 = vmatmul.mubr.bf16.gmra.mrb[28].mxu1 %v6338_v42 }
 0x105   : > { %5091 = vmatmul.mubr.bf16.gmra.mrb[12].mxu0 %v6342_v58  ;;  %4886 = vmatprep.mubr.bf16.mxu1 %v1240_v39  ;;  %v3080_v39 = vld [vmem:[#allocation2 + $0x129] sm:$0xff] }
 0x106   : > { %5094 = vmatprep.mubr.bf16.mxu0 %v6346_v0  ;;  %5123 = vmatpush3.bf16.msra.mxu0 %v5612_v41  ;;  %v2719_v0 = vld [vmem:[#allocation2 + $0x198] sm:$0xff]  ;;  %v3079_v41 = vld [vmem:[#allocation2 + $0x121] sm:$0xff] }
 0x107   : > { %5124 = vmatprep.subr.bf16.mxu0 %v5614_v52 }
 0x10a   : > { %5125 = vmatpush3.bf16.msra.mxu0 %v5614_v52 }
 0x10b   : > { %5158 = vmatprep.subr.bf16.mxu0 %v5616_v38 }
 0x10c   : > { %4887 = vmatmul.mubr.bf16.vlgmr.msra.gmra.mrb[0].mxu1 %v6321_v11  ;;  %v2717_v11 = vld [vmem:[#allocation2 + $0x180] sm:$0xff] }
 0x10d   : > { %5095 = vmatmul.mubr.bf16.gmra.mrb[16].mxu0 %v6357_v32  ;;  %4919 = vmatpush3.bf16.msra.mxu1 %v5607_v25  ;;  %v6466_v58 = vpack.c.bf16 %v2718_v20, %v2717_v11  ;;  %v3060_v32 = vld [vmem:[#allocation2 + $0x39] sm:$0xff]  ;;  %v3082_v20 = vld [vmem:[#allocation2 + $0x141] sm:$0xff] }
 0x10e   : > { %4890 = vmatprep.mubr.bf16.mxu1 %v6344_v60  ;;  %5098 = vmatprep.mubr.bf16.mxu0 %v6363_v43  ;;  %v5617_v60 = vld [vmem:[#allocation7 + $0xe8] sm:$0xff]   ;;  %v5627_v43 = vld [vmem:[#allocation2 + $0x8] sm:$0xff] }
 0x10f   : > { %4920 = vmatprep.subr.bf16.mxu1 %v5609_v53  ;;  %v2736_v26 = vpack.c.bf16 %v5627_v43, %v2719_v0  ;;  %v3081_v11 = vld [vmem:[#allocation2 + $0x139] sm:$0xff] }
 0x110   : > { %v1587_v0 = vld [vmem:[#allocation2 + $0x80] sm:$0xff]  ;;  %v6497_v43 = vpack.c.bf16 %v3082_v20, %v3081_v11  ;;  %v1604_v11 = vld [vmem:[#allocation2 + $0x150] sm:$0xff]  ;;  %v1605_v20 = vld [vmem:[#allocation2 + $0x158] sm:$0xff] }
 0x111   : > { %4921 = vmatpush3.bf16.msra.mxu1 %v5609_v53  ;;  %v1612_v53 = vpack.c.bf16 %v1583_v34, %v1582_v61  ;;  %v1602_v61 = vld [vmem:[#allocation2 + $0x138] sm:$0xff]  ;;  %v1603_v34 = vld [vmem:[#allocation2 + $0x140] sm:$0xff] }
 0x112   : > { %4922 = vmatprep.subr.bf16.mxu1 %v5611_v12 }
 0x114   : > { %4891 = vmatmul.mubr.bf16.gmra.mrb[4].mxu1 %v6348_v2  ;;  %v3059_v2 = vld [vmem:[#allocation2 + $0x31] sm:$0xff] }
 0x115   : > { %5099 = vmatmul.mubr.bf16.gmra.mrb[20].mxu0 %v6384_v56  ;;  %4894 = vmatprep.mubr.bf16.mxu1 %v6359_v36  ;;  %v5619_v36 = vld [vmem:[#allocation7 + $0xf0] sm:$0xff]   ;;  %v3091_v14 = vpack.c.bf16 %v3060_v32, %v3059_v2  ;;  %v3062_v56 = vld [vmem:[#allocation2 + $0x51] sm:$0xff] }
 0x116   : > { %5102 = vmatprep.mubr.bf16.mxu0 %v6388_v4  ;;  %4923 = vmatpush3.bf16.msra.mxu1 %v5611_v12  ;;  %v3064_v4 = vld [vmem:[#allocation2 + $0x69] sm:$0xff]  ;;  %v1584_v12 = vld [vmem:[#allocation2 + $0x60] sm:$0xff]  ;;  %v3083_v2 = vld [vmem:[#allocation2 + $0x151] sm:$0xff] }
 0x117   : > { %4924 = vmatprep.subr.bf16.mxu1 %v5613_v15  ;;  %v3084_v32 = vld [vmem:[#allocation2 + $0x159] sm:$0xff] }
 0x11a   : > { %4925 = vmatpush3.bf16.msra.mxu1 %v5613_v15  ;;  %v1585_v15 = vld [vmem:[#allocation2 + $0x68] sm:$0xff] }
 0x11b   : > { %4926 = vmatprep.subr.bf16.mxu1 %v5615_v49 }
 0x11c   : > { %4895 = vmatmul.mubr.bf16.gmra.mrb[8].mxu1 %v6361_v37  ;;  %v3061_v37 = vld [vmem:[#allocation2 + $0x49] sm:$0xff] }
 0x11d   : > { %5103 = vmatmul.mubr.bf16.gmra.mrb[24].mxu0 %v6396_v29  ;;  %4898 = vmatprep.mubr.bf16.mxu1 %v6386_v57  ;;  %v3063_v57 = vld [vmem:[#allocation2 + $0x61] sm:$0xff]  ;;  %v3092_v29 = vpack.c.bf16 %v3062_v56, %v3061_v37  ;;  %v1588_v37 = vld [vmem:[#allocation2 + $0x90] sm:$0xff]  ;;  %v1589_v56 = vld [vmem:[#allocation2 + $0x98] sm:$0xff] }
 0x11e   : > { %5106 = vmatprep.mubr.bf16.mxu0 %v6466_v58  ;;  %4927 = vmatpush3.bf16.msra.mxu1 %v5615_v49  ;;  %v3093_v47 = vpack.c.bf16 %v3064_v4, %v3063_v57  ;;  %v1586_v49 = vld [vmem:[#allocation2 + $0x78] sm:$0xff]  ;;  %v1590_v57 = vld [vmem:[#allocation2 + $0xa8] sm:$0xff]  ;;  %v1591_v4 = vld [vmem:[#allocation2 + $0xb0] sm:$0xff] }
 0x11f   : > { %4928 = vmatprep.subr.bf16.mxu1 %v5617_v60 }
 0x122   : > { %4929 = vmatpush3.bf16.msra.mxu1 %v5617_v60  ;;  %v5629_v60 = vld [vmem:[#allocation7 + $0x108] sm:$0xff]  }
 0x123   : > { %4930 = vmatprep.subr.bf16.mxu1 %v5619_v36 }
 0x124   : > { %4899 = vmatmul.mubr.bf16.gmra.mrb[12].mxu1 %v6390_v5  ;;  %v3065_v5 = vld [vmem:[#allocation2 + $0x79] sm:$0xff] }
 0x125   : > { %5107 = vmatmul.mubr.bf16.gmra.mrb[28].mxu0 %v2736_v26  ;;  %4902 = vmatprep.mubr.bf16.mxu1 %v6398_v33  ;;  %v3066_v33 = vld [vmem:[#allocation2 + $0x81] sm:$0xff]  ;;  %v1614_v26 = vpack.c.bf16 %v1587_v0, %v1586_v49  ;;  %v3439_v49 = vld [vmem:[#allocation2 + $0xaa] sm:$0xff] }
 0x126   : > { %5126 = vmatprep.mubr.bf16.mxu0 %v3091_v14  ;;  %4931 = vmatpush3.bf16.msra.mxu1 %v5619_v36  ;;  %v3094_v10 = vpack.c.bf16 %v3066_v33, %v3065_v5  ;;  %v1613_v36 = vpack.c.bf16 %v1585_v15, %v1584_v12  ;;  %v6499_v14 = vpack.c.bf16 %v3084_v32, %v3083_v2  ;;  %v1592_v5 = vld [vmem:[#allocation2 + $0xc0] sm:$0xff]  ;;  %v1593_v33 = vld [vmem:[#allocation2 + $0xc8] sm:$0xff]  ;;  %v1607_v2 = vld [vmem:[#allocation2 + $0x170] sm:$0xff] }
 0x127   : > { %4932 = vmatprep.subr.bf16.mxu1 %v5621_v54  ;;  %v1622_v12 = vpack.c.bf16 %v1603_v34, %v1602_v61  ;;  %v1606_v0 = vld [vmem:[#allocation2 + $0x168] sm:$0xff] }
 0x128   : > { %v3441_v32 = vld [vmem:[#allocation2 + $0xc2] sm:$0xff] }
 0x12a   : > { %4933 = vmatpush3.bf16.msra.mxu1 %v5621_v54  ;;  %v5630_v54 = vld [vmem:[#allocation7 + $0x110] sm:$0xff]  }
 0x12b   : > { %5206 = vmatprep.subr.bf16.mxu1 %v6474_v55 }
 0x12c   : > { %4903 = vmatmul.mubr.bf16.gmra.mrb[16].mxu1 %v6400_v44  ;;  %v3069_v44 = vld [vmem:[#allocation2 + $0xa9] sm:$0xff] }
 0x12d   : > { %5127 = vmatmul.mubr.bf16.vlgmr.msra.gmra.mrb[0].mxu0 %v3092_v29  ;;  %4906 = vmatprep.mubr.bf16.mxu1 %v6407_v27  ;;  %v3070_v27 = vld [vmem:[#allocation2 + $0xb1] sm:$0xff]  ;;  %v5631_v29 = vld [vmem:[#allocation7 + $0x118] sm:$0xff]  }
 0x12e   : > { %5159 = vmatpush3.bf16.msra.mxu0 %v5616_v38  ;;  %5130 = vmatprep.mubr.bf16.mxu0 %v3093_v47  ;;  %v3096_v23 = vpack.c.bf16 %v3070_v27, %v3069_v44  ;;  %v6490_v38 = vpack.c.bf16 %v3078_v28, %v3077_v50  ;;  %v1615_v47 = vpack.c.bf16 %v1589_v56, %v1588_v37  ;;  %v5633_v44 = vld [vmem:[#allocation7 + $0x128] sm:$0xff]   ;;  %v3436_v28 = vld [vmem:[#allocation2 + $0x82] sm:$0xff] }
 0x12f   : > { %5160 = vmatprep.subr.bf16.mxu0 %v5618_v51  ;;  %v1617_v27 = vpack.c.bf16 %v1593_v33, %v1592_v5  ;;  %v3435_v50 = vld [vmem:[#allocation2 + $0x7a] sm:$0xff]  ;;  %v1624_v37 = vpack.c.bf16 %v1607_v2, %v1606_v0  ;;  %v3447_v5 = vld [vmem:[#allocation2 + $0x10a] sm:$0xff]  ;;  %v3448_v33 = vld [vmem:[#allocation2 + $0x112] sm:$0xff] }
 0x132   : > { %5161 = vmatpush3.bf16.msra.mxu0 %v5618_v51  ;;  %v1616_v51 = vpack.c.bf16 %v1591_v4, %v1590_v57  ;;  %v3443_v57 = vld [vmem:[#allocation2 + $0xda] sm:$0xff]  ;;  %v3444_v4 = vld [vmem:[#allocation2 + $0xe2] sm:$0xff] }
 0x133   : > { %5162 = vmatprep.subr.bf16.mxu0 %v5620_v8 }
 0x134   : > { %4907 = vmatmul.mubr.bf16.gmra.mrb[20].mxu1 %v6409_v40  ;;  %v3073_v40 = vld [vmem:[#allocation2 + $0xd9] sm:$0xff] }
 0x135   : > { %5131 = vmatmul.mubr.bf16.gmra.mrb[4].mxu0 %v3094_v10  ;;  %4910 = vmatprep.mubr.bf16.mxu1 %v6417_v59  ;;  %v3074_v59 = vld [vmem:[#allocation2 + $0xe1] sm:$0xff] }
 0x136   : > { %5134 = vmatprep.mubr.bf16.mxu0 %v3095_v16  ;;  %5163 = vmatpush3.bf16.msra.mxu0 %v5620_v8  ;;  %v6483_v25 = vpack.c.bf16 %v3074_v59, %v3073_v40  ;;  %v1594_v8 = vld [vmem:[#allocation2 + $0xd8] sm:$0xff]  ;;  %v1595_v10 = vld [vmem:[#allocation2 + $0xe0] sm:$0xff]  ;;  %v1598_v40 = vld [vmem:[#allocation2 + $0x108] sm:$0xff] }
 0x137   : > { %5164 = vmatprep.subr.bf16.mxu0 %v5622_v46  ;;  %v3429_v16 = vld [vmem:[#allocation2 + $0x32] sm:$0xff]  ;;  %v1618_v21 = vpack.c.bf16 %v1595_v10, %v1594_v8  ;;  %v3470_v8 = vpack.c.bf16 %v3448_v33, %v3447_v5  ;;  %v3471_v10 = vpack.c.bf16 %v3450_v7, %v3449_v19 }
 0x138   : > { %v1599_v59 = vld [vmem:[#allocation2 + $0x110] sm:$0xff] }
 0x13a   : > { %5165 = vmatpush3.bf16.msra.mxu0 %v5622_v46  ;;  %v3430_v46 = vld [vmem:[#allocation2 + $0x3a] sm:$0xff] }
 0x13b   : > { %5166 = vmatprep.subr.bf16.mxu0 %v5623_v22 }
 0x13c   : > { %4911 = vmatmul.mubr.bf16.gmra.mrb[24].mxu1 %v6419_v17  ;;  %v5626_v17 = vld [vmem:[#allocation7 + $0x238] sm:$0xff]  }
 0x13d   : > { %5135 = vmatmul.mubr.bf16.gmra.mrb[8].mxu0 %v3096_v23  ;;  %4914 = vmatprep.mubr.bf16.mxu1 %v6425_v9  ;;  %v1580_v9 = vld [vmem:[#allocation2 + $0x30] sm:$0xff] }
 0x13e   : > { %5138 = vmatprep.mubr.bf16.mxu0 %v3097_v24  ;;  %5167 = vmatpush3.bf16.msra.mxu0 %v5623_v22  ;;  %v1611_v52 = vpack.c.bf16 %v1581_v35, %v1580_v9  ;;  %v3461_v22 = vpack.c.bf16 %v3430_v46, %v3429_v16  ;;  %v1596_v23 = vld [vmem:[#allocation2 + $0xf0] sm:$0xff]  ;;  %v1600_v9 = vld [vmem:[#allocation2 + $0x120] sm:$0xff]  ;;  %v1601_v35 = vld [vmem:[#allocation2 + $0x128] sm:$0xff] }
 0x13f   : > { %5168 = vmatprep.subr.bf16.mxu0 %v5624_v18  ;;  %v3431_v24 = vld [vmem:[#allocation2 + $0x4a] sm:$0xff]  ;;  %v3451_v16 = vld [vmem:[#allocation2 + $0x13a] sm:$0xff]  ;;  %v3452_v46 = vld [vmem:[#allocation2 + $0x142] sm:$0xff] }
 0x142   : > { %5169 = vmatpush3.bf16.msra.mxu0 %v5624_v18  ;;  %v3432_v18 = vld [vmem:[#allocation2 + $0x52] sm:$0xff] }
 0x143   : > { %5170 = vmatprep.subr.bf16.mxu0 %v5625_v62 }
 0x144   : > { %4915 = vmatmul.mubr.bf16.gmra.mrb[28].mxu1 %v6427_v63  ;;  %v6492_v63 = vpack.c.bf16 %v3080_v39, %v3079_v41  ;;  %v3437_v41 = vld [vmem:[#allocation2 + $0x92] sm:$0xff]  ;;  %v3438_v39 = vld [vmem:[#allocation2 + $0x9a] sm:$0xff] }
 0x145   : > { %5139 = vmatmul.mubr.bf16.gmra.mrb[12].mxu0 %v6483_v25  ;;  %4934 = vmatprep.mubr.bf16.mxu1 %v1610_v48  ;;  %v1620_v48 = vpack.c.bf16 %v1599_v59, %v1598_v40  ;;  %v3465_v15 = vpack.c.bf16 %v3438_v39, %v3437_v41  ;;  %v3459_v40 = vld [vmem:[#allocation2 + $0x19a] sm:$0xff]  ;;  %v3460_v59 = vld [vmem:[#allocation2 + $0x1a2] sm:$0xff] }
 0x146   : > { %5142 = vmatprep.mubr.bf16.mxu0 %v6485_v30  ;;  %5171 = vmatpush3.bf16.msra.mxu0 %v5625_v62  ;;  %v3462_v62 = vpack.c.bf16 %v3432_v18, %v3431_v24  ;;  %v1978_v18 = vld [vmem:[#allocation2 + $0x181] sm:$0xff] }
 0x147   : > { %5172 = vmatprep.subr.bf16.mxu0 %v5626_v17 }
 0x14a   : > { %5173 = vmatpush3.bf16.msra.mxu0 %v5626_v17  ;;  %v3463_v17 = vpack.c.bf16 %v3434_v1, %v3433_v45  ;;  %v3476_v45 = vpack.c.bf16 %v3460_v59, %v3459_v40 }
 0x14c   : > { %4935 = vmatmul.mubr.bf16.vlgmr.msra.gmra.mrb[0].mxu1 %v1611_v52  ;;  %v1621_v52 = vpack.c.bf16 %v1601_v35, %v1600_v9 }
 0x14d   : > { %5143 = vmatmul.mubr.bf16.gmra.mrb[16].mxu0 %v6490_v38  ;;  %5214 = vmatpush3.bf16.msra.mxu1 %v6474_v55  ;;  %v5632_v55 = vld [vmem:[#allocation7 + $0x120] sm:$0xff]  }
 0x14e   : > { %4938 = vmatprep.mubr.bf16.mxu1 %v1612_v53  ;;  %5146 = vmatprep.mubr.bf16.mxu0 %v6492_v63  ;;  %v3464_v53 = vpack.c.bf16 %v3436_v28, %v3435_v50 }
 0x14f   : > { %5207 = vmatprep.subr.bf16.mxu1 %v5629_v60 }
 0x151   : > { %5215 = vmatpush3.bf16.msra.mxu1 %v5629_v60  ;;  %v3440_v60 = vld [vmem:[#allocation2 + $0xb2] sm:$0xff] }
 0x152   : > { %5208 = vmatprep.subr.bf16.mxu1 %v5630_v54 }
 0x154   : > { %4939 = vmatmul.mubr.bf16.gmra.mrb[4].mxu1 %v1613_v36  ;;  %v3442_v36 = vld [vmem:[#allocation2 + $0xca] sm:$0xff] }
 0x155   : > { %5147 = vmatmul.mubr.bf16.gmra.mrb[20].mxu0 %v6497_v43  ;;  %4942 = vmatprep.mubr.bf16.mxu1 %v1614_v26  ;;  %v1623_v26 = vpack.c.bf16 %v1605_v20, %v1604_v11  ;;  %v3467_v56 = vpack.c.bf16 %v3442_v36, %v3441_v32 }
 0x156   : > { %5150 = vmatprep.mubr.bf16.mxu0 %v6499_v14  ;;  %5216 = vmatpush3.bf16.msra.mxu1 %v5630_v54  ;;  %v3466_v54 = vpack.c.bf16 %v3440_v60, %v3439_v49 }
 0x157   : > { %5209 = vmatprep.subr.bf16.mxu1 %v5631_v29 }
 0x15a   : > { %5217 = vmatpush3.bf16.msra.mxu1 %v5631_v29  ;;  %v3445_v29 = vld [vmem:[#allocation2 + $0xf2] sm:$0xff] }
 0x15b   : > { %5210 = vmatprep.subr.bf16.mxu1 %v5632_v55 }
 0x15c   : > { %4943 = vmatmul.mubr.bf16.gmra.mrb[8].mxu1 %v1615_v47  ;;  %v3446_v47 = vld [vmem:[#allocation2 + $0xfa] sm:$0xff] }
 0x15d   : > { %5151 = vmatmul.mubr.bf16.gmra.mrb[24].mxu0 %v6338_v42  ;;  %4946 = vmatprep.mubr.bf16.mxu1 %v1616_v51  ;;  %v5634_v42 = vld [vmem:[#allocation7 + $0x130] sm:$0xff]   ;;  %v3468_v51 = vpack.c.bf16 %v3444_v4, %v3443_v57 }
 0x15e   : > { %5154 = vmatprep.mubr.bf16.mxu0 %v6437_v3  ;;  %5218 = vmatpush3.bf16.msra.mxu1 %v5632_v55  ;;  %v1597_v3 = vld [vmem:[#allocation2 + $0xf8] sm:$0xff]  ;;  %v3469_v55 = vpack.c.bf16 %v3446_v47, %v3445_v29 }
 0x15f   : > { %5211 = vmatprep.subr.bf16.mxu1 %v5633_v44  ;;  %v1619_v13 = vpack.c.bf16 %v1597_v3, %v1596_v23  ;;  %v3458_v23 = vld [vmem:[#allocation2 + $0x18a] sm:$0xff] }
 0x162   : > { %5219 = vmatpush3.bf16.msra.mxu1 %v5633_v44  ;;  %v3453_v44 = vld [vmem:[#allocation2 + $0x152] sm:$0xff] }
 0x163   : > { %5212 = vmatprep.subr.bf16.mxu1 %v5634_v42 }
 0x164   : > { %4947 = vmatmul.mubr.bf16.gmra.mrb[12].mxu1 %v1617_v27  ;;  %v3472_v27 = vpack.c.bf16 %v3452_v46, %v3451_v16 }
 0x165   : > { %5155 = vmatmul.mubr.bf16.gmra.mrb[28].mxu0 %v3106_v6  ;;  %4950 = vmatprep.mubr.bf16.mxu1 %v1618_v21  ;;  %v3456_v21 = vld [vmem:[#allocation2 + $0x172] sm:$0xff] }
 0x166   : > { %5174 = vmatprep.mubr.bf16.mxu0 %v3461_v22  ;;  %5220 = vmatpush3.bf16.msra.mxu1 %v5634_v42  ;;  %v1976_v22 = vld [vmem:[#allocation2 + $0x169] sm:$0xff] }
 0x167   : > { %5213 = vmatprep.subr.bf16.mxu1 %v5635_v31  ;;  %v3457_v42 = vld [vmem:[#allocation2 + $0x182] sm:$0xff] }
 0x168   : > { %v3475_v24 = vpack.c.bf16 %v3458_v23, %v3457_v42 }
 0x16a   : > { %5221 = vmatpush3.bf16.msra.mxu1 %v5635_v31 }
 0x16c   : > { %4951 = vmatmul.mubr.bf16.gmra.mrb[16].mxu1 %v1619_v13 }
 0x16d   : > { %5175 = vmatmul.mubr.bf16.vlgmr.msra.gmra.mrb[0].mxu0 %v3462_v62  ;;  %4954 = vmatprep.mubr.bf16.mxu1 %v1620_v48 }
 0x16e   : > { %5178 = vmatprep.mubr.bf16.mxu0 %v3463_v17 }
 0x174   : > { %4955 = vmatmul.mubr.bf16.gmra.mrb[20].mxu1 %v1621_v52 }
 0x175   : > { %5179 = vmatmul.mubr.bf16.gmra.mrb[4].mxu0 %v3464_v53  ;;  %4958 = vmatprep.mubr.bf16.mxu1 %v1622_v12 }
 0x176   : > { %5182 = vmatprep.mubr.bf16.mxu0 %v3465_v15 }
 0x17c   : > { %4959 = vmatmul.mubr.bf16.gmra.mrb[24].mxu1 %v1623_v26 }
 0x17d   : > { %5183 = vmatmul.mubr.bf16.gmra.mrb[8].mxu0 %v3466_v54  ;;  %4962 = vmatprep.mubr.bf16.mxu1 %v1624_v37 }
 0x17e   : > { %5186 = vmatprep.mubr.bf16.mxu0 %v3467_v56 }
 0x184   : > { %4963 = vmatmul.mubr.bf16.gmra.mrb[28].mxu1 %v6466_v58  ;;  %v3454_v58 = vld [vmem:[#allocation2 + $0x15a] sm:$0xff] }
 0x185   : > { %5187 = vmatmul.mubr.bf16.gmra.mrb[12].mxu0 %v3468_v51  ;;  %4998 = vmatprep.mubr.bf16.mxu1 %v6483_v25  ;;  %v3473_v6 = vpack.c.bf16 %v3454_v58, %v3453_v44  ;;  %v3455_v25 = vld [vmem:[#allocation2 + $0x16a] sm:$0xff] }
 0x186   : > { %5190 = vmatprep.mubr.bf16.mxu0 %v3469_v55 }
 0x18c   : > { %4999 = vmatmul.mubr.bf16.vlgmr.msra.gmra.mrb[16].mxu1 %v6485_v30  ;;  %v1977_v30 = vld [vmem:[#allocation2 + $0x171] sm:$0xff] }
 0x18d   : > { %5191 = vmatmul.mubr.bf16.gmra.mrb[16].mxu0 %v3470_v8  ;;  %5002 = vmatprep.mubr.bf16.mxu1 %v6490_v38  ;;  %v3474_v38 = vpack.c.bf16 %v3456_v21, %v3455_v25  ;;  %v1994_v3 = vpack.c.bf16 %v1977_v30, %v1976_v22 }
 0x18e   : > { %5194 = vmatprep.mubr.bf16.mxu0 %v3471_v10 }
 0x194   : > { %5003 = vmatmul.mubr.bf16.gmra.mrb[20].mxu1 %v6492_v63  ;;  %v1979_v63 = vld [vmem:[#allocation2 + $0x189] sm:$0xff] }
 0x195   : > { %5195 = vmatmul.mubr.bf16.gmra.mrb[20].mxu0 %v3472_v27  ;;  %5006 = vmatprep.mubr.bf16.mxu1 %v6497_v43  ;;  %v1995_v43 = vpack.c.bf16 %v1979_v63, %v1978_v18 }
 0x196   : > { %5198 = vmatprep.mubr.bf16.mxu0 %v3473_v6 }
 0x19c   : > { %5007 = vmatmul.mubr.bf16.gmra.mrb[24].mxu1 %v6499_v14 }
 0x19d   : > { %5199 = vmatmul.mubr.bf16.gmra.mrb[24].mxu0 %v3474_v38  ;;  %5010 = vmatprep.mubr.bf16.mxu1 %v1994_v3 }
 0x19e   : > { %5202 = vmatprep.mubr.bf16.mxu0 %v3475_v24 }
 0x1a4   : > { %5011 = vmatmul.mubr.bf16.gmra.mrb[28].mxu1 %v1995_v43 }
 0x1a5   : > { %5203 = vmatmul.mubr.bf16.gmra.mrb[28].mxu0 %v3476_v45 }
 0x21f   : > { %v4936_v1 = vpop.f32.mrb[0].mxu1 }
 0x220   : > { %v1725_v31 = vpop.f32.mrb[1].mxu1 }
 0x221   : > { %v4937_v13 = vpop.f32.mrb[2].mxu1 }
 0x222   : > { %v1728_v62 = vpop.f32.mrb[3].mxu1 }
 0x227   : > { %v4940_v48 = vpop.f32.mrb[4].mxu1 }
 0x228   : > { %v1741_v17 = vpop.f32.mrb[5].mxu1 }
 0x229   : > { %v4941_v9 = vpop.f32.mrb[6].mxu1 }
 0x22a   : > { %v1744_v35 = vpop.f32.mrb[7].mxu1 }
 0x22f   : > { %v4944_v14 = vpop.f32.mrb[8].mxu1 }
 0x230   : > { %v1757_v50 = vpop.f32.mrb[9].mxu1 }
 0x231   : > { %v4945_v28 = vpop.f32.mrb[10].mxu1 }
 0x232   : > { %v1760_v61 = vpop.f32.mrb[11].mxu1 }
 0x237   : > { %v6512_v34 = vpop.f32.mrb[12].mxu1 }
 0x238   : > { %v6514_v41 = vpop.f32.mrb[13].mxu1 }
 0x239   : > { %v6516_v39 = vpop.f32.mrb[14].mxu1 }
 0x23a   : > { %v6518_v52 = vpop.f32.mrb[15].mxu1 }
 0x240   : > { %v5176_v53 = vpop.f32.mrb[0].mxu0 }
 0x241   : > { %v5222_v12 = vadd.f32 %v5176_v53, %v4936_v1  ;;  %v3576_v15 = vpop.f32.mrb[1].mxu0 }
 0x242   : > { %v5223_v11 = vadd.f32 %v3576_v15, %v1725_v31  ;;  %v5177_v20 = vpop.f32.mrb[2].mxu0 }
 0x243   : > { %v5224_v49 = vadd.f32 %v5177_v20, %v4937_v13  ;;  %v3579_v60 = vpop.f32.mrb[3].mxu0  ;;  %v3999_v37 = vmul.f32 %v5222_v12, %v5222_v12 }
 0x244   : > { %v5225_v0 = vadd.f32 %v3579_v60, %v1728_v62  ;;  %v3997_v32 = vmul.f32 %v5223_v11, %v5223_v11 }
 0x245   : > { %v4456_v2 = vpack.c.bf16 %v5224_v49, %v5222_v12  ;;  %v4000_v51 = vmul.f32 %v5224_v49, %v5224_v49 }
 0x246   : > { %v4451_v36 = vpack.c.bf16 %v5225_v0, %v5223_v11  ;;  %v3959_v26 = vadd.f32 %v5225_v0, %v5223_v11  ;;  %v3998_v54 = vmul.f32 %v5225_v0, %v5225_v0 }
 0x247   : > { %4543 = vst [vmem:[%s6522_s21 + $0x8] sm:$0xff] %v4456_v2  }
 0x248   : > { %4452 = vst [vmem:[%s6522_s21] sm:$0xff] %v4451_v36   ;;  %v3960_v56 = vadd.f32 %v5222_v12, %v3959_v26  ;;  %v4029_v57 = vadd.f32 %v3998_v54, %v3997_v32  ;;  %v5180_v4 = vpop.f32.mrb[4].mxu0 }
 0x249   : > { %v5226_v29 = vadd.f32 %v5180_v4, %v4940_v48  ;;  %v3592_v47 = vpop.f32.mrb[5].mxu0 }
 0x24a   : > { %v4030_v55 = vadd.f32 %v4029_v57, %v3999_v37  ;;  %v5227_v5 = vadd.f32 %v3592_v47, %v1741_v17  ;;  %v3961_v33 = vadd.f32 %v5224_v49, %v3960_v56  ;;  %v5181_v19 = vpop.f32.mrb[6].mxu0 }
 0x24b   : > { %v5228_v7 = vadd.f32 %v5181_v19, %v4941_v9  ;;  %v3595_v8 = vpop.f32.mrb[7].mxu0  ;;  %v4003_v22 = vmul.f32 %v5226_v29, %v5226_v29 }
 0x24c   : > { %v3962_v10 = vadd.f32 %v5227_v5, %v3961_v33  ;;  %v4001_v16 = vmul.f32 %v5227_v5, %v5227_v5  ;;  %v4031_v46 = vadd.f32 %v4030_v55, %v4000_v51  ;;  %v5229_v44 = vadd.f32 %v3595_v8, %v1744_v35 }
 0x24d   : > { %v4466_v58 = vpack.c.bf16 %v5228_v7, %v5226_v29  ;;  %v4004_v24 = vmul.f32 %v5228_v7, %v5228_v7 }
 0x24e   : > { %v4032_v27 = vadd.f32 %v4031_v46, %v4001_v16  ;;  %v4461_v6 = vpack.c.bf16 %v5229_v44, %v5227_v5  ;;  %v3963_v25 = vadd.f32 %v5229_v44, %v3962_v10  ;;  %v4002_v21 = vmul.f32 %v5229_v44, %v5229_v44 }
 0x24f   : > { %4545 = vst [vmem:[%s6522_s21 + $0x18] sm:$0xff] %v4466_v58  }
 0x250   : > { %4544 = vst [vmem:[%s6522_s21 + $0x10] sm:$0xff] %v4461_v6   ;;  %v3964_v30 = vadd.f32 %v5226_v29, %v3963_v25  ;;  %v4033_v42 = vadd.f32 %v4032_v27, %v4002_v21  ;;  %v5184_v23 = vpop.f32.mrb[8].mxu0 }
 0x251   : > { %v5230_v38 = vadd.f32 %v5184_v23, %v4944_v14  ;;  %v3608_v3 = vpop.f32.mrb[9].mxu0 }
 0x252   : > { %v4034_v18 = vadd.f32 %v4033_v42, %v4003_v22  ;;  %v5231_v63 = vadd.f32 %v3608_v3, %v1757_v50  ;;  %v3965_v40 = vadd.f32 %v5228_v7, %v3964_v30  ;;  %v5185_v59 = vpop.f32.mrb[10].mxu0 }
 0x253   : > { %v5232_v43 = vadd.f32 %v5185_v59, %v4945_v28  ;;  %v3611_v45 = vpop.f32.mrb[11].mxu0  ;;  %v4007_v14 = vmul.f32 %v5230_v38, %v5230_v38 }
 0x254   : > { %v3966_v1 = vadd.f32 %v5231_v63, %v3965_v40  ;;  %v4005_v31 = vmul.f32 %v5231_v63, %v5231_v63  ;;  %v4035_v13 = vadd.f32 %v4034_v18, %v4004_v24  ;;  %v5233_v62 = vadd.f32 %v3611_v45, %v1760_v61 }
 0x255   : > { %v4476_v48 = vpack.c.bf16 %v5232_v43, %v5230_v38  ;;  %v4008_v28 = vmul.f32 %v5232_v43, %v5232_v43 }
 0x256   : > { %v4036_v17 = vadd.f32 %v4035_v13, %v4005_v31  ;;  %v4471_v9 = vpack.c.bf16 %v5233_v62, %v5231_v63  ;;  %v3967_v35 = vadd.f32 %v5233_v62, %v3966_v1  ;;  %v4006_v53 = vmul.f32 %v5233_v62, %v5233_v62 }
 0x257   : > { %4547 = vst [vmem:[%s6522_s21 + $0x28] sm:$0xff] %v4476_v48  }
 0x258   : > { %4546 = vst [vmem:[%s6522_s21 + $0x20] sm:$0xff] %v4471_v9   ;;  %v3968_v12 = vadd.f32 %v5230_v38, %v3967_v35  ;;  %v4037_v15 = vadd.f32 %v4036_v17, %v4006_v53  ;;  %v5188_v50 = vpop.f32.mrb[12].mxu0 }
 0x259   : > { %v5234_v11 = vadd.f32 %v5188_v50, %v6512_v34  ;;  %v3624_v20 = vpop.f32.mrb[13].mxu0 }
 0x25a   : > { %v4038_v49 = vadd.f32 %v4037_v15, %v4007_v14  ;;  %v5235_v60 = vadd.f32 %v3624_v20, %v6514_v41  ;;  %v3969_v61 = vadd.f32 %v5232_v43, %v3968_v12  ;;  %v5189_v0 = vpop.f32.mrb[14].mxu0 }
 0x25b   : > { %v5236_v2 = vadd.f32 %v5189_v0, %v6516_v39  ;;  %v3627_v32 = vpop.f32.mrb[15].mxu0  ;;  %v4011_v47 = vmul.f32 %v5234_v11, %v5234_v11 }
 0x25c   : > { %v3970_v36 = vadd.f32 %v5235_v60, %v3969_v61  ;;  %v4009_v26 = vmul.f32 %v5235_v60, %v5235_v60  ;;  %v4039_v54 = vadd.f32 %v4038_v49, %v4008_v28  ;;  %v5237_v37 = vadd.f32 %v3627_v32, %v6518_v52 }
 0x25d   : > { %v4486_v56 = vpack.c.bf16 %v5236_v2, %v5234_v11  ;;  %v4012_v7 = vmul.f32 %v5236_v2, %v5236_v2 }
 0x25e   : > { %v4040_v57 = vadd.f32 %v4039_v54, %v4009_v26  ;;  %v4481_v34 = vpack.c.bf16 %v5237_v37, %v5235_v60  ;;  %v3971_v4 = vadd.f32 %v5237_v37, %v3970_v36  ;;  %v4010_v29 = vmul.f32 %v5237_v37, %v5237_v37 }
 0x25f   : > { %4549 = vst [vmem:[%s6522_s21 + $0x38] sm:$0xff] %v4486_v56   ;;  %v5000_v55 = vpop.f32.mrb[16].mxu1 }
 0x260   : > { %4548 = vst [vmem:[%s6522_s21 + $0x30] sm:$0xff] %v4481_v34   ;;  %v3972_v41 = vadd.f32 %v5234_v11, %v3971_v4  ;;  %v4041_v51 = vadd.f32 %v4040_v57, %v4010_v29  ;;  %v5192_v5 = vpop.f32.mrb[16].mxu0  ;;  %v2159_v39 = vpop.f32.mrb[17].mxu1 }
 0x261   : > { %v5238_v33 = vadd.f32 %v5192_v5, %v5000_v55  ;;  %v3640_v19 = vpop.f32.mrb[17].mxu0  ;;  %v5001_v16 = vpop.f32.mrb[18].mxu1 }
 0x262   : > { %v4042_v8 = vadd.f32 %v4041_v51, %v4011_v47  ;;  %v5239_v10 = vadd.f32 %v3640_v19, %v2159_v39  ;;  %v3973_v52 = vadd.f32 %v5236_v2, %v3972_v41  ;;  %v5193_v46 = vpop.f32.mrb[18].mxu0  ;;  %v2162_v58 = vpop.f32.mrb[19].mxu1 }
 0x263   : > { %v5240_v44 = vadd.f32 %v5193_v46, %v5001_v16  ;;  %v3643_v27 = vpop.f32.mrb[19].mxu0  ;;  %v4015_v24 = vmul.f32 %v5238_v33, %v5238_v33 }
 0x264   : > { %v3974_v6 = vadd.f32 %v5239_v10, %v3973_v52  ;;  %v4013_v25 = vmul.f32 %v5239_v10, %v5239_v10  ;;  %v4043_v21 = vadd.f32 %v4042_v8, %v4012_v7  ;;  %v5241_v22 = vadd.f32 %v3643_v27, %v2162_v58 }
 0x265   : > { %v4496_v30 = vpack.c.bf16 %v5240_v44, %v5238_v33  ;;  %v4016_v31 = vmul.f32 %v5240_v44, %v5240_v44 }
 0x266   : > { %v4044_v42 = vadd.f32 %v4043_v21, %v4013_v25  ;;  %v4491_v23 = vpack.c.bf16 %v5241_v22, %v5239_v10  ;;  %v3975_v38 = vadd.f32 %v5241_v22, %v3974_v6  ;;  %v4014_v3 = vmul.f32 %v5241_v22, %v5241_v22 }
 0x267   : > { %4551 = vst [vmem:[%s6522_s21 + $0x48] sm:$0xff] %v4496_v30   ;;  %v5004_v40 = vpop.f32.mrb[20].mxu1 }
 0x268   : > { %4550 = vst [vmem:[%s6522_s21 + $0x40] sm:$0xff] %v4491_v23   ;;  %v3976_v18 = vadd.f32 %v5238_v33, %v3975_v38  ;;  %v4045_v63 = vadd.f32 %v4044_v42, %v4014_v3  ;;  %v5196_v59 = vpop.f32.mrb[20].mxu0  ;;  %v2175_v45 = vpop.f32.mrb[21].mxu1 }
 0x269   : > { %v5242_v43 = vadd.f32 %v5196_v59, %v5004_v40  ;;  %v3656_v1 = vpop.f32.mrb[21].mxu0  ;;  %v5005_v17 = vpop.f32.mrb[22].mxu1 }
 0x26a   : > { %v4046_v13 = vadd.f32 %v4045_v63, %v4015_v24  ;;  %v5243_v62 = vadd.f32 %v3656_v1, %v2175_v45  ;;  %v3977_v48 = vadd.f32 %v5240_v44, %v3976_v18  ;;  %v5197_v9 = vpop.f32.mrb[22].mxu0  ;;  %v2178_v53 = vpop.f32.mrb[23].mxu1 }
 0x26b   : > { %v5244_v35 = vadd.f32 %v5197_v9, %v5005_v17  ;;  %v3659_v14 = vpop.f32.mrb[23].mxu0  ;;  %v4019_v0 = vmul.f32 %v5242_v43, %v5242_v43 }
 0x26c   : > { %v3978_v12 = vadd.f32 %v5243_v62, %v3977_v48  ;;  %v4017_v15 = vmul.f32 %v5243_v62, %v5243_v62  ;;  %v4047_v50 = vadd.f32 %v4046_v13, %v4016_v31  ;;  %v5245_v11 = vadd.f32 %v3659_v14, %v2178_v53 }
 0x26d   : > { %v4506_v20 = vpack.c.bf16 %v5244_v35, %v5242_v43  ;;  %v4020_v57 = vmul.f32 %v5244_v35, %v5244_v35 }
 0x26e   : > { %v4048_v28 = vadd.f32 %v4047_v50, %v4017_v15  ;;  %v4501_v49 = vpack.c.bf16 %v5245_v11, %v5243_v62  ;;  %v3979_v60 = vadd.f32 %v5245_v11, %v3978_v12  ;;  %v4018_v61 = vmul.f32 %v5245_v11, %v5245_v11 }
 0x26f   : > { %4553 = vst [vmem:[%s6522_s21 + $0x58] sm:$0xff] %v4506_v20   ;;  %v5008_v36 = vpop.f32.mrb[24].mxu1 }
 0x270   : > { %4552 = vst [vmem:[%s6522_s21 + $0x50] sm:$0xff] %v4501_v49   ;;  %v3980_v2 = vadd.f32 %v5242_v43, %v3979_v60  ;;  %v4049_v32 = vadd.f32 %v4048_v28, %v4018_v61  ;;  %v5200_v26 = vpop.f32.mrb[24].mxu0  ;;  %v2191_v37 = vpop.f32.mrb[25].mxu1 }
 0x271   : > { %v5246_v54 = vadd.f32 %v5200_v26, %v5008_v36  ;;  %v3672_v56 = vpop.f32.mrb[25].mxu0  ;;  %v5009_v47 = vpop.f32.mrb[26].mxu1 }
 0x272   : > { %v4050_v34 = vadd.f32 %v4049_v32, %v4019_v0  ;;  %v5247_v4 = vadd.f32 %v3672_v56, %v2191_v37  ;;  %v3981_v29 = vadd.f32 %v5244_v35, %v3980_v2  ;;  %v5201_v41 = vpop.f32.mrb[26].mxu0  ;;  %v2194_v55 = vpop.f32.mrb[27].mxu1 }
 0x273   : > { %v5248_v51 = vadd.f32 %v5201_v41, %v5009_v47  ;;  %v3675_v5 = vpop.f32.mrb[27].mxu0  ;;  %v4023_v44 = vmul.f32 %v5246_v54, %v5246_v54 }
 0x274   : > { %v3982_v33 = vadd.f32 %v5247_v4, %v3981_v29  ;;  %v4021_v39 = vmul.f32 %v5247_v4, %v5247_v4  ;;  %v4051_v19 = vadd.f32 %v4050_v34, %v4020_v57  ;;  %v5249_v7 = vadd.f32 %v3675_v5, %v2194_v55 }
 0x275   : > { %v4516_v8 = vpack.c.bf16 %v5248_v51, %v5246_v54  ;;  %v4024_v42 = vmul.f32 %v5248_v51, %v5248_v51 }
 0x276   : > { %v4052_v10 = vadd.f32 %v4051_v19, %v4021_v39  ;;  %v4511_v52 = vpack.c.bf16 %v5249_v7, %v5247_v4  ;;  %v3983_v16 = vadd.f32 %v5249_v7, %v3982_v33  ;;  %v4022_v46 = vmul.f32 %v5249_v7, %v5249_v7 }
 0x277   : > { %4555 = vst [vmem:[%s6522_s21 + $0x68] sm:$0xff] %v4516_v8   ;;  %v5012_v6 = vpop.f32.mrb[28].mxu1 }
 0x278   : > { %4554 = vst [vmem:[%s6522_s21 + $0x60] sm:$0xff] %v4511_v52   ;;  %v3984_v58 = vadd.f32 %v5246_v54, %v3983_v16  ;;  %v4053_v27 = vadd.f32 %v4052_v10, %v4022_v46  ;;  %v5204_v25 = vpop.f32.mrb[28].mxu0  ;;  %v2207_v22 = vpop.f32.mrb[29].mxu1 }
 0x279   : > { %v5250_v21 = vadd.f32 %v5204_v25, %v5012_v6  ;;  %v3688_v30 = vpop.f32.mrb[29].mxu0  ;;  %v5013_v24 = vpop.f32.mrb[30].mxu1 }
 0x27a   : > { %v4054_v23 = vadd.f32 %v4053_v27, %v4023_v44  ;;  %v5251_v38 = vadd.f32 %v3688_v30, %v2207_v22  ;;  %v3985_v3 = vadd.f32 %v5248_v51, %v3984_v58  ;;  %v5205_v18 = vpop.f32.mrb[30].mxu0  ;;  %v2210_v40 = vpop.f32.mrb[31].mxu1 }
 0x27b   : > { %v5252_v63 = vadd.f32 %v5205_v18, %v5013_v24  ;;  %v3691_v59 = vpop.f32.mrb[31].mxu0  ;;  %v4027_v35 = vmul.f32 %v5250_v21, %v5250_v21 }
 0x27c   : > { %v3986_v43 = vadd.f32 %v5251_v38, %v3985_v3  ;;  %v4025_v45 = vmul.f32 %v5251_v38, %v5251_v38  ;;  %v4055_v1 = vadd.f32 %v4054_v23, %v4024_v42  ;;  %v5253_v31 = vadd.f32 %v3691_v59, %v2210_v40 }
 0x27d   : > { %v4526_v13 = vpack.c.bf16 %v5252_v63, %v5250_v21 }
 0x27e   : > { %v4056_v62 = vadd.f32 %v4055_v1, %v4025_v45  ;;  %v4521_v48 = vpack.c.bf16 %v5253_v31, %v5251_v38  ;;  %v3987_v17 = vadd.f32 %v5253_v31, %v3986_v43  ;;  %v4026_v9 = vmul.f32 %v5253_v31, %v5253_v31 }
 0x27f   : > { %4557 = vst [vmem:[%s6522_s21 + $0x78] sm:$0xff] %v4526_v13  }
 0x280   : > { %4556 = vst [vmem:[%s6522_s21 + $0x70] sm:$0xff] %v4521_v48   ;;  %v3988_v53 = vadd.f32 %v5250_v21, %v3987_v17  ;;  %v4057_v14 = vadd.f32 %v4056_v62, %v4026_v9 }
 0x281   : > { %5735 = shalt.err (!%p5732_p1)
}
 0x282   : > { %s5736_s5 = scalar_lea.hbm %s6547_s6, 2048  ;;  %s5740_s24 = scalar_lea.hbm %s6629_s3, 4096 }
 0x283   : > { %p5737_p13 = scmp.ne.s32.totalorder %s6547_s6, %s5736_s5  ;;  %p5741_p4 = scmp.lt.u32.totalorder %s6547_s6, %s6629_s3 }
 0x284   : > { %p5742_p5 = scmp.lt.u32.totalorder %s5740_s24, %s5736_s5  ;;  %p5744_p11 = scmp.lt.u32.totalorder %s5736_s5, %s6547_s6 }
 0x285   : > { %p5738_p6 = pnand %p5737_p13, %p6644_p0 }
 0x286   : > { %p5743_p8 = por %p5742_p5, %p5741_p4 }
 0x287   : > { %p5739_p10 = pneg %p5738_p6 }
 0x288   : > { %p5745_p2 = por %p5744_p11, %p5743_p8 }
 0x28a   : > { %p5746_p3 = pnand %p5745_p2, %p5739_p10 }
 0x28c   : > { %5749 = shalt.err (!%p5746_p3)
}
 0x28d   : > { %s5833_s23 = smov 64   ;;  %s5834_s12 = smov 4   ;;  %v4028_v12 = vmul.f32 %v5252_v63, %v5252_v63  ;;  %v3989_v15 = vadd.f32 %v5252_v63, %v3988_v53  ;;  %v4058_v50 = vadd.f32 %v4057_v14, %v4027_v35 }
 0x28e   : > { %5488 = dma.vmem_to_hbm [thread:$0]  (%p6644_p0), %s6549_s11, 2048, %s6547_s6, %s4068_s7, %s5833_s23, %s5833_s23, %s5834_s12  }
 0x28f   : > { %v3990_v11 = vrot.slane %v3989_v15, 4  ;;  %v4059_v20 = vadd.f32 %v4058_v50, %v4028_v12  ;;  %s4236_s30 = sshll.u32 %s6039_s8, 1  ;;  %s4347_s28 = sshll.u32 %s5882_s19, 5 }
 0x290   : > { %s253_s27 = scalar_lea.vmem [#allocation11], %s4236_s30  ;;  %s6582_s7 = scalar_lea.hbm %s6630_s4, %s4347_s28 }
 0x291   : > { %v3991_v28 = vadd.f32 %v3990_v11, %v3989_v15  ;;  %v4060_v49 = vrot.slane %v4059_v20, 4  ;;  %s4102_s20 = sshll.u32 %s253_s27, 4  ;;  %s4073_s29 = scalar_lea.sflag [#allocation12], %s6039_s8  ;;  %s6584_s20 = int_to_ptr.vmem [resolvable:$true] %s4102_s20 }
 0x292   : > { %s5750_s5 = scalar_lea.vmem %s6584_s20, 32  ;;  %s5835_s19 = smov [#allocation11]  }
 0x293   : > { %v3992_v60 = vrot.slane %v3991_v28, 2  ;;  %v4061_v61 = vadd.f32 %v4060_v49, %v4059_v20  ;;  %p5751_p7 = scmp.ne.s32.totalorder %s6584_s20, %s5750_s5  ;;  %s5754_s26 = sshll.u32 %s5835_s19, 4  ;;  %s5755_s26 = int_to_ptr.vmem [resolvable:$false] %s5754_s26 }
 0x294   : > { %s5756_s10 = scalar_lea.vmem %s5755_s26, 64  ;;  %p5757_p1 = scmp.lt.s32.totalorder %s6584_s20, %s5755_s26 }
 0x295   : > { %v3993_v0 = vadd.f32 %v3992_v60, %v3991_v28  ;;  %v4062_v2 = vrot.slane %v4061_v61, 2  ;;  %p5752_p9 = pnand %p5751_p7, %p6644_p0  ;;  %p5758_p13 = scmp.lt.s32.totalorder %s5756_s10, %s5750_s5 }
 0x297   : > { %v3994_v32 = vrot.slane %v3993_v0, 1  ;;  %v4063_v36 = vadd.f32 %v4062_v2, %v4061_v61  ;;  %p5753_p12 = pneg %p5752_p9  ;;  %p5759_p6 = por %p5758_p13, %p5757_p1 }
 0x299   : > { %v3995_v26 = vadd.f32 %v3994_v32, %v3993_v0  ;;  %v4064_v54 = vrot.slane %v4063_v36, 1  ;;  %p5760_p10 = pnand %p5759_p6, %p5753_p12 }
 0x29b   : > { %3996 = vst [vmem:[%s253_s27] sm:$0x1] %v3995_v26  ;;  %v4065_v37 = vadd.f32 %v4064_v54, %v4063_v36 }
 0x29d   : > { %4066 = vst [vmem:[%s253_s27 + $0x1] sm:$0x1] %v4065_v37 }
 0x29e   : > { %5763 = shalt.err (!%p5760_p10)
}
 0x29f   : > { %s5764_s8 = scalar_lea.hbm %s6582_s7, 32  ;;  %s5768_s21 = scalar_lea.hbm %s6630_s4, 64 }
 0x2a0   : > { %p5765_p4 = scmp.ne.s32.totalorder %s6582_s7, %s5764_s8  ;;  %p5769_p11 = scmp.lt.u32.totalorder %s6582_s7, %s6630_s4 }
 0x2a1   : > { %p5770_p2 = scmp.lt.u32.totalorder %s5768_s21, %s5764_s8  ;;  %p5772_p7 = scmp.lt.u32.totalorder %s5764_s8, %s6582_s7 }
 0x2a2   : > { %p5766_p5 = pnand %p5765_p4, %p6644_p0 }
 0x2a3   : > { %p5771_p3 = por %p5770_p2, %p5769_p11 }
 0x2a4   : > { %p5767_p8 = pneg %p5766_p5 }
 0x2a5   : > { %p5773_p9 = por %p5772_p7, %p5771_p3 }
 0x2a7   : > { %p5774_p12 = pnand %p5773_p9, %p5767_p8 }
 0x2a9   : > { %5777 = shalt.err (!%p5774_p12)
}
 0x2aa   : > { %5489 = dma.vmem_to_hbm [thread:$0]  (%p6644_p0), %s6584_s20, 32, %s6582_s7, %s4073_s29  }
 0x2ab PF: > { %s4114_s30 = sand.u32 1, %s5812_s15   ;;  %p6645_p1 = scmp.ne.s32.totalorder %s6635_s22, 0 }
 0x2ac   : > { %p6646_p13 = scmp.ge.s32.totalorder %s5824_s18, 2  ;;  %s4115_s28 = scalar_lea.sflag [#allocation6], %s4114_s30 }
 0x2ae   : > { %p5504_p6 = pnand %p6646_p13, %p6645_p1 }
 0x2b0   : > { %5803 = dma.done.wait (!%p5504_p6), %s4115_s28, 2048  }
 0x2b1   : > { %5805 = vsyncadd (!%p5504_p6), %s4115_s28, 4294965248  ;;  %s4124_s27 = scalar_lea.sflag [#allocation12], %s4114_s30 }
 0x2b2   : > { %5807 = dma.done.wait (!%p5504_p6), %s4124_s27, 32  }
 0x2b3   : > { %5809 = vsyncadd (!%p5504_p6), %s4124_s27, 4294967264  ;;  %p22_p0 = scmp.ge.s32.totalorder %s5974_s9, 4   ;;  %s6647_s15 = smov %s5816_s16 }
 0x2b4   : > { %s6648_s16 = smov %s5820_s17  ;;  %s6649_s17 = smov %s5990_s14 }
 0x2b5   : > { %s6650_s18 = smov %s5974_s9  ;;  %24 = sbr.rel (!%p22_p0) target bundleno = 8 (0x8), region = 113 }
 0x2bc   :  { %4129 = vsyncpa [#allocation5], 1 }
 0x2bd   :  { %4131 = vsyncpa [#allocation5 + $0x1], 1 }
 0x2be   :  { %4132 = vsyncpa [#allocation8], 1 }
 0x2bf   :  { %4133 = vsyncpa [#allocation6], 1 }
 0x2c0   :  { %4135 = vsyncpa [#allocation6 + $0x1], 1 }
 0x2c1   :  { %4136 = vsyncpa [#allocation12], 1 }
 0x2c2   :  { %4138 = vsyncpa [#allocation12 + $0x1], 1 }

// kernel: resblk_forward.3
= control target key start
LH: loop header
LB: loop body
LE: loop exit
PB: predicated region body
PF: predicated region fallthrough
CT: control target
= control target key end

     0   :  { %12 = vsyncpa [#allocation5], 0  ;;  %s7606_s0 = inlined_call_operand.hbm [shape: bf16[2,16,16,128], index: 0, kind: input, shape index: {}]   ;;  %s7607_s1 = inlined_call_operand.hbm [shape: bf16[9,128,128], index: 1, kind: input, shape index: {}]   ;;  %s7608_s2 = inlined_call_operand.hbm [shape: bf16[128,128], index: 2, kind: input, shape index: {}]   ;;  %s7609_s3 = inlined_call_operand.hbm [shape: bf16[2,256,128], index: 3, kind: output, shape index: {0}]   ;;  %s7610_s4 = inlined_call_operand.hbm [shape: bf16[2,256,128], index: 4, kind: output, shape index: {1}]   ;;  %s7611_s5 = inlined_call_operand.hbm [shape: f32[2,2,128], index: 5, kind: output, shape index: {2}]   ;;  %s7612_s6 = inlined_call_operand.hbm [shape: f32[2,2,128], index: 6, kind: output, shape index: {3}]  }
   0x1   :  { %14 = vsyncpa [#allocation5 + $0x1], 0 }
   0x2   :  { %15 = vsyncpa [#allocation8], 0 }
   0x3   :  { %16 = vsyncpa [#allocation6], 0 }
   0x4   :  { %18 = vsyncpa [#allocation6 + $0x1], 0 }
   0x5   :  { %19 = vsyncpa [#allocation12], 0 }
   0x6   :  { %21 = vsyncpa [#allocation12 + $0x1], 0 }
   0x7   :  { %22 = vsyncpa [#allocation15], 0 }
   0x8   :  { %24 = vsyncpa [#allocation15 + $0x1], 0  ;;  %s6796_s21 = smov 0   ;;  %s6798_s22 = smov 0  }
   0x9   :  { %s6800_s23 = smov 0   ;;  %s6802_s24 = smov 0  }
   0xa LB: > { %s6817_s25 = sadd.s32 4294967295, %s6747_s24   ;;  %s7614_s26 = sadd.s32 4294967294, %s6747_s24   ;;  %s6747_s24 = sphi %s6802_s24, %s7634_s24   ;;  %s6743_s23 = sphi %s6800_s23, %s7633_s23   ;;  %s6739_s22 = sphi %s6798_s22, %s7632_s22   ;;  %s6735_s21 = sphi %s6796_s21, %s7631_s21  }
   0xb   : > { %p50_p0 = scmp.ne.s32.totalorder %s6739_s22, %s6735_s21  ;;  %p7613_p1 = scmp.eq.s32.totalorder %s6817_s25, 0 }
   0xc   : > { %p122_p3 = scmp.eq.s32.totalorder %s7614_s26, 1  ;;  %p4832_p5 = scmp.ge.s32.totalorder %s6747_s24, 1 }
   0xd   : > { %p6828_p4 = por %p7613_p1, %p50_p0  ;;  %p207_p7 = scmp.lt.s32.totalorder %s6747_s24, 3 }
   0xe   : > { %p6833_p6 = por %p122_p3, %p50_p0  ;;  %s6749_s30 = smov [#allocation7]  }
   0xf   : > { %s7617_s27 = scalar_select %p6828_p4, 1, 0 }
  0x10   : > { %s7618_s28 = scalar_select %p6833_p6, 1, 0 }
  0x11   : > { %p6838_p8 = pnand %p4832_p5, %p207_p7  ;;  %s219_s7 = sshll.u32 %s6749_s30, 4  ;;  %s6842_s7 = int_to_ptr.vmem [resolvable:$true] %s219_s7 }
  0x12   : > { %s6750_s9 = smov [#allocation9]   ;;  %s6499_s13 = scalar_lea.hbm %s7607_s1, 9216 }
  0x13   : > { %p6333_p9 = pneg %p6838_p8  ;;  %s232_s10 = sshll.u32 %s6750_s9, 4  ;;  %s6853_s10 = int_to_ptr.vmem [resolvable:$true] %s232_s10 }
  0x14   : > { %p6500_p12 = scmp.ne.s32.totalorder %s7607_s1, %s6499_s13  ;;  %p6506_p5 = scmp.lt.u32.totalorder %s6499_s13, %s7607_s1 }
  0x15   : > { %p6849_p11 = pnand %p6333_p9, %p7613_p1 }
  0x17   : > { %p6501_p13 = pneg %p6849_p11 }
  0x19   : > { %p6502_p0 = pnand %p6501_p13, %p6500_p12 }
  0x1b   : > { %p6503_p3 = pneg %p6502_p0 }
  0x1d   : > { %p6508_p7 = pnand %p6506_p5, %p6503_p3 }
  0x1f   : > { %6511 = shalt.err (!%p6508_p7)
}
  0x20   : > { %s6512_s18 = scalar_lea.vmem %s6842_s7, 9216  ;;  %p6520_p2 = scmp.lt.s32.totalorder %s6842_s7, %s6842_s7 }
  0x21   : > { %p6513_p9 = scmp.ne.s32.totalorder %s6842_s7, %s6512_s18  ;;  %p6521_p12 = scmp.lt.s32.totalorder %s6512_s18, %s6512_s18 }
  0x23   : > { %p6515_p10 = pnand %p6513_p9, %p6501_p13  ;;  %p6522_p0 = por %p6521_p12, %p6520_p2 }
  0x25   : > { %p6516_p1 = pneg %p6515_p10 }
  0x27   : > { %p6523_p6 = pnand %p6522_p0, %p6516_p1 }
  0x29   : > { %6526 = shalt.err (!%p6523_p6)
}
  0x2a   : > { %s6751_s19 = smov 64   ;;  %s6752_s20 = smov 4  }
  0x2b   : > { %6336 = dma.hbm_to_vmem [thread:$0]  (!%p6849_p11), %s7607_s1, 9216, %s6842_s7, [#allocation8], %s6751_s19, %s6751_s19, %s6752_s20  }
  0x2c   : > { %s6527_s13 = scalar_lea.hbm %s7608_s2, 1024 }
  0x2d   : > { %p6528_p1 = scmp.ne.s32.totalorder %s7608_s2, %s6527_s13  ;;  %p6534_p10 = scmp.lt.u32.totalorder %s6527_s13, %s7608_s2 }
  0x2f   : > { %p6530_p2 = pnand %p6528_p1, %p6501_p13 }
  0x31   : > { %p6531_p6 = pneg %p6530_p2 }
  0x33   : > { %p6536_p3 = pnand %p6534_p10, %p6531_p6 }
  0x35   : > { %6539 = shalt.err (!%p6536_p3)
}
  0x36   : > { %s6540_s7 = scalar_lea.vmem %s6853_s10, 1024  ;;  %p6548_p12 = scmp.lt.s32.totalorder %s6853_s10, %s6853_s10 }
  0x37   : > { %p6541_p5 = scmp.ne.s32.totalorder %s6853_s10, %s6540_s7  ;;  %p6549_p0 = scmp.lt.s32.totalorder %s6540_s7, %s6540_s7 }
  0x39   : > { %p6543_p7 = pnand %p6541_p5, %p6501_p13  ;;  %p6550_p1 = por %p6549_p0, %p6548_p12 }
  0x3b   : > { %p6544_p9 = pneg %p6543_p7 }
  0x3d   : > { %p6551_p2 = pnand %p6550_p1, %p6544_p9 }
  0x3f   : > { %6554 = shalt.err (!%p6551_p2)
}
  0x40   : > { %6339 = dma.hbm_to_vmem [thread:$0]  (!%p6849_p11), %s7608_s2, 1024, %s6853_s10, [#allocation8], %s6751_s19, %s6751_s19, %s6752_s20  }
  0x41   : > { %s6914_s8 = sadd.s32 1, %s6747_s24   ;;  %s37_s9 = sadd.s32 1, %s6743_s23 }
  0x42   : > { %s34_s11 = ssub.s32 %s6747_s24, %s6914_s8  ;;  %p44_p13 = scmp.ne.s32.totalorder %s6743_s23, %s6739_s22 }
  0x43   : > { %p35_p6 = scmp.eq.s32.totalorder %s34_s11, 0  ;;  %p45_p10 = scmp.eq.s32.totalorder %s6747_s24, 0 }
  0x44   : > { %p7621_p3 = scmp.eq.s32.totalorder %s6817_s25, 1  ;;  %p6359_p7 = scmp.lt.s32.totalorder %s6747_s24, 2 }
  0x45   : > { %s6930_s13 = scalar_select %p35_p6, %s6743_s23, %s37_s9  }
  0x46   : > { %p6924_p5 = por %p7621_p3, %p44_p13  ;;  %p46_p9 = por %p45_p10, %p44_p13 }
  0x47   : > { %s246_s14 = sand.u32 1, %s6743_s23   ;;  %s5003_s10 = sshll.u32 %s6747_s24, 11 }
  0x48   : > { %s7622_s12 = scalar_select %p6924_p5, 1, 0 }
  0x49   : > { %s4836_s15 = sshll.u32 %s246_s14, 7  ;;  %s6937_s7 = scalar_lea.hbm %s7606_s0, %s5003_s10 }
  0x4a   : > { %s250_s18 = scalar_lea.vmem [#allocation4], %s4836_s15  ;;  %p6941_p11 = pnand %p6359_p7, %p46_p9 }
  0x4b   : > { %s257_s30 = sshll.u32 %s250_s18, 4  ;;  %s6945_s11 = scalar_lea.sflag [#allocation5], %s246_s14  ;;  %s6939_s30 = int_to_ptr.vmem [resolvable:$true] %s257_s30 }
  0x4c   : > { %s6555_s26 = scalar_lea.hbm %s6937_s7, 2048  ;;  %p6557_p0 = pneg %p6941_p11 }
  0x4d   : > { %p6556_p12 = scmp.ne.s32.totalorder %s6937_s7, %s6555_s26  ;;  %s6560_s16 = scalar_lea.hbm %s7606_s0, 4096 }
  0x4e   : > { %p6561_p13 = scmp.lt.u32.totalorder %s6937_s7, %s7606_s0  ;;  %p6562_p6 = scmp.lt.u32.totalorder %s6560_s16, %s6555_s26 }
  0x4f   : > { %p6558_p1 = pnand %p6557_p0, %p6556_p12  ;;  %p6564_p3 = scmp.lt.u32.totalorder %s6555_s26, %s6937_s7 }
  0x50   : > { %p6563_p10 = por %p6562_p6, %p6561_p13 }
  0x51   : > { %p6559_p2 = pneg %p6558_p1 }
  0x52   : > { %p6565_p7 = por %p6564_p3, %p6563_p10 }
  0x54   : > { %p6566_p9 = pnand %p6565_p7, %p6559_p2 }
  0x56   : > { %6569 = shalt.err (!%p6566_p9)
}
  0x57   : > { %s6570_s14 = scalar_lea.vmem %s6939_s30, 2048  ;;  %s6753_s15 = smov [#allocation4]  }
  0x58   : > { %p6571_p12 = scmp.ne.s32.totalorder %s6939_s30, %s6570_s14  ;;  %s6575_s10 = sshll.u32 %s6753_s15, 4  ;;  %s6576_s10 = int_to_ptr.vmem [resolvable:$false] %s6575_s10 }
  0x59   : > { %s6577_s17 = scalar_lea.vmem %s6576_s10, 4096  ;;  %p6578_p4 = scmp.lt.s32.totalorder %s6939_s30, %s6576_s10 }
  0x5a   : > { %p6573_p1 = pnand %p6571_p12, %p6557_p0  ;;  %p6579_p13 = scmp.lt.s32.totalorder %s6577_s17, %s6570_s14 }
  0x5c   : > { %p6574_p5 = pneg %p6573_p1  ;;  %p6580_p6 = por %p6579_p13, %p6578_p4 }
  0x5e   : > { %p6581_p10 = pnand %p6580_p6, %p6574_p5 }
  0x60   : > { %6584 = shalt.err (!%p6581_p10)
}
  0x61   : > { %6343 = dma.hbm_to_vmem [thread:$0]  (!%p6941_p11), %s6937_s7, 2048, %s6939_s30, %s6945_s11, %s6751_s19, %s6751_s19, %s6752_s20  }
  0x62   : > { %269 = sbr.rel (%p6838_p8) target bundleno = 766 (0x2fe), region = 32  ;;  %s6979_s26 = sand.u32 (!%p6838_p8), 1, %s6739_s22  }
  0x63   : > { %s6982_s16 = sshll.u32 (!%p6838_p8), %s6979_s26, 7  ;;  %s272_s9 = scalar_lea.sflag (!%p6838_p8), [#allocation5], %s6979_s26 }
  0x64   : > { %s6986_s18 = scalar_lea.vmem (!%p6838_p8), [#allocation4], %s6982_s16  ;;  %p7624_p4 = scmp.ne.s32.totalorder (!%p6838_p8), %s7617_s27, 0 }
  0x69   : > { %6714 = dma.done.wait (%p7624_p4), %s272_s9, 2048  }
  0x6a   : > { %6716 = vsyncadd (%p7624_p4), %s272_s9, 4294965248  ;;  %p7625_p5 = scmp.eq.s32.totalorder %s6817_s25, 0 }
  0x6c   : > { %6718 = dma.done.wait (%p7625_p5), [#allocation8], 10240   ;;  %p7626_p8 = pmov %p7625_p5 }
  0x6d   : > { %v6754_v0 = vmov 0.0   ;;  %v6402_v1 = vld [vmem:[#allocation7] sm:$0xff]   ;;  %v6404_v3 = vld [vmem:[#allocation7 + $0x8] sm:$0xff]   ;;  %v6406_v5 = vld [vmem:[#allocation7 + $0x10] sm:$0xff]   ;;  %s7372_s27 = scalar_lea.vmem [#allocation11], %s6982_s16  ;;  %s7377_s29 = scalar_lea.vmem [#allocation10], %s6982_s16 }
  0x6e   : > { %6720 = vsyncadd (%p7626_p8), [#allocation8], 4294957056  ;;  %328 = vst [vmem:[#allocation2] sm:$0xff] %v6754_v0  ;;  %v6403_v2 = vld [vmem:[#allocation7 + $0x100] sm:$0xff]   ;;  %5579 = vmatprep.subr.bf16.mxu1 %v6402_v1  ;;  %v6405_v4 = vld [vmem:[#allocation7 + $0x108] sm:$0xff]   ;;  %s4580_s19 = sand.u32 1, %s6817_s25  }
  0x6f   : > { %329 = vst [vmem:[#allocation2 + $0x8] sm:$0xff] %v6754_v0  ;;  %330 = vst [vmem:[#allocation2 + $0x10] sm:$0x3] %v6754_v0  ;;  %5771 = vmatprep.subr.bf16.mxu0 %v6403_v2  ;;  %5580 = vmatpush3.bf16.msra.mxu1 %v6402_v1  ;;  %v6407_v6 = vld [vmem:[#allocation7 + $0x110] sm:$0xff]   ;;  %v6408_v7 = vld [vmem:[#allocation7 + $0x18] sm:$0xff]   ;;  %s5068_s20 = sshll.u32 %s6817_s25, 11 }
  0x70   : > { %332 = vst [vmem:[#allocation2 + $0x198] sm:$0xff] %v6754_v0  ;;  %333 = vst [vmem:[#allocation2 + $0x1a0] sm:$0xff] %v6754_v0  ;;  %5772 = vmatpush3.bf16.msra.mxu0 %v6403_v2  ;;  %5581 = vmatprep.subr.bf16.mxu1 %v6404_v3  ;;  %v6409_v8 = vld [vmem:[#allocation7 + $0x118] sm:$0xff]   ;;  %v6410_v9 = vld [vmem:[#allocation7 + $0x20] sm:$0xff]   ;;  %s4620_s7 = sshll.u32 %s7372_s27, 4  ;;  %s4604_s30 = sshll.u32 %s7377_s29, 4  ;;  %s7450_s7 = int_to_ptr.vmem [resolvable:$true] %s4620_s7  ;;  %s7457_s30 = int_to_ptr.vmem [resolvable:$true] %s4604_s30 }
  0x71   : > { %334 = vst [vmem:[#allocation2 + $0x1a8] sm:$0x3] %v6754_v0  ;;  %336 = vst [vmem:[#allocation2 + $0x18] sm:$0x1] %v6754_v0  ;;  %5773 = vmatprep.subr.bf16.mxu0 %v6405_v4  ;;  %v6411_v10 = vld [vmem:[#allocation7 + $0x120] sm:$0xff]   ;;  %v6412_v11 = vld [vmem:[#allocation7 + $0x28] sm:$0xff]   ;;  %s7447_s15 = scalar_lea.hbm %s7610_s4, %s5068_s20  ;;  %s7455_s16 = scalar_lea.hbm %s7609_s3, %s5068_s20 }
  0x72   : > { %337 = vst [vmem:[#allocation2 + $0x30] sm:$0x1] %v6754_v0  ;;  %338 = vst [vmem:[#allocation2 + $0x48] sm:$0x1] %v6754_v0  ;;  %v5071_v13 = vld [vmem:[%s6986_s18] sm:$0xff]   ;;  %v6413_v15 = vld [vmem:[#allocation7 + $0x128] sm:$0xff]  }
  0x73   : > { %339 = vst [vmem:[#allocation2 + $0x60] sm:$0x1] %v6754_v0  ;;  %340 = vst [vmem:[#allocation2 + $0x78] sm:$0x1] %v6754_v0  ;;  %5582 = vmatpush3.bf16.msra.mxu1 %v6404_v3  ;;  %v7040_v14 = vld [vmem:[%s6986_s18] sm:$0xff]  ;;  %v5072_v17 = vunpack.c.l.bf16 %v5071_v13  ;;  %v5073_v18 = vunpack.c.h.bf16 %v5071_v13  ;;  %v5294_v19 = vld [vmem:[%s6986_s18 + $0x8] sm:$0xff]  }
  0x74   : > { %341 = vst [vmem:[#allocation2 + $0x90] sm:$0x1] %v6754_v0  ;;  %342 = vst [vmem:[#allocation2 + $0xa8] sm:$0x1] %v6754_v0  ;;  %5774 = vmatpush3.bf16.msra.mxu0 %v6405_v4  ;;  %5583 = vmatprep.subr.bf16.mxu1 %v6406_v5  ;;  %v5076_v20 = vunpack.c.l.bf16 %v5294_v19  ;;  %v5077_v21 = vunpack.c.h.bf16 %v5294_v19  ;;  %v5295_v22 = vld [vmem:[%s6986_s18 + $0x10] sm:$0xff]   ;;  %v5296_v26 = vld [vmem:[%s6986_s18 + $0x18] sm:$0xff]  }
  0x75   : > { %343 = vst [vmem:[#allocation2 + $0xc0] sm:$0x1] %v6754_v0  ;;  %344 = vst [vmem:[#allocation2 + $0xd8] sm:$0x1] %v6754_v0  ;;  %5775 = vmatprep.subr.bf16.mxu0 %v6407_v6  ;;  %5787 = vmatprep.mubr.bf16.mxu0 %v7040_v14  ;;  %v6414_v23 = vld [vmem:[#allocation7 + $0x30] sm:$0xff]   ;;  %v5080_v24 = vunpack.c.l.bf16 %v5295_v22  ;;  %v5081_v25 = vunpack.c.h.bf16 %v5295_v22  ;;  %v5084_v28 = vunpack.c.l.bf16 %v5296_v26  ;;  %v5085_v29 = vunpack.c.h.bf16 %v5296_v26  ;;  %v5297_v30 = vld [vmem:[%s6986_s18 + $0x20] sm:$0xff]  }
  0x76   : > { %345 = vst [vmem:[#allocation2 + $0xf0] sm:$0x1] %v6754_v0  ;;  %346 = vst [vmem:[#allocation2 + $0x108] sm:$0x1] %v6754_v0  ;;  %v6415_v27 = vld [vmem:[#allocation7 + $0x130] sm:$0xff]   ;;  %v5298_v31 = vld [vmem:[%s6986_s18 + $0x28] sm:$0xff]   ;;  %v5088_v33 = vunpack.c.l.bf16 %v5297_v30  ;;  %v5089_v34 = vunpack.c.h.bf16 %v5297_v30 }
  0x77   : > { %347 = vst [vmem:[#allocation2 + $0x120] sm:$0x1] %v6754_v0  ;;  %348 = vst [vmem:[#allocation2 + $0x138] sm:$0x1] %v6754_v0  ;;  %5584 = vmatpush3.bf16.msra.mxu1 %v6406_v5  ;;  %v6416_v32 = vld [vmem:[#allocation7 + $0x38] sm:$0xff]   ;;  %v5092_v35 = vunpack.c.l.bf16 %v5298_v31  ;;  %v5093_v36 = vunpack.c.h.bf16 %v5298_v31  ;;  %v5299_v40 = vld [vmem:[%s6986_s18 + $0x30] sm:$0xff]  }
  0x78   : > { %349 = vst [vmem:[#allocation2 + $0x150] sm:$0x1] %v6754_v0  ;;  %350 = vst [vmem:[#allocation2 + $0x168] sm:$0x1] %v6754_v0  ;;  %5776 = vmatpush3.bf16.msra.mxu0 %v6407_v6  ;;  %5585 = vmatprep.subr.bf16.mxu1 %v6408_v7  ;;  %v6417_v37 = vld [vmem:[#allocation7 + $0x138] sm:$0xff]   ;;  %v6420_v41 = vld [vmem:[#allocation7 + $0x140] sm:$0xff]   ;;  %v5096_v43 = vunpack.c.l.bf16 %v5299_v40  ;;  %v5097_v44 = vunpack.c.h.bf16 %v5299_v40 }
  0x79   : > { %351 = vst [vmem:[#allocation2 + $0x180] sm:$0x1] %v6754_v0  ;;  %354 = vst [vmem:[#allocation2 + $0x29] sm:$0x1] %v6754_v0  ;;  %5777 = vmatprep.subr.bf16.mxu0 %v6409_v8  ;;  %v6421_v42 = vld [vmem:[#allocation7 + $0x40] sm:$0xff]   ;;  %v5300_v45 = vld [vmem:[%s6986_s18 + $0x38] sm:$0xff]  }
  0x7a   : > { %355 = vst [vmem:[#allocation2 + $0x41] sm:$0x1] %v6754_v0  ;;  %356 = vst [vmem:[#allocation2 + $0x59] sm:$0x1] %v6754_v0  ;;  %v5100_v48 = vunpack.c.l.bf16 %v5300_v45  ;;  %v5101_v49 = vunpack.c.h.bf16 %v5300_v45  ;;  %v7052_v51 = vld [vmem:[%s6986_s18 + $0x8] sm:$0xff]  ;;  %v5301_v53 = vld [vmem:[%s6986_s18 + $0x40] sm:$0xff]  }
  0x7b   : > { %357 = vst [vmem:[#allocation2 + $0x71] sm:$0x1] %v6754_v0  ;;  %358 = vst [vmem:[#allocation2 + $0x89] sm:$0x1] %v6754_v0  ;;  %5586 = vmatpush3.bf16.msra.mxu1 %v6408_v7  ;;  %v7058_v54 = vld [vmem:[%s6986_s18 + $0x10] sm:$0xff]  ;;  %v6424_v55 = vld [vmem:[#allocation7 + $0x148] sm:$0xff]   ;;  %v5104_v57 = vunpack.c.l.bf16 %v5301_v53  ;;  %v5105_v58 = vunpack.c.h.bf16 %v5301_v53 }
  0x7c   : > { %359 = vst [vmem:[#allocation2 + $0xa1] sm:$0x1] %v6754_v0  ;;  %360 = vst [vmem:[#allocation2 + $0xb9] sm:$0x1] %v6754_v0  ;;  %5778 = vmatpush3.bf16.msra.mxu0 %v6409_v8  ;;  %5587 = vmatprep.subr.bf16.mxu1 %v6410_v9  ;;  %v6425_v56 = vld [vmem:[#allocation7 + $0x48] sm:$0xff]   ;;  %v6429_v61 = vld [vmem:[#allocation7 + $0x50] sm:$0xff]  }
  0x7d   : > { %361 = vst [vmem:[#allocation2 + $0xd1] sm:$0x1] %v6754_v0  ;;  %362 = vst [vmem:[#allocation2 + $0xe9] sm:$0x1] %v6754_v0  ;;  %5779 = vmatprep.subr.bf16.mxu0 %v6411_v10  ;;  %v5302_v62 = vld [vmem:[%s6986_s18 + $0x48] sm:$0xff]   ;;  %v6428_v3 = vld [vmem:[#allocation7 + $0x150] sm:$0xff]  }
  0x7e   : > { %363 = vst [vmem:[#allocation2 + $0x101] sm:$0x1] %v6754_v0  ;;  %364 = vst [vmem:[#allocation2 + $0x119] sm:$0x1] %v6754_v0  ;;  %v5109_v1 = vunpack.c.h.bf16 %v5302_v62  ;;  %v5303_v4 = vld [vmem:[%s6986_s18 + $0x50] sm:$0xff]   ;;  %v7068_v8 = vld [vmem:[%s6986_s18 + $0x18] sm:$0xff] }
  0x7f   : > { %365 = vst [vmem:[#allocation2 + $0x131] sm:$0x1] %v6754_v0  ;;  %366 = vst [vmem:[#allocation2 + $0x149] sm:$0x1] %v6754_v0  ;;  %5588 = vmatpush3.bf16.msra.mxu1 %v6410_v9  ;;  %v5112_v6 = vunpack.c.l.bf16 %v5303_v4  ;;  %v5113_v7 = vunpack.c.h.bf16 %v5303_v4  ;;  %v5306_v22 = vld [vmem:[%s6986_s18 + $0x68] sm:$0xff]   ;;  %v5307_v30 = vld [vmem:[%s6986_s18 + $0x70] sm:$0xff]  }
  0x80   : > { %367 = vst [vmem:[#allocation2 + $0x161] sm:$0x1] %v6754_v0  ;;  %368 = vst [vmem:[#allocation2 + $0x179] sm:$0x1] %v6754_v0  ;;  %5780 = vmatpush3.bf16.msra.mxu0 %v6411_v10  ;;  %5589 = vmatprep.subr.bf16.mxu1 %v6412_v11  ;;  %v5304_v10 = vld [vmem:[%s6986_s18 + $0x58] sm:$0xff]   ;;  %v5125_v26 = vunpack.c.h.bf16 %v5306_v22  ;;  %v7086_v31 = vld [vmem:[%s6986_s18 + $0x28] sm:$0xff] }
  0x81   : > { %369 = vst [vmem:[#allocation2 + $0x191] sm:$0x1] %v6754_v0  ;;  %335 = vst [vmem:[#allocation2] sm:$0x1] %v6754_v0  ;;  %5781 = vmatprep.subr.bf16.mxu0 %v6413_v15  ;;  %v5117_v13 = vunpack.c.h.bf16 %v5304_v10  ;;  %v6441_v40 = vld [vmem:[#allocation7 + $0x68] sm:$0xff]   ;;  %v6444_v45 = vld [vmem:[#allocation7 + $0x170] sm:$0xff]  }
  0x82   : > { %352 = vst [vmem:[#allocation2 + $0x198] sm:$0x1] %v6754_v0  ;;  %353 = vst [vmem:[#allocation2 + $0x11] sm:$0x1] %v6754_v0  ;;  %s7465_s9 = scalar_lea.sflag [#allocation12], %s4580_s19  ;;  %p7627_p0 = scmp.ne.s32.totalorder %s7622_s12, 0 }
  0x83   : > { %370 = vst [vmem:[#allocation2 + $0x1a9] sm:$0x1] %v6754_v0  ;;  %436 = vst [vmem:[#allocation2 + $0x19] sm:$0xff] %v5072_v17  ;;  %5590 = vmatpush3.bf16.msra.mxu1 %v6412_v11  ;;  %v7074_v11 = vld [vmem:[%s6986_s18 + $0x20] sm:$0xff]  ;;  %s6755_s20 = smov [#allocation11]  }
  0x84   : > { %437 = vst [vmem:[#allocation2 + $0x21] sm:$0xff] %v5073_v18  ;;  %438 = vst [vmem:[#allocation2 + $0x31] sm:$0xff] %v5076_v20  ;;  %5782 = vmatpush3.bf16.msra.mxu0 %v6413_v15  ;;  %5591 = vmatprep.subr.bf16.mxu1 %v6414_v23  ;;  %v6432_v15 = vld [vmem:[#allocation7 + $0x158] sm:$0xff]   ;;  %s6589_s11 = sshll.u32 %s6755_s20, 4  ;;  %s6590_s11 = int_to_ptr.vmem [resolvable:$false] %s6589_s11 }
  0x85   : > { %439 = vst [vmem:[#allocation2 + $0x39] sm:$0xff] %v5077_v21  ;;  %440 = vst [vmem:[#allocation2 + $0x49] sm:$0xff] %v5080_v24  ;;  %5783 = vmatprep.subr.bf16.mxu0 %v6415_v27  ;;  %v6433_v18 = vld [vmem:[#allocation7 + $0x58] sm:$0xff]   ;;  %p6592_p7 = scmp.lt.s32.totalorder %s7450_s7, %s6590_s11 }
  0x86   : > { %441 = vst [vmem:[#allocation2 + $0x51] sm:$0xff] %v5081_v25  ;;  %442 = vst [vmem:[#allocation2 + $0x61] sm:$0xff] %v5084_v28  ;;  %v5124_v25 = vunpack.c.l.bf16 %v5306_v22  ;;  %v7151_v22 = vld [vmem:[%s6986_s18 + $0x70] sm:$0xff] }
  0x87   : > { %443 = vst [vmem:[#allocation2 + $0x69] sm:$0xff] %v5085_v29  ;;  %444 = vst [vmem:[#allocation2 + $0x79] sm:$0xff] %v5088_v33  ;;  %5592 = vmatpush3.bf16.msra.mxu1 %v6414_v23  ;;  %v6437_v29 = vld [vmem:[#allocation7 + $0x60] sm:$0xff]   ;;  %v5128_v33 = vunpack.c.l.bf16 %v5307_v30 }
  0x88   : > { %v468_v12 = vld [vmem:[#allocation2] sm:$0xff]  ;;  %445 = vst [vmem:[#allocation2 + $0x81] sm:$0xff] %v5089_v34  ;;  %446 = vst [vmem:[#allocation2 + $0x91] sm:$0xff] %v5092_v35  ;;  %5784 = vmatpush3.bf16.msra.mxu0 %v6415_v27  ;;  %5593 = vmatprep.subr.bf16.mxu1 %v6416_v32  ;;  %v6436_v27 = vld [vmem:[#allocation7 + $0x160] sm:$0xff]   ;;  %v5129_v34 = vunpack.c.h.bf16 %v5307_v30 }
  0x89   : > { %v500_v16 = vpack.c.bf16 %v6754_v0, %v468_v12  ;;  %447 = vst [vmem:[#allocation2 + $0x99] sm:$0xff] %v5093_v36  ;;  %5785 = vmatprep.subr.bf16.mxu0 %v6417_v37  ;;  %448 = vst [vmem:[#allocation2 + $0xa9] sm:$0xff] %v5096_v43  ;;  %v5108_v0 = vunpack.c.l.bf16 %v5302_v62  ;;  %v5116_v12 = vunpack.c.l.bf16 %v5304_v10  ;;  %v5308_v35 = vld [vmem:[%s6986_s18 + $0x78] sm:$0xff]   ;;  %v7092_v36 = vld [vmem:[%s6986_s18 + $0x30] sm:$0xff] }
  0x8a   : > { %v470_v38 = vld [vmem:[#allocation2 + $0x18] sm:$0xff]  ;;  %449 = vst [vmem:[#allocation2 + $0xb1] sm:$0xff] %v5097_v44  ;;  %450 = vst [vmem:[#allocation2 + $0xc1] sm:$0xff] %v5100_v48  ;;  %v7101_v48 = vld [vmem:[%s6986_s18 + $0x38] sm:$0xff] }
  0x8b   : > { %5595 = vmatprep.mubr.bf16.mxu1 %v500_v16  ;;  %v471_v39 = vld [vmem:[#allocation2 + $0x20] sm:$0xff]  ;;  %v472_v46 = vld [vmem:[#allocation2 + $0x30] sm:$0xff]  ;;  %5594 = vmatpush3.bf16.msra.mxu1 %v6416_v32  ;;  %451 = vst [vmem:[#allocation2 + $0xc9] sm:$0xff] %v5101_v49  ;;  %452 = vst [vmem:[#allocation2 + $0xd9] sm:$0xff] %v5104_v57 }
  0x8c   : > { %v473_v47 = vld [vmem:[#allocation2 + $0x38] sm:$0xff]  ;;  %v501_v50 = vpack.c.bf16 %v471_v39, %v470_v38  ;;  %5786 = vmatpush3.bf16.msra.mxu0 %v6417_v37  ;;  %5627 = vmatprep.subr.bf16.mxu1 %v6421_v42  ;;  %v474_v59 = vld [vmem:[#allocation2 + $0x48] sm:$0xff]  ;;  %453 = vst [vmem:[#allocation2 + $0xe1] sm:$0xff] %v5105_v58  ;;  %454 = vst [vmem:[#allocation2 + $0xf1] sm:$0xff] %v5108_v0  ;;  %v5132_v37 = vunpack.c.l.bf16 %v5308_v35  ;;  %v5133_v38 = vunpack.c.h.bf16 %v5308_v35 }
  0x8d   : > { %v7054_v52 = vpack.c.bf16 %v473_v47, %v472_v46  ;;  %5819 = vmatprep.subr.bf16.mxu0 %v6420_v41  ;;  %v475_v60 = vld [vmem:[#allocation2 + $0x50] sm:$0xff]  ;;  %v476_v63 = vld [vmem:[#allocation2 + $0x60] sm:$0xff]  ;;  %455 = vst [vmem:[#allocation2 + $0xf9] sm:$0xff] %v5109_v1  ;;  %456 = vst [vmem:[#allocation2 + $0x109] sm:$0xff] %v5112_v6 }
  0x8e   : > { %5596 = vmatmul.mubr.bf16.vlgmr.msra.gmra.mrb[0].mxu1 %v501_v50  ;;  %v477_v2 = vld [vmem:[#allocation2 + $0x68] sm:$0xff]  ;;  %v7065_v5 = vpack.c.bf16 %v475_v60, %v474_v59  ;;  %457 = vst [vmem:[#allocation2 + $0x111] sm:$0xff] %v5113_v7  ;;  %v5305_v16 = vld [vmem:[%s6986_s18 + $0x60] sm:$0xff]   ;;  %v478_v17 = vld [vmem:[#allocation2 + $0x78] sm:$0xff] }
  0x8f   : > { %5788 = vmatmul.mubr.bf16.vlgmr.msra.gmra.mrb[0].mxu0 %v7052_v51  ;;  %5628 = vmatpush3.bf16.msra.mxu1 %v6421_v42  ;;  %v7070_v9 = vpack.c.bf16 %v477_v2, %v476_v63  ;;  %458 = vst [vmem:[#allocation2 + $0x121] sm:$0xff] %v5116_v12  ;;  %459 = vst [vmem:[#allocation2 + $0x129] sm:$0xff] %v5117_v13  ;;  %v5120_v19 = vunpack.c.l.bf16 %v5305_v16  ;;  %v5121_v20 = vunpack.c.h.bf16 %v5305_v16  ;;  %v479_v21 = vld [vmem:[#allocation2 + $0x80] sm:$0xff]  ;;  %v480_v23 = vld [vmem:[#allocation2 + $0x90] sm:$0xff] }
  0x90   : > { %5820 = vmatpush3.bf16.msra.mxu0 %v6420_v41  ;;  %5599 = vmatprep.mubr.bf16.mxu1 %v7054_v52  ;;  %v481_v24 = vld [vmem:[#allocation2 + $0x98] sm:$0xff]  ;;  %v7082_v28 = vpack.c.bf16 %v479_v21, %v478_v17  ;;  %462 = vst [vmem:[#allocation2 + $0x151] sm:$0xff] %v5124_v25  ;;  %463 = vst [vmem:[#allocation2 + $0x159] sm:$0xff] %v5125_v26  ;;  %v482_v41 = vld [vmem:[#allocation2 + $0xa8] sm:$0xff] }
  0x91   : > { %5791 = vmatprep.mubr.bf16.mxu0 %v7058_v54  ;;  %5821 = vmatprep.subr.bf16.mxu0 %v6424_v55  ;;  %460 = vst [vmem:[#allocation2 + $0x139] sm:$0xff] %v5120_v19  ;;  %461 = vst [vmem:[#allocation2 + $0x141] sm:$0xff] %v5121_v20  ;;  %v7088_v32 = vpack.c.bf16 %v481_v24, %v480_v23  ;;  %v6440_v39 = vld [vmem:[#allocation7 + $0x168] sm:$0xff]   ;;  %v483_v42 = vld [vmem:[#allocation2 + $0xb0] sm:$0xff] }
  0x92   : > { %5629 = vmatprep.subr.bf16.mxu1 %v6425_v56  ;;  %464 = vst [vmem:[#allocation2 + $0x169] sm:$0xff] %v5128_v33  ;;  %465 = vst [vmem:[#allocation2 + $0x171] sm:$0xff] %v5129_v34  ;;  %v484_v43 = vld [vmem:[#allocation2 + $0xc0] sm:$0xff]  ;;  %v485_v44 = vld [vmem:[#allocation2 + $0xc8] sm:$0xff]  ;;  %v7098_v46 = vpack.c.bf16 %v483_v42, %v482_v41 }
  0x93   : > { %5630 = vmatpush3.bf16.msra.mxu1 %v6425_v56  ;;  %466 = vst [vmem:[#allocation2 + $0x181] sm:$0xff] %v5132_v37  ;;  %467 = vst [vmem:[#allocation2 + $0x189] sm:$0xff] %v5133_v38  ;;  %v6445_v47 = vld [vmem:[#allocation7 + $0x70] sm:$0xff]   ;;  %v7103_v49 = vpack.c.bf16 %v485_v44, %v484_v43  ;;  %v7106_v50 = vld [vmem:[%s6986_s18 + $0x40] sm:$0xff] }
  0x94   : > { %5822 = vmatpush3.bf16.msra.mxu0 %v6424_v55  ;;  %5631 = vmatprep.subr.bf16.mxu1 %v6429_v61  ;;  %v486_v53 = vld [vmem:[#allocation2 + $0xd8] sm:$0xff]  ;;  %v6448_v55 = vld [vmem:[#allocation7 + $0x178] sm:$0xff]   ;;  %v487_v57 = vld [vmem:[#allocation2 + $0xe0] sm:$0xff] }
  0x95   : > { %5823 = vmatprep.subr.bf16.mxu0 %v6428_v3  ;;  %v6449_v56 = vld [vmem:[#allocation7 + $0x78] sm:$0xff]   ;;  %v488_v58 = vld [vmem:[#allocation2 + $0xf0] sm:$0xff]  ;;  %v489_v59 = vld [vmem:[#allocation2 + $0xf8] sm:$0xff] }
  0x96   : > { %5600 = vmatmul.mubr.bf16.gmra.mrb[4].mxu1 %v7065_v5  ;;  %v7112_v60 = vld [vmem:[#allocation7 + $0x180] sm:$0xff]   ;;  %v7117_v63 = vld [vmem:[%s6986_s18 + $0x48] sm:$0xff]  ;;  %v7119_v0 = vpack.c.bf16 %v489_v59, %v488_v58  ;;  %v7122_v1 = vld [vmem:[%s6986_s18 + $0x50] sm:$0xff] }
  0x97   : > { %5792 = vmatmul.mubr.bf16.gmra.mrb[4].mxu0 %v7068_v8  ;;  %5603 = vmatprep.mubr.bf16.mxu1 %v7070_v9  ;;  %v6451_v62 = vld [vmem:[#allocation7 + $0x80] sm:$0xff]   ;;  %v490_v2 = vld [vmem:[#allocation2 + $0x108] sm:$0xff]  ;;  %v492_v4 = vld [vmem:[#allocation2 + $0x120] sm:$0xff] }
  0x98   : > { %5795 = vmatprep.mubr.bf16.mxu0 %v7074_v11  ;;  %5824 = vmatpush3.bf16.msra.mxu0 %v6428_v3  ;;  %v491_v3 = vld [vmem:[#allocation2 + $0x110] sm:$0xff]  ;;  %v493_v6 = vld [vmem:[#allocation2 + $0x128] sm:$0xff]  ;;  %v495_v16 = vld [vmem:[#allocation2 + $0x140] sm:$0xff] }
  0x99   : > { %5632 = vmatpush3.bf16.msra.mxu1 %v6429_v61  ;;  %5825 = vmatprep.subr.bf16.mxu0 %v6432_v15  ;;  %v7114_v61 = vpack.c.bf16 %v487_v57, %v486_v53  ;;  %v7129_v7 = vpack.c.bf16 %v491_v3, %v490_v2  ;;  %v7132_v10 = vld [vmem:[%s6986_s18 + $0x58] sm:$0xff]  ;;  %v7134_v12 = vpack.c.bf16 %v493_v6, %v492_v4  ;;  %v7137_v13 = vld [vmem:[%s6986_s18 + $0x60] sm:$0xff]  ;;  %v7146_v20 = vld [vmem:[%s6986_s18 + $0x68] sm:$0xff] }
  0x9a   : > { %5633 = vmatprep.subr.bf16.mxu1 %v6433_v18  ;;  %v496_v17 = vld [vmem:[#allocation2 + $0x150] sm:$0xff]  ;;  %v498_v23 = vld [vmem:[#allocation2 + $0x168] sm:$0xff]  ;;  %v2288_v38 = vld [vmem:[#allocation2 + $0x3a] sm:$0xff] }
  0x9b   : > { %v805_v24 = vld [vmem:[#allocation2 + $0x1] sm:$0xff]  ;;  %v806_v25 = vld [vmem:[#allocation2 + $0x9] sm:$0xff]  ;;  %v2287_v37 = vld [vmem:[#allocation2 + $0x32] sm:$0xff] }
  0x9c   : > { %5826 = vmatpush3.bf16.msra.mxu0 %v6432_v15  ;;  %v494_v15 = vld [vmem:[#allocation2 + $0x138] sm:$0xff]  ;;  %v499_v26 = vld [vmem:[#allocation2 + $0x170] sm:$0xff]  ;;  %v6447_v33 = vld [vmem:[%s6986_s18 + $0x78] sm:$0xff]  ;;  %v837_v34 = vpack.c.bf16 %v806_v25, %v805_v24  ;;  %v7164_v41 = vpack.c.bf16 %v2288_v38, %v2287_v37  ;;  %s6585_s18 = scalar_lea.vmem %s7450_s7, 2048 }
  0x9d   : > { %5634 = vmatpush3.bf16.msra.mxu1 %v6433_v18  ;;  %5827 = vmatprep.subr.bf16.mxu0 %v6436_v27  ;;  %v497_v18 = vld [vmem:[#allocation2 + $0x158] sm:$0xff]  ;;  %v7143_v19 = vpack.c.bf16 %v495_v16, %v494_v15  ;;  %v7157_v30 = vpack.c.bf16 %v499_v26, %v498_v23  ;;  %v6454_v57 = vld [vmem:[#allocation7 + $0x190] sm:$0xff]   ;;  %v6456_v59 = vld [vmem:[#allocation7 + $0x198] sm:$0xff]   ;;  %p6586_p11 = scmp.ne.s32.totalorder %s7450_s7, %s6585_s18 }
  0x9e   : > { %5604 = vmatmul.mubr.bf16.gmra.mrb[8].mxu1 %v7082_v28  ;;  %5635 = vmatprep.subr.bf16.mxu1 %v6437_v29  ;;  %v7148_v21 = vpack.c.bf16 %v497_v18, %v496_v17  ;;  %v6452_v43 = vld [vmem:[#allocation7 + $0x188] sm:$0xff]   ;;  %v2297_v2 = vld [vmem:[#allocation2 + $0xaa] sm:$0xff]  ;;  %v2302_v24 = vld [vmem:[#allocation2 + $0xe2] sm:$0xff] }
  0x9f   : > { %5796 = vmatmul.mubr.bf16.gmra.mrb[8].mxu0 %v7086_v31  ;;  %5607 = vmatprep.mubr.bf16.mxu1 %v7088_v32  ;;  %v6453_v44 = vld [vmem:[#allocation7 + $0x88] sm:$0xff]   ;;  %v6458_v4 = vld [vmem:[#allocation7 + $0x1a0] sm:$0xff]   ;;  %v6462_v25 = vld [vmem:[#allocation7 + $0x1b0] sm:$0xff]   ;;  %p6587_p2 = pnand %p6586_p11, %p7627_p0 }
  0xa0   : > { %5799 = vmatprep.mubr.bf16.mxu0 %v7092_v36  ;;  %5828 = vmatpush3.bf16.msra.mxu0 %v6436_v27  ;;  %v2285_v27 = vld [vmem:[#allocation2 + $0x1a] sm:$0xff]  ;;  %v2298_v3 = vld [vmem:[#allocation2 + $0xb2] sm:$0xff]  ;;  %v2300_v18 = vld [vmem:[#allocation2 + $0xca] sm:$0xff] }
  0xa1   : > { %5636 = vmatpush3.bf16.msra.mxu1 %v6437_v29  ;;  %5829 = vmatprep.subr.bf16.mxu0 %v6440_v39  ;;  %v2286_v29 = vld [vmem:[#allocation2 + $0x22] sm:$0xff]  ;;  %v2293_v53 = vld [vmem:[#allocation2 + $0x7a] sm:$0xff]  ;;  %v6459_v6 = vld [vmem:[#allocation7 + $0xa0] sm:$0xff]   ;;  %v7183_v16 = vpack.c.bf16 %v2298_v3, %v2297_v2  ;;  %p6588_p3 = pneg %p6587_p2 }
  0xa2   : > { %5637 = vmatprep.subr.bf16.mxu1 %v6441_v40  ;;  %v7160_v35 = vpack.c.bf16 %v2286_v29, %v2285_v27  ;;  %v6461_v17 = vld [vmem:[#allocation7 + $0xa8] sm:$0xff]   ;;  %v6463_v26 = vld [vmem:[#allocation7 + $0xb0] sm:$0xff]   ;;  %v6465_v29 = vld [vmem:[#allocation7 + $0xb8] sm:$0xff]  }
  0xa3   : > { %v2301_v23 = vld [vmem:[#allocation2 + $0xda] sm:$0xff]  ;;  %v2305_v37 = vld [vmem:[#allocation2 + $0x10a] sm:$0xff]  ;;  %v2306_v38 = vld [vmem:[#allocation2 + $0x112] sm:$0xff] }
  0xa4   : > { %5830 = vmatpush3.bf16.msra.mxu0 %v6440_v39  ;;  %v2289_v39 = vld [vmem:[#allocation2 + $0x4a] sm:$0xff] }
  0xa5   : > { %5638 = vmatpush3.bf16.msra.mxu1 %v6441_v40  ;;  %5831 = vmatprep.subr.bf16.mxu0 %v6444_v45  ;;  %v2290_v40 = vld [vmem:[#allocation2 + $0x52] sm:$0xff] }
  0xa6   : > { %5608 = vmatmul.mubr.bf16.gmra.mrb[12].mxu1 %v7098_v46  ;;  %5639 = vmatprep.subr.bf16.mxu1 %v6445_v47  ;;  %v7166_v42 = vpack.c.bf16 %v2290_v40, %v2289_v39  ;;  %v6466_v39 = vld [vmem:[#allocation7 + $0x1c0] sm:$0xff]  }
  0xa7   : > { %5800 = vmatmul.mubr.bf16.gmra.mrb[12].mxu0 %v7101_v48  ;;  %5611 = vmatprep.mubr.bf16.mxu1 %v7103_v49  ;;  %v6467_v40 = vld [vmem:[#allocation7 + $0xc0] sm:$0xff]  }
  0xa8   : > { %5803 = vmatprep.mubr.bf16.mxu0 %v7106_v50  ;;  %5832 = vmatpush3.bf16.msra.mxu0 %v6444_v45  ;;  %v2291_v45 = vld [vmem:[#allocation2 + $0x62] sm:$0xff] }
  0xa9   : > { %5640 = vmatpush3.bf16.msra.mxu1 %v6445_v47  ;;  %5833 = vmatprep.subr.bf16.mxu0 %v6448_v55  ;;  %v2292_v47 = vld [vmem:[#allocation2 + $0x6a] sm:$0xff] }
  0xaa   : > { %5641 = vmatprep.subr.bf16.mxu1 %v6449_v56  ;;  %v7173_v58 = vpack.c.bf16 %v2292_v47, %v2291_v45  ;;  %v2309_v45 = vld [vmem:[#allocation2 + $0x13a] sm:$0xff]  ;;  %v2310_v47 = vld [vmem:[#allocation2 + $0x142] sm:$0xff] }
  0xac   : > { %5834 = vmatpush3.bf16.msra.mxu0 %v6448_v55  ;;  %v2294_v55 = vld [vmem:[#allocation2 + $0x82] sm:$0xff] }
  0xad   : > { %5642 = vmatpush3.bf16.msra.mxu1 %v6449_v56  ;;  %5867 = vmatprep.subr.bf16.mxu0 %v7112_v60  ;;  %v6455_v56 = vld [vmem:[#allocation7 + $0x90] sm:$0xff]  }
  0xae   : > { %5612 = vmatmul.mubr.bf16.gmra.mrb[16].mxu1 %v7114_v61  ;;  %5675 = vmatprep.subr.bf16.mxu1 %v6451_v62 }
  0xaf   : > { %5804 = vmatmul.mubr.bf16.gmra.mrb[16].mxu0 %v7117_v63  ;;  %5615 = vmatprep.mubr.bf16.mxu1 %v7119_v0 }
  0xb0   : > { %5807 = vmatprep.mubr.bf16.mxu0 %v7122_v1 }
  0xb6   : > { %5616 = vmatmul.mubr.bf16.gmra.mrb[20].mxu1 %v7129_v7 }
  0xb7   : > { %5808 = vmatmul.mubr.bf16.gmra.mrb[20].mxu0 %v7132_v10  ;;  %5619 = vmatprep.mubr.bf16.mxu1 %v7134_v12 }
  0xb8   : > { %5811 = vmatprep.mubr.bf16.mxu0 %v7137_v13 }
  0xbe   : > { %5620 = vmatmul.mubr.bf16.gmra.mrb[24].mxu1 %v7143_v19 }
  0xbf   : > { %5812 = vmatmul.mubr.bf16.gmra.mrb[24].mxu0 %v7146_v20  ;;  %5623 = vmatprep.mubr.bf16.mxu1 %v7148_v21 }
  0xc0   : > { %5815 = vmatprep.mubr.bf16.mxu0 %v7151_v22 }
  0xc6   : > { %5624 = vmatmul.mubr.bf16.gmra.mrb[28].mxu1 %v7157_v30 }
  0xc7   : > { %5816 = vmatmul.mubr.bf16.gmra.mrb[28].mxu0 %v6447_v33  ;;  %5643 = vmatprep.mubr.bf16.mxu1 %v837_v34  ;;  %v2303_v33 = vld [vmem:[#allocation2 + $0xf2] sm:$0xff]  ;;  %v2304_v34 = vld [vmem:[#allocation2 + $0xfa] sm:$0xff] }
  0xc8   : > { %5835 = vmatprep.mubr.bf16.mxu0 %v7160_v35 }
  0xce   : > { %5644 = vmatmul.mubr.bf16.vlgmr.msra.gmra.mrb[0].mxu1 %v7040_v14  ;;  %v7175_v14 = vpack.c.bf16 %v2294_v55, %v2293_v53  ;;  %v7207_v55 = vpack.c.bf16 %v2310_v47, %v2309_v45  ;;  %v6487_v45 = vld [vmem:[#allocation9 + $0x10] sm:$0xff]   ;;  %v3034_v47 = vld [vmem:[#allocation2 + $0x91] sm:$0xff] }
  0xcf   : > { %5836 = vmatmul.mubr.bf16.vlgmr.msra.gmra.mrb[0].mxu0 %v7164_v41  ;;  %5676 = vmatpush3.bf16.msra.mxu1 %v6451_v62  ;;  %v6457_v62 = vld [vmem:[#allocation7 + $0x98] sm:$0xff]  }
  0xd0   : > { %5868 = vmatpush3.bf16.msra.mxu0 %v7112_v60  ;;  %5647 = vmatprep.mubr.bf16.mxu1 %v7052_v51  ;;  %v2295_v51 = vld [vmem:[#allocation2 + $0x92] sm:$0xff]  ;;  %v2296_v60 = vld [vmem:[#allocation2 + $0x9a] sm:$0xff] }
  0xd1   : > { %5839 = vmatprep.mubr.bf16.mxu0 %v7166_v42  ;;  %5869 = vmatprep.subr.bf16.mxu0 %v6452_v43  ;;  %v7181_v15 = vpack.c.bf16 %v2296_v60, %v2295_v51  ;;  %v1175_v51 = vld [vmem:[#allocation2 + $0x2] sm:$0xff]  ;;  %v1176_v60 = vld [vmem:[#allocation2 + $0xa] sm:$0xff] }
  0xd2   : > { %5677 = vmatprep.subr.bf16.mxu1 %v6453_v44  ;;  %v1207_v3 = vpack.c.bf16 %v1176_v60, %v1175_v51  ;;  %v3036_v51 = vld [vmem:[#allocation2 + $0xa9] sm:$0xff]  ;;  %v3037_v60 = vld [vmem:[#allocation2 + $0xb1] sm:$0xff] }
  0xd3   : > { %5678 = vmatpush3.bf16.msra.mxu1 %v6453_v44  ;;  %v2308_v44 = vld [vmem:[#allocation2 + $0x12a] sm:$0xff] }
  0xd4   : > { %5870 = vmatpush3.bf16.msra.mxu0 %v6452_v43  ;;  %5679 = vmatprep.subr.bf16.mxu1 %v6455_v56  ;;  %v7197_v43 = vpack.c.bf16 %v2304_v34, %v2303_v33 }
  0xd5   : > { %5871 = vmatprep.subr.bf16.mxu0 %v6454_v57 }
  0xd6   : > { %5648 = vmatmul.mubr.bf16.gmra.mrb[4].mxu1 %v7058_v54  ;;  %v6460_v54 = vld [vmem:[#allocation7 + $0x1a8] sm:$0xff]  }
  0xd7   : > { %5840 = vmatmul.mubr.bf16.gmra.mrb[4].mxu0 %v7173_v58  ;;  %5651 = vmatprep.mubr.bf16.mxu1 %v7068_v8  ;;  %v2299_v8 = vld [vmem:[#allocation2 + $0xc2] sm:$0xff] }
  0xd8   : > { %5843 = vmatprep.mubr.bf16.mxu0 %v7175_v14  ;;  %5872 = vmatpush3.bf16.msra.mxu0 %v6454_v57  ;;  %v7189_v27 = vpack.c.bf16 %v2300_v18, %v2299_v8  ;;  %v2314_v57 = vld [vmem:[#allocation2 + $0x172] sm:$0xff] }
  0xd9   : > { %5680 = vmatpush3.bf16.msra.mxu1 %v6455_v56  ;;  %5873 = vmatprep.subr.bf16.mxu0 %v6456_v59  ;;  %v2313_v56 = vld [vmem:[#allocation2 + $0x16a] sm:$0xff] }
  0xda   : > { %5681 = vmatprep.subr.bf16.mxu1 %v6457_v62  ;;  %v1547_v18 = vld [vmem:[#allocation2 + $0x30] sm:$0xff] }
  0xdc   : > { %5874 = vmatpush3.bf16.msra.mxu0 %v6456_v59 }
  0xdd   : > { %5682 = vmatpush3.bf16.msra.mxu1 %v6457_v62  ;;  %5875 = vmatprep.subr.bf16.mxu0 %v6458_v4  ;;  %v7215_v62 = vpack.c.bf16 %v2314_v57, %v2313_v56 }
  0xde   : > { %5652 = vmatmul.mubr.bf16.gmra.mrb[8].mxu1 %v7074_v11  ;;  %5683 = vmatprep.subr.bf16.mxu1 %v6459_v6  ;;  %v7191_v11 = vpack.c.bf16 %v2302_v24, %v2301_v23  ;;  %v3028_v23 = vld [vmem:[#allocation2 + $0x49] sm:$0xff]  ;;  %v3029_v24 = vld [vmem:[#allocation2 + $0x51] sm:$0xff] }
  0xdf   : > { %5844 = vmatmul.mubr.bf16.gmra.mrb[8].mxu0 %v7181_v15  ;;  %5655 = vmatprep.mubr.bf16.mxu1 %v7086_v31  ;;  %v6464_v31 = vld [vmem:[#allocation7 + $0x1b8] sm:$0xff]  }
  0xe0   : > { %5847 = vmatprep.mubr.bf16.mxu0 %v7183_v16  ;;  %5876 = vmatpush3.bf16.msra.mxu0 %v6458_v4  ;;  %v6468_v4 = vld [vmem:[#allocation7 + $0x1c8] sm:$0xff]  }
  0xe1   : > { %5684 = vmatpush3.bf16.msra.mxu1 %v6459_v6  ;;  %5877 = vmatprep.subr.bf16.mxu0 %v6460_v54  ;;  %v6470_v6 = vld [vmem:[#allocation7 + $0x1d0] sm:$0xff]  }
  0xe2   : > { %5685 = vmatprep.subr.bf16.mxu1 %v6461_v17 }
  0xe4   : > { %5878 = vmatpush3.bf16.msra.mxu0 %v6460_v54  ;;  %v6498_v54 = vld [vmem:[#allocation2 + $0x8] sm:$0xff] }
  0xe5   : > { %5686 = vmatpush3.bf16.msra.mxu1 %v6461_v17  ;;  %5879 = vmatprep.subr.bf16.mxu0 %v6462_v25 }
  0xe6   : > { %5656 = vmatmul.mubr.bf16.gmra.mrb[12].mxu1 %v7092_v36  ;;  %5687 = vmatprep.subr.bf16.mxu1 %v6463_v26  ;;  %v7199_v36 = vpack.c.bf16 %v2306_v38, %v2305_v37  ;;  %v6484_v37 = vld [vmem:[#allocation7 + $0x208] sm:$0xff]   ;;  %v1551_v38 = vld [vmem:[#allocation2 + $0x60] sm:$0xff] }
  0xe7   : > { %5848 = vmatmul.mubr.bf16.gmra.mrb[12].mxu0 %v7189_v27  ;;  %5659 = vmatprep.mubr.bf16.mxu1 %v7101_v48  ;;  %v2307_v48 = vld [vmem:[#allocation2 + $0x122] sm:$0xff] }
  0xe8   : > { %5851 = vmatprep.mubr.bf16.mxu0 %v7191_v11  ;;  %5880 = vmatpush3.bf16.msra.mxu0 %v6462_v25  ;;  %v7205_v53 = vpack.c.bf16 %v2308_v44, %v2307_v48  ;;  %v1549_v25 = vld [vmem:[#allocation2 + $0x48] sm:$0xff]  ;;  %v1553_v48 = vld [vmem:[#allocation2 + $0x78] sm:$0xff]  ;;  %v1554_v44 = vld [vmem:[#allocation2 + $0x80] sm:$0xff] }
  0xe9   : > { %5688 = vmatpush3.bf16.msra.mxu1 %v6463_v26  ;;  %5881 = vmatprep.subr.bf16.mxu0 %v6464_v31  ;;  %v1550_v26 = vld [vmem:[#allocation2 + $0x50] sm:$0xff]  ;;  %v1581_v56 = vpack.c.bf16 %v1554_v44, %v1553_v48  ;;  %v1569_v48 = vld [vmem:[#allocation2 + $0x138] sm:$0xff]  ;;  %v1570_v44 = vld [vmem:[#allocation2 + $0x140] sm:$0xff] }
  0xea   : > { %5689 = vmatprep.subr.bf16.mxu1 %v6465_v29  ;;  %v1579_v33 = vpack.c.bf16 %v1550_v26, %v1549_v25  ;;  %v1565_v25 = vld [vmem:[#allocation2 + $0x108] sm:$0xff]  ;;  %v1566_v26 = vld [vmem:[#allocation2 + $0x110] sm:$0xff] }
  0xec   : > { %5882 = vmatpush3.bf16.msra.mxu0 %v6464_v31  ;;  %v3031_v31 = vld [vmem:[#allocation2 + $0x69] sm:$0xff] }
  0xed   : > { %5690 = vmatpush3.bf16.msra.mxu1 %v6465_v29  ;;  %5915 = vmatprep.subr.bf16.mxu0 %v6466_v39  ;;  %v7257_v29 = vpack.c.bf16 %v3029_v24, %v3028_v23  ;;  %v3044_v23 = vld [vmem:[#allocation2 + $0x109] sm:$0xff]  ;;  %v3045_v24 = vld [vmem:[#allocation2 + $0x111] sm:$0xff] }
  0xee   : > { %5660 = vmatmul.mubr.bf16.gmra.mrb[16].mxu1 %v7106_v50  ;;  %5723 = vmatprep.subr.bf16.mxu1 %v6467_v40  ;;  %v2311_v50 = vld [vmem:[#allocation2 + $0x152] sm:$0xff] }
  0xef   : > { %5852 = vmatmul.mubr.bf16.gmra.mrb[16].mxu0 %v7197_v43  ;;  %5663 = vmatprep.mubr.bf16.mxu1 %v7117_v63  ;;  %v2312_v63 = vld [vmem:[#allocation2 + $0x15a] sm:$0xff] }
  0xf0   : > { %5855 = vmatprep.mubr.bf16.mxu0 %v7199_v36  ;;  %v7213_v59 = vpack.c.bf16 %v2312_v63, %v2311_v50 }
  0xf6   : > { %5664 = vmatmul.mubr.bf16.gmra.mrb[20].mxu1 %v7122_v1  ;;  %v2315_v1 = vld [vmem:[#allocation2 + $0x182] sm:$0xff] }
  0xf7   : > { %5856 = vmatmul.mubr.bf16.gmra.mrb[20].mxu0 %v7205_v53  ;;  %5667 = vmatprep.mubr.bf16.mxu1 %v7132_v10  ;;  %v2316_v10 = vld [vmem:[#allocation2 + $0x18a] sm:$0xff] }
  0xf8   : > { %5859 = vmatprep.mubr.bf16.mxu0 %v7207_v55  ;;  %v2332_v2 = vpack.c.bf16 %v2316_v10, %v2315_v1  ;;  %v1555_v1 = vld [vmem:[#allocation2 + $0x90] sm:$0xff]  ;;  %v1556_v10 = vld [vmem:[#allocation2 + $0x98] sm:$0xff] }
  0xfe   : > { %5668 = vmatmul.mubr.bf16.gmra.mrb[24].mxu1 %v7137_v13  ;;  %v6469_v13 = vld [vmem:[#allocation7 + $0xc8] sm:$0xff]  }
  0xff   : > { %5860 = vmatmul.mubr.bf16.gmra.mrb[24].mxu0 %v7213_v59  ;;  %5671 = vmatprep.mubr.bf16.mxu1 %v7146_v20  ;;  %v6471_v20 = vld [vmem:[#allocation7 + $0xd0] sm:$0xff]  }
 0x100   : > { %5863 = vmatprep.mubr.bf16.mxu0 %v7215_v62 }
 0x106   : > { %5672 = vmatmul.mubr.bf16.gmra.mrb[28].mxu1 %v7151_v22  ;;  %v6473_v22 = vld [vmem:[#allocation7 + $0xd8] sm:$0xff]  }
 0x107   : > { %5864 = vmatmul.mubr.bf16.gmra.mrb[28].mxu0 %v2332_v2  ;;  %5691 = vmatprep.mubr.bf16.mxu1 %v1207_v3  ;;  %v1557_v2 = vld [vmem:[#allocation2 + $0xa8] sm:$0xff]  ;;  %v1558_v3 = vld [vmem:[#allocation2 + $0xb0] sm:$0xff] }
 0x108   : > { %5883 = vmatprep.mubr.bf16.mxu0 %v7054_v52  ;;  %v6472_v52 = vld [vmem:[#allocation7 + $0x1d8] sm:$0xff]  }
 0x10e   : > { %5692 = vmatmul.mubr.bf16.vlgmr.msra.gmra.mrb[0].mxu1 %v7160_v35  ;;  %v6476_v35 = vld [vmem:[#allocation7 + $0x1e8] sm:$0xff]  }
 0x10f   : > { %5884 = vmatmul.mubr.bf16.vlgmr.msra.gmra.mrb[0].mxu0 %v7065_v5  ;;  %5724 = vmatpush3.bf16.msra.mxu1 %v6467_v40  ;;  %v6474_v5 = vld [vmem:[#allocation7 + $0x1e0] sm:$0xff]   ;;  %v1552_v40 = vld [vmem:[#allocation2 + $0x68] sm:$0xff] }
 0x110   : > { %5916 = vmatpush3.bf16.msra.mxu0 %v6466_v39  ;;  %5695 = vmatprep.mubr.bf16.mxu1 %v7164_v41  ;;  %v6477_v41 = vld [vmem:[#allocation7 + $0xe8] sm:$0xff]   ;;  %v1580_v50 = vpack.c.bf16 %v1552_v40, %v1551_v38  ;;  %v1568_v40 = vld [vmem:[#allocation2 + $0x128] sm:$0xff] }
 0x111   : > { %5887 = vmatprep.mubr.bf16.mxu0 %v7070_v9  ;;  %5917 = vmatprep.subr.bf16.mxu0 %v6468_v4  ;;  %v6475_v9 = vld [vmem:[#allocation7 + $0xe0] sm:$0xff]   ;;  %v6485_v39 = vld [vmem:[#allocation9 + $0x8] sm:$0xff]  }
 0x112   : > { %5725 = vmatprep.subr.bf16.mxu1 %v6469_v13 }
 0x113   : > { %5726 = vmatpush3.bf16.msra.mxu1 %v6469_v13  ;;  %v3039_v13 = vld [vmem:[#allocation2 + $0xc9] sm:$0xff] }
 0x114   : > { %5918 = vmatpush3.bf16.msra.mxu0 %v6468_v4  ;;  %5727 = vmatprep.subr.bf16.mxu1 %v6471_v20  ;;  %v3038_v4 = vld [vmem:[#allocation2 + $0xc1] sm:$0xff] }
 0x115   : > { %5919 = vmatprep.subr.bf16.mxu0 %v6470_v6 }
 0x116   : > { %5696 = vmatmul.mubr.bf16.gmra.mrb[4].mxu1 %v7166_v42  ;;  %v6480_v42 = vld [vmem:[#allocation7 + $0x1f8] sm:$0xff]  }
 0x117   : > { %5888 = vmatmul.mubr.bf16.gmra.mrb[4].mxu0 %v7082_v28  ;;  %5699 = vmatprep.mubr.bf16.mxu1 %v7173_v58  ;;  %v6478_v28 = vld [vmem:[#allocation7 + $0x1f0] sm:$0xff]   ;;  %v6481_v58 = vld [vmem:[#allocation7 + $0xf8] sm:$0xff]  }
 0x118   : > { %5891 = vmatprep.mubr.bf16.mxu0 %v7088_v32  ;;  %5920 = vmatpush3.bf16.msra.mxu0 %v6470_v6  ;;  %v6479_v32 = vld [vmem:[#allocation7 + $0xf0] sm:$0xff]   ;;  %v1582_v6 = vpack.c.bf16 %v1556_v10, %v1555_v1  ;;  %v3052_v1 = vld [vmem:[#allocation2 + $0x169] sm:$0xff]  ;;  %v3053_v10 = vld [vmem:[#allocation2 + $0x171] sm:$0xff] }
 0x119   : > { %5728 = vmatpush3.bf16.msra.mxu1 %v6471_v20  ;;  %5921 = vmatprep.subr.bf16.mxu0 %v6472_v52  ;;  %v6490_v20 = vld [vmem:[#allocation7 + $0x220] sm:$0xff]  }
 0x11a   : > { %5729 = vmatprep.subr.bf16.mxu1 %v6473_v22 }
 0x11c   : > { %5922 = vmatpush3.bf16.msra.mxu0 %v6472_v52  ;;  %v6491_v52 = vld [vmem:[#allocation9 + $0x20] sm:$0xff]  }
 0x11d   : > { %5730 = vmatpush3.bf16.msra.mxu1 %v6473_v22  ;;  %5923 = vmatprep.subr.bf16.mxu0 %v6474_v5  ;;  %v7269_v22 = vpack.c.bf16 %v3037_v60, %v3036_v51  ;;  %v1573_v51 = vld [vmem:[#allocation2 + $0x168] sm:$0xff]  ;;  %v1574_v60 = vld [vmem:[#allocation2 + $0x170] sm:$0xff] }
 0x11e   : > { %5700 = vmatmul.mubr.bf16.gmra.mrb[8].mxu1 %v7175_v14  ;;  %5731 = vmatprep.subr.bf16.mxu1 %v6475_v9 }
 0x11f   : > { %5892 = vmatmul.mubr.bf16.gmra.mrb[8].mxu0 %v7098_v46  ;;  %5703 = vmatprep.mubr.bf16.mxu1 %v7181_v15  ;;  %v6482_v46 = vld [vmem:[#allocation7 + $0x200] sm:$0xff]   ;;  %v1546_v15 = vld [vmem:[#allocation2 + $0x20] sm:$0xff] }
 0x120   : > { %5895 = vmatprep.mubr.bf16.mxu0 %v7103_v49  ;;  %5924 = vmatpush3.bf16.msra.mxu0 %v6474_v5  ;;  %v6483_v49 = vld [vmem:[#allocation9] sm:$0xff]   ;;  %v1583_v5 = vpack.c.bf16 %v1558_v3, %v1557_v2  ;;  %v3054_v2 = vld [vmem:[#allocation2 + $0x181] sm:$0xff] }
 0x121   : > { %5732 = vmatpush3.bf16.msra.mxu1 %v6475_v9  ;;  %5925 = vmatprep.subr.bf16.mxu0 %v6476_v35  ;;  %v7271_v9 = vpack.c.bf16 %v3039_v13, %v3038_v4  ;;  %v3055_v3 = vld [vmem:[#allocation2 + $0x189] sm:$0xff]  ;;  %v7293_v13 = vpack.c.bf16 %v3053_v10, %v3052_v1 }
 0x122   : > { %5733 = vmatprep.subr.bf16.mxu1 %v6477_v41  ;;  %v3427_v10 = vld [vmem:[#allocation2 + $0x1a2] sm:$0xff] }
 0x124   : > { %5926 = vmatpush3.bf16.msra.mxu0 %v6476_v35  ;;  %v6492_v35 = vld [vmem:[#allocation7 + $0x228] sm:$0xff]  }
 0x125   : > { %5734 = vmatpush3.bf16.msra.mxu1 %v6477_v41  ;;  %5927 = vmatprep.subr.bf16.mxu0 %v6478_v28  ;;  %v6493_v41 = vld [vmem:[#allocation9 + $0x28] sm:$0xff]  }
 0x126   : > { %5704 = vmatmul.mubr.bf16.gmra.mrb[12].mxu1 %v7183_v16  ;;  %5735 = vmatprep.subr.bf16.mxu1 %v6479_v32  ;;  %v3027_v16 = vld [vmem:[#allocation2 + $0x39] sm:$0xff] }
 0x127   : > { %5896 = vmatmul.mubr.bf16.gmra.mrb[12].mxu0 %v7114_v61  ;;  %5707 = vmatprep.mubr.bf16.mxu1 %v7189_v27  ;;  %v2684_v61 = vld [vmem:[#allocation2 + $0x180] sm:$0xff] }
 0x128   : > { %5899 = vmatprep.mubr.bf16.mxu0 %v7119_v0  ;;  %5928 = vmatpush3.bf16.msra.mxu0 %v6478_v28  ;;  %v2685_v0 = vld [vmem:[#allocation2 + $0x188] sm:$0xff]  ;;  %v1559_v28 = vld [vmem:[#allocation2 + $0xc0] sm:$0xff] }
 0x129   : > { %5736 = vmatpush3.bf16.msra.mxu1 %v6479_v32  ;;  %5929 = vmatprep.subr.bf16.mxu0 %v6480_v42  ;;  %v7247_v14 = vpack.c.bf16 %v2685_v0, %v2684_v61  ;;  %v1560_v32 = vld [vmem:[#allocation2 + $0xc8] sm:$0xff]  ;;  %v3042_v61 = vld [vmem:[#allocation2 + $0xf1] sm:$0xff]  ;;  %v3043_v0 = vld [vmem:[#allocation2 + $0xf9] sm:$0xff] }
 0x12a   : > { %5737 = vmatprep.subr.bf16.mxu1 %v6481_v58 }
 0x12c   : > { %5930 = vmatpush3.bf16.msra.mxu0 %v6480_v42  ;;  %v3040_v42 = vld [vmem:[#allocation2 + $0xd9] sm:$0xff] }
 0x12d   : > { %5738 = vmatpush3.bf16.msra.mxu1 %v6481_v58  ;;  %5963 = vmatprep.subr.bf16.mxu0 %v6482_v46  ;;  %v3041_v58 = vld [vmem:[#allocation2 + $0xe1] sm:$0xff] }
 0x12e   : > { %5708 = vmatmul.mubr.bf16.gmra.mrb[16].mxu1 %v7191_v11  ;;  %6011 = vmatprep.subr.bf16.mxu1 %v6483_v49  ;;  %v3030_v11 = vld [vmem:[#allocation2 + $0x61] sm:$0xff] }
 0x12f   : > { %5900 = vmatmul.mubr.bf16.gmra.mrb[16].mxu0 %v7129_v7  ;;  %5711 = vmatprep.mubr.bf16.mxu1 %v7197_v43  ;;  %v2686_v7 = vld [vmem:[#allocation2 + $0x198] sm:$0xff]  ;;  %v7259_v34 = vpack.c.bf16 %v3031_v31, %v3030_v11  ;;  %v3047_v11 = vld [vmem:[#allocation2 + $0x129] sm:$0xff] }
 0x130   : > { %5903 = vmatprep.mubr.bf16.mxu0 %v7134_v12  ;;  %v1545_v12 = vld [vmem:[#allocation2 + $0x18] sm:$0xff]  ;;  %v2703_v17 = vpack.c.bf16 %v6498_v54, %v2686_v7  ;;  %v6494_v7 = vld [vmem:[#allocation7 + $0x230] sm:$0xff]   ;;  %v7277_v54 = vpack.c.bf16 %v3043_v0, %v3042_v61 }
 0x131   : > { %v3032_v43 = vld [vmem:[#allocation2 + $0x79] sm:$0xff]  ;;  %v3400_v0 = vld [vmem:[#allocation2 + $0x62] sm:$0xff] }
 0x132   : > { %v3399_v61 = vld [vmem:[#allocation2 + $0x52] sm:$0xff] }
 0x136   : > { %5712 = vmatmul.mubr.bf16.gmra.mrb[20].mxu1 %v7199_v36  ;;  %v3033_v36 = vld [vmem:[#allocation2 + $0x81] sm:$0xff] }
 0x137   : > { %5904 = vmatmul.mubr.bf16.gmra.mrb[20].mxu0 %v7143_v19  ;;  %5715 = vmatprep.mubr.bf16.mxu1 %v7205_v53  ;;  %v3026_v19 = vld [vmem:[#allocation2 + $0x31] sm:$0xff]  ;;  %v3035_v53 = vld [vmem:[#allocation2 + $0x99] sm:$0xff]  ;;  %v7263_v63 = vpack.c.bf16 %v3033_v36, %v3032_v43  ;;  %v3049_v36 = vld [vmem:[#allocation2 + $0x141] sm:$0xff] }
 0x138   : > { %5907 = vmatprep.mubr.bf16.mxu0 %v7148_v21  ;;  %v1577_v21 = vpack.c.bf16 %v1546_v15, %v1545_v12  ;;  %v7253_v8 = vpack.c.bf16 %v3027_v16, %v3026_v19  ;;  %v7265_v57 = vpack.c.bf16 %v3035_v53, %v3034_v47  ;;  %v1584_v12 = vpack.c.bf16 %v1560_v32, %v1559_v28  ;;  %v6495_v15 = vld [vmem:[#allocation9 + $0x30] sm:$0xff]   ;;  %v3396_v28 = vld [vmem:[#allocation2 + $0x32] sm:$0xff] }
 0x139   : > { %v7275_v19 = vpack.c.bf16 %v3041_v58, %v3040_v42  ;;  %v3048_v43 = vld [vmem:[#allocation2 + $0x139] sm:$0xff] }
 0x13a   : > { %v3051_v47 = vld [vmem:[#allocation2 + $0x159] sm:$0xff] }
 0x13b   : > { %v3397_v32 = vld [vmem:[#allocation2 + $0x3a] sm:$0xff] }
 0x13e   : > { %5716 = vmatmul.mubr.bf16.gmra.mrb[24].mxu1 %v7207_v55  ;;  %v6486_v55 = vld [vmem:[#allocation7 + $0x210] sm:$0xff]  }
 0x13f   : > { %5908 = vmatmul.mubr.bf16.gmra.mrb[24].mxu0 %v7157_v30  ;;  %5719 = vmatprep.mubr.bf16.mxu1 %v7213_v59  ;;  %v1548_v30 = vld [vmem:[#allocation2 + $0x38] sm:$0xff]  ;;  %v6488_v59 = vld [vmem:[#allocation7 + $0x218] sm:$0xff]  }
 0x140   : > { %5911 = vmatprep.mubr.bf16.mxu0 %v7247_v14  ;;  %v1578_v27 = vpack.c.bf16 %v1548_v30, %v1547_v18  ;;  %v1563_v18 = vld [vmem:[#allocation2 + $0xf0] sm:$0xff]  ;;  %v1564_v30 = vld [vmem:[#allocation2 + $0xf8] sm:$0xff] }
 0x141   : > { %v1586_v31 = vpack.c.bf16 %v1564_v30, %v1563_v18  ;;  %v3405_v18 = vld [vmem:[#allocation2 + $0x9a] sm:$0xff] }
 0x146   : > { %5720 = vmatmul.mubr.bf16.gmra.mrb[28].mxu1 %v7215_v62  ;;  %v6489_v62 = vld [vmem:[#allocation9 + $0x18] sm:$0xff]  }
 0x147   : > { %5912 = vmatmul.mubr.bf16.gmra.mrb[28].mxu0 %v2703_v17  ;;  %5739 = vmatprep.mubr.bf16.mxu1 %v1577_v21  ;;  %v6496_v17 = vld [vmem:[#allocation7 + $0x238] sm:$0xff]  }
 0x148   : > { %5931 = vmatprep.mubr.bf16.mxu0 %v7253_v8  ;;  %v6497_v21 = vld [vmem:[#allocation9 + $0x38] sm:$0xff]  }
 0x14e   : > { %5740 = vmatmul.mubr.bf16.vlgmr.msra.gmra.mrb[0].mxu1 %v1578_v27  ;;  %v3046_v27 = vld [vmem:[#allocation2 + $0x121] sm:$0xff] }
 0x14f   : > { %5932 = vmatmul.mubr.bf16.vlgmr.msra.gmra.mrb[0].mxu0 %v7257_v29  ;;  %6012 = vmatpush3.bf16.msra.mxu1 %v6483_v49  ;;  %v1562_v49 = vld [vmem:[#allocation2 + $0xe0] sm:$0xff]  ;;  %v7283_v38 = vpack.c.bf16 %v3047_v11, %v3046_v27 }
 0x150   : > { %5964 = vmatpush3.bf16.msra.mxu0 %v6482_v46  ;;  %5743 = vmatprep.mubr.bf16.mxu1 %v1579_v33  ;;  %v1561_v46 = vld [vmem:[#allocation2 + $0xd8] sm:$0xff]  ;;  %v7281_v33 = vpack.c.bf16 %v3045_v24, %v3044_v23  ;;  %v3406_v23 = vld [vmem:[#allocation2 + $0xaa] sm:$0xff]  ;;  %v3411_v11 = vld [vmem:[#allocation2 + $0xe2] sm:$0xff] }
 0x151   : > { %5935 = vmatprep.mubr.bf16.mxu0 %v7259_v34  ;;  %5965 = vmatprep.subr.bf16.mxu0 %v6484_v37  ;;  %v1585_v16 = vpack.c.bf16 %v1562_v49, %v1561_v46  ;;  %v3428_v46 = vpack.c.bf16 %v3397_v32, %v3396_v28  ;;  %v3398_v49 = vld [vmem:[#allocation2 + $0x4a] sm:$0xff]  ;;  %v3407_v24 = vld [vmem:[#allocation2 + $0xb2] sm:$0xff] }
 0x152   : > { %6013 = vmatprep.subr.bf16.mxu1 %v6485_v39 }
 0x153   : > { %6014 = vmatpush3.bf16.msra.mxu1 %v6485_v39  ;;  %v1567_v39 = vld [vmem:[#allocation2 + $0x120] sm:$0xff] }
 0x154   : > { %5966 = vmatpush3.bf16.msra.mxu0 %v6484_v37  ;;  %6015 = vmatprep.subr.bf16.mxu1 %v6487_v45  ;;  %v1587_v37 = vpack.c.bf16 %v1566_v26, %v1565_v25  ;;  %v1588_v53 = vpack.c.bf16 %v1568_v40, %v1567_v39  ;;  %v3408_v25 = vld [vmem:[#allocation2 + $0xc2] sm:$0xff]  ;;  %v3433_v26 = vpack.c.bf16 %v3407_v24, %v3406_v23  ;;  %v3415_v40 = vld [vmem:[#allocation2 + $0x112] sm:$0xff] }
 0x155   : > { %5967 = vmatprep.subr.bf16.mxu0 %v6486_v55 }
 0x156   : > { %5744 = vmatmul.mubr.bf16.gmra.mrb[4].mxu1 %v1580_v50  ;;  %v1589_v50 = vpack.c.bf16 %v1570_v44, %v1569_v48  ;;  %v3419_v44 = vld [vmem:[#allocation2 + $0x142] sm:$0xff] }
 0x157   : > { %5936 = vmatmul.mubr.bf16.gmra.mrb[4].mxu0 %v7263_v63  ;;  %5747 = vmatprep.mubr.bf16.mxu1 %v1581_v56 }
 0x158   : > { %5939 = vmatprep.mubr.bf16.mxu0 %v7265_v57  ;;  %5968 = vmatpush3.bf16.msra.mxu0 %v6486_v55  ;;  %v7287_v55 = vpack.c.bf16 %v3049_v36, %v3048_v43  ;;  %v3416_v43 = vld [vmem:[#allocation2 + $0x122] sm:$0xff] }
 0x159   : > { %6016 = vmatpush3.bf16.msra.mxu1 %v6487_v45  ;;  %5969 = vmatprep.subr.bf16.mxu0 %v6488_v59  ;;  %v3050_v45 = vld [vmem:[#allocation2 + $0x151] sm:$0xff] }
 0x15a   : > { %6017 = vmatprep.subr.bf16.mxu1 %v6489_v62  ;;  %v7289_v56 = vpack.c.bf16 %v3051_v47, %v3050_v45  ;;  %v3420_v45 = vld [vmem:[#allocation2 + $0x152] sm:$0xff] }
 0x15c   : > { %5970 = vmatpush3.bf16.msra.mxu0 %v6488_v59  ;;  %v1571_v59 = vld [vmem:[#allocation2 + $0x150] sm:$0xff] }
 0x15d   : > { %6018 = vmatpush3.bf16.msra.mxu1 %v6489_v62  ;;  %5971 = vmatprep.subr.bf16.mxu0 %v6490_v20  ;;  %v1572_v62 = vld [vmem:[#allocation2 + $0x158] sm:$0xff] }
 0x15e   : > { %5748 = vmatmul.mubr.bf16.gmra.mrb[8].mxu1 %v1582_v6  ;;  %6019 = vmatprep.subr.bf16.mxu1 %v6491_v52  ;;  %v1590_v4 = vpack.c.bf16 %v1572_v62, %v1571_v59  ;;  %v7295_v6 = vpack.c.bf16 %v3055_v3, %v3054_v2  ;;  %v3424_v59 = vld [vmem:[#allocation2 + $0x182] sm:$0xff] }
 0x15f   : > { %5940 = vmatmul.mubr.bf16.gmra.mrb[8].mxu0 %v7269_v22  ;;  %5751 = vmatprep.mubr.bf16.mxu1 %v1583_v5  ;;  %v3057_v5 = vld [vmem:[#allocation2 + $0x1a1] sm:$0xff] }
 0x160   : > { %5943 = vmatprep.mubr.bf16.mxu0 %v7271_v9  ;;  %5972 = vmatpush3.bf16.msra.mxu0 %v6490_v20  ;;  %v1591_v20 = vpack.c.bf16 %v1574_v60, %v1573_v51 }
 0x161   : > { %6020 = vmatpush3.bf16.msra.mxu1 %v6491_v52  ;;  %5973 = vmatprep.subr.bf16.mxu0 %v6492_v35  ;;  %v3056_v52 = vld [vmem:[#allocation2 + $0x199] sm:$0xff] }
 0x162   : > { %6021 = vmatprep.subr.bf16.mxu1 %v6493_v41  ;;  %v3073_v42 = vpack.c.bf16 %v3057_v5, %v3056_v52 }
 0x164   : > { %5974 = vmatpush3.bf16.msra.mxu0 %v6492_v35  ;;  %v4034_v35 = vld [vmem:[#allocation2 + $0x19] sm:$0xff] }
 0x165   : > { %6022 = vmatpush3.bf16.msra.mxu1 %v6493_v41  ;;  %5975 = vmatprep.subr.bf16.mxu0 %v6494_v7  ;;  %v4035_v41 = vld [vmem:[#allocation2 + $0x21] sm:$0xff] }
 0x166   : > { %5752 = vmatmul.mubr.bf16.gmra.mrb[12].mxu1 %v1584_v12  ;;  %6023 = vmatprep.subr.bf16.mxu1 %v6495_v15  ;;  %v4066_v58 = vpack.c.bf16 %v4035_v41, %v4034_v35  ;;  %v3429_v12 = vpack.c.bf16 %v3399_v61, %v3398_v49 }
 0x167   : > { %5944 = vmatmul.mubr.bf16.gmra.mrb[12].mxu0 %v7275_v19  ;;  %5755 = vmatprep.mubr.bf16.mxu1 %v1585_v16  ;;  %v3402_v16 = vld [vmem:[#allocation2 + $0x7a] sm:$0xff] }
 0x168   : > { %5947 = vmatprep.mubr.bf16.mxu0 %v7277_v54  ;;  %5976 = vmatpush3.bf16.msra.mxu0 %v6494_v7  ;;  %v3401_v7 = vld [vmem:[#allocation2 + $0x6a] sm:$0xff] }
 0x169   : > { %6024 = vmatpush3.bf16.msra.mxu1 %v6495_v15  ;;  %5977 = vmatprep.subr.bf16.mxu0 %v6496_v17  ;;  %v3430_v15 = vpack.c.bf16 %v3401_v7, %v3400_v0 }
 0x16a   : > { %6025 = vmatprep.subr.bf16.mxu1 %v6497_v21 }
 0x16c   : > { %5978 = vmatpush3.bf16.msra.mxu0 %v6496_v17  ;;  %v3403_v17 = vld [vmem:[#allocation2 + $0x82] sm:$0xff] }
 0x16d   : > { %6026 = vmatpush3.bf16.msra.mxu1 %v6497_v21  ;;  %v3404_v21 = vld [vmem:[#allocation2 + $0x92] sm:$0xff] }
 0x16e   : > { %5756 = vmatmul.mubr.bf16.gmra.mrb[16].mxu1 %v1586_v31  ;;  %v3432_v30 = vpack.c.bf16 %v3405_v18, %v3404_v21  ;;  %v3412_v31 = vld [vmem:[#allocation2 + $0xf2] sm:$0xff] }
 0x16f   : > { %5948 = vmatmul.mubr.bf16.gmra.mrb[16].mxu0 %v7281_v33  ;;  %5759 = vmatprep.mubr.bf16.mxu1 %v1587_v37 }
 0x170   : > { %5951 = vmatprep.mubr.bf16.mxu0 %v7283_v38 }
 0x176   : > { %5760 = vmatmul.mubr.bf16.gmra.mrb[20].mxu1 %v1588_v53 }
 0x177   : > { %5952 = vmatmul.mubr.bf16.gmra.mrb[20].mxu0 %v7287_v55  ;;  %5763 = vmatprep.mubr.bf16.mxu1 %v1589_v50  ;;  %v3423_v50 = vld [vmem:[#allocation2 + $0x172] sm:$0xff] }
 0x178   : > { %5955 = vmatprep.mubr.bf16.mxu0 %v7289_v56 }
 0x17e   : > { %5764 = vmatmul.mubr.bf16.gmra.mrb[24].mxu1 %v1590_v4 }
 0x17f   : > { %5956 = vmatmul.mubr.bf16.gmra.mrb[24].mxu0 %v7293_v13  ;;  %5767 = vmatprep.mubr.bf16.mxu1 %v1591_v20 }
 0x180   : > { %5959 = vmatprep.mubr.bf16.mxu0 %v7295_v6 }
 0x186   : > { %5768 = vmatmul.mubr.bf16.gmra.mrb[28].mxu1 %v7247_v14  ;;  %v3431_v14 = vpack.c.bf16 %v3403_v17, %v3402_v16 }
 0x187   : > { %5960 = vmatmul.mubr.bf16.gmra.mrb[28].mxu0 %v3073_v42  ;;  %6027 = vmatprep.mubr.bf16.mxu1 %v4066_v58 }
 0x188   : > { %5979 = vmatprep.mubr.bf16.mxu0 %v3428_v46 }
 0x18e   : > { %6028 = vmatmul.mubr.bf16.vlgmr.msra.gmra.mrb[32].mxu1 %v7253_v8  ;;  %v3409_v8 = vld [vmem:[#allocation2 + $0xca] sm:$0xff] }
 0x18f   : > { %5980 = vmatmul.mubr.bf16.vlgmr.msra.gmra.mrb[0].mxu0 %v3429_v12  ;;  %6031 = vmatprep.mubr.bf16.mxu1 %v7257_v29  ;;  %v3434_v27 = vpack.c.bf16 %v3409_v8, %v3408_v25  ;;  %v3410_v29 = vld [vmem:[#allocation2 + $0xda] sm:$0xff] }
 0x190   : > { %5983 = vmatprep.mubr.bf16.mxu0 %v3430_v15  ;;  %v3435_v37 = vpack.c.bf16 %v3411_v11, %v3410_v29 }
 0x196   : > { %6032 = vmatmul.mubr.bf16.gmra.mrb[36].mxu1 %v7259_v34  ;;  %v3413_v34 = vld [vmem:[#allocation2 + $0xfa] sm:$0xff] }
 0x197   : > { %5984 = vmatmul.mubr.bf16.gmra.mrb[4].mxu0 %v3431_v14  ;;  %6035 = vmatprep.mubr.bf16.mxu1 %v7263_v63  ;;  %v3436_v39 = vpack.c.bf16 %v3413_v34, %v3412_v31  ;;  %v3414_v63 = vld [vmem:[#allocation2 + $0x10a] sm:$0xff] }
 0x198   : > { %5987 = vmatprep.mubr.bf16.mxu0 %v3432_v30  ;;  %v3437_v36 = vpack.c.bf16 %v3415_v40, %v3414_v63 }
 0x19e   : > { %6036 = vmatmul.mubr.bf16.gmra.mrb[40].mxu1 %v7265_v57  ;;  %v3417_v57 = vld [vmem:[#allocation2 + $0x12a] sm:$0xff] }
 0x19f   : > { %5988 = vmatmul.mubr.bf16.gmra.mrb[8].mxu0 %v3433_v26  ;;  %6039 = vmatprep.mubr.bf16.mxu1 %v7269_v22  ;;  %v3438_v48 = vpack.c.bf16 %v3417_v57, %v3416_v43  ;;  %v3418_v22 = vld [vmem:[#allocation2 + $0x13a] sm:$0xff] }
 0x1a0   : > { %5991 = vmatprep.mubr.bf16.mxu0 %v3434_v27  ;;  %v3439_v47 = vpack.c.bf16 %v3419_v44, %v3418_v22 }
 0x1a6   : > { %6040 = vmatmul.mubr.bf16.gmra.mrb[44].mxu1 %v7271_v9  ;;  %v3421_v9 = vld [vmem:[#allocation2 + $0x15a] sm:$0xff] }
 0x1a7   : > { %5992 = vmatmul.mubr.bf16.gmra.mrb[12].mxu0 %v3435_v37  ;;  %6043 = vmatprep.mubr.bf16.mxu1 %v7275_v19  ;;  %v3440_v53 = vpack.c.bf16 %v3421_v9, %v3420_v45  ;;  %v3422_v19 = vld [vmem:[#allocation2 + $0x16a] sm:$0xff] }
 0x1a8   : > { %5995 = vmatprep.mubr.bf16.mxu0 %v3436_v39  ;;  %v3441_v62 = vpack.c.bf16 %v3423_v50, %v3422_v19 }
 0x1ae   : > { %6044 = vmatmul.mubr.bf16.gmra.mrb[48].mxu1 %v7277_v54  ;;  %v3425_v54 = vld [vmem:[#allocation2 + $0x18a] sm:$0xff] }
 0x1af   : > { %5996 = vmatmul.mubr.bf16.gmra.mrb[16].mxu0 %v3437_v36  ;;  %6047 = vmatprep.mubr.bf16.mxu1 %v7281_v33  ;;  %v3442_v1 = vpack.c.bf16 %v3425_v54, %v3424_v59  ;;  %v3426_v33 = vld [vmem:[#allocation2 + $0x19a] sm:$0xff] }
 0x1b0   : > { %5999 = vmatprep.mubr.bf16.mxu0 %v3438_v48  ;;  %v3443_v51 = vpack.c.bf16 %v3427_v10, %v3426_v33 }
 0x1b6   : > { %6048 = vmatmul.mubr.bf16.gmra.mrb[52].mxu1 %v7283_v38 }
 0x1b7   : > { %6000 = vmatmul.mubr.bf16.gmra.mrb[20].mxu0 %v3439_v47  ;;  %6051 = vmatprep.mubr.bf16.mxu1 %v7287_v55 }
 0x1b8   : > { %6003 = vmatprep.mubr.bf16.mxu0 %v3440_v53 }
 0x1be   : > { %6052 = vmatmul.mubr.bf16.gmra.mrb[56].mxu1 %v7289_v56 }
 0x1bf   : > { %6004 = vmatmul.mubr.bf16.gmra.mrb[24].mxu0 %v3441_v62  ;;  %6055 = vmatprep.mubr.bf16.mxu1 %v7293_v13 }
 0x1c0   : > { %6007 = vmatprep.mubr.bf16.mxu0 %v3442_v1 }
 0x1c6   : > { %6056 = vmatmul.mubr.bf16.gmra.mrb[60].mxu1 %v7295_v6 }
 0x1c7   : > { %6008 = vmatmul.mubr.bf16.gmra.mrb[28].mxu0 %v3443_v51 }
 0x221   : > { %v5741_v38 = vpop.f32.mrb[0].mxu1 }
 0x222   : > { %v1692_v55 = vpop.f32.mrb[1].mxu1 }
 0x223   : > { %v5742_v60 = vpop.f32.mrb[2].mxu1 }
 0x224   : > { %v1695_v2 = vpop.f32.mrb[3].mxu1 }
 0x229   : > { %v7315_v3 = vpop.f32.mrb[4].mxu1 }
 0x22a   : > { %v7317_v4 = vpop.f32.mrb[5].mxu1 }
 0x22b   : > { %v7319_v20 = vpop.f32.mrb[6].mxu1 }
 0x22c   : > { %v7321_v56 = vpop.f32.mrb[7].mxu1 }
 0x231   : > { %v7323_v13 = vpop.f32.mrb[8].mxu1 }
 0x232   : > { %v7325_v52 = vpop.f32.mrb[9].mxu1 }
 0x233   : > { %v7327_v5 = vpop.f32.mrb[10].mxu1 }
 0x234   : > { %v7329_v6 = vpop.f32.mrb[11].mxu1 }
 0x239   : > { %v7331_v35 = vpop.f32.mrb[12].mxu1 }
 0x23a   : > { %v7333_v41 = vpop.f32.mrb[13].mxu1 }
 0x23b   : > { %v7335_v28 = vpop.f32.mrb[14].mxu1 }
 0x23c   : > { %v7337_v32 = vpop.f32.mrb[15].mxu1 }
 0x241   : > { %v7339_v42 = vpop.f32.mrb[16].mxu1 }
 0x242   : > { %v7341_v58 = vpop.f32.mrb[17].mxu1 }
 0x243   : > { %v7343_v46 = vpop.f32.mrb[18].mxu1 }
 0x244   : > { %v7345_v49 = vpop.f32.mrb[19].mxu1 }
 0x249   : > { %v7347_v61 = vpop.f32.mrb[20].mxu1 }
 0x24a   : > { %v7349_v0 = vpop.f32.mrb[21].mxu1 }
 0x24b   : > { %v7351_v7 = vpop.f32.mrb[22].mxu1 }
 0x24c   : > { %v7353_v12 = vpop.f32.mrb[23].mxu1 }
 0x251   : > { %v7355_v15 = vpop.f32.mrb[24].mxu1 }
 0x252   : > { %v7357_v16 = vpop.f32.mrb[25].mxu1 }
 0x253   : > { %v7359_v17 = vpop.f32.mrb[26].mxu1 }
 0x254   : > { %v7361_v21 = vpop.f32.mrb[27].mxu1 }
 0x259   : > { %v7363_v18 = vpop.f32.mrb[28].mxu1 }
 0x25a   : > { %v7365_v14 = vpop.f32.mrb[29].mxu1 }
 0x25b   : > { %v7367_v30 = vpop.f32.mrb[30].mxu1 }
 0x25c   : > { %v7369_v23 = vpop.f32.mrb[31].mxu1 }
 0x261   : > { %v6029_v24 = vpop.f32.mrb[32].mxu1 }
 0x262   : > { %v5981_v25 = vpop.f32.mrb[0].mxu0  ;;  %v4180_v8 = vpop.f32.mrb[33].mxu1  ;;  %v4507_v22 = vmul.f32 %v6029_v24, %v6029_v24 }
 0x263   : > { %v6059_v26 = vadd.f32 %v5981_v25, %v5741_v38  ;;  %v3543_v27 = vpop.f32.mrb[1].mxu0  ;;  %v6030_v29 = vpop.f32.mrb[34].mxu1  ;;  %v4505_v31 = vmul.f32 %v4180_v8, %v4180_v8 }
 0x264   : > { %v6060_v11 = vadd.f32 %v3543_v27, %v1692_v55  ;;  %v5982_v34 = vpop.f32.mrb[2].mxu0  ;;  %v5222_v37 = vpack.c.bf16 %v6030_v29, %v6029_v24  ;;  %v4183_v39 = vpop.f32.mrb[35].mxu1  ;;  %v4508_v59 = vmul.f32 %v6030_v29, %v6030_v29 }
 0x265   : > { %v6061_v63 = vadd.f32 %v5982_v34, %v5742_v60  ;;  %v3546_v40 = vpop.f32.mrb[3].mxu0  ;;  %v5217_v43 = vpack.c.bf16 %v4183_v39, %v4180_v8  ;;  %v4467_v57 = vadd.f32 %v4183_v39, %v4180_v8  ;;  %v4506_v48 = vmul.f32 %v4183_v39, %v4183_v39 }
 0x266   : > { %5324 = vst [vmem:[%s7372_s27 + $0x8] sm:$0xff] %v5222_v37   ;;  %v6062_v36 = vadd.f32 %v3546_v40, %v1695_v2  ;;  %v3964_v44 = vmul.f32 %v6060_v11, %v6060_v11  ;;  %v3966_v1 = vmul.f32 %v6059_v26, %v6059_v26 }
 0x267   : > { %v5142_v45 = vpack.c.bf16 %v6061_v63, %v6059_v26  ;;  %5218 = vst [vmem:[%s7372_s27] sm:$0xff] %v5217_v43   ;;  %v4468_v9 = vadd.f32 %v6029_v24, %v4467_v57  ;;  %v4537_v50 = vadd.f32 %v4506_v48, %v4505_v31  ;;  %v3967_v60 = vmul.f32 %v6061_v63, %v6061_v63 }
 0x268   : > { %v5137_v47 = vpack.c.bf16 %v6062_v36, %v6060_v11  ;;  %v3926_v53 = vadd.f32 %v6062_v36, %v6060_v11  ;;  %v3965_v19 = vmul.f32 %v6062_v36, %v6062_v36 }
 0x269   : > { %5309 = vst [vmem:[%s7377_s29 + $0x8] sm:$0xff] %v5142_v45   ;;  %v6033_v54 = vpop.f32.mrb[36].mxu1  ;;  %v4469_v62 = vadd.f32 %v6030_v29, %v4468_v9  ;;  %v4538_v51 = vadd.f32 %v4537_v50, %v4507_v22 }
 0x26a   : > { %5138 = vst [vmem:[%s7377_s29] sm:$0xff] %v5137_v47   ;;  %v3927_v33 = vadd.f32 %v6059_v26, %v3926_v53  ;;  %v3996_v10 = vadd.f32 %v3965_v19, %v3964_v44  ;;  %v5985_v38 = vpop.f32.mrb[4].mxu0  ;;  %v4196_v55 = vpop.f32.mrb[37].mxu1  ;;  %v4511_v47 = vmul.f32 %v6033_v54, %v6033_v54 }
 0x26b   : > { %v6063_v2 = vadd.f32 %v5985_v38, %v7315_v3  ;;  %v3559_v24 = vpop.f32.mrb[5].mxu0  ;;  %v4470_v25 = vadd.f32 %v4469_v62, %v4196_v55  ;;  %v4509_v8 = vmul.f32 %v4196_v55, %v4196_v55  ;;  %v6034_v27 = vpop.f32.mrb[38].mxu1  ;;  %v4539_v29 = vadd.f32 %v4538_v51, %v4508_v59 }
 0x26c   : > { %v3997_v11 = vadd.f32 %v3996_v10, %v3966_v1  ;;  %v6064_v31 = vadd.f32 %v3559_v24, %v7317_v4  ;;  %v3928_v34 = vadd.f32 %v6061_v63, %v3927_v33  ;;  %v5986_v37 = vpop.f32.mrb[6].mxu0  ;;  %v4199_v39 = vpop.f32.mrb[39].mxu1  ;;  %v5232_v40 = vpack.c.bf16 %v6034_v27, %v6033_v54 }
 0x26d   : > { %v6065_v26 = vadd.f32 %v5986_v37, %v7319_v20  ;;  %v3562_v43 = vpop.f32.mrb[7].mxu0  ;;  %v4540_v48 = vadd.f32 %v4539_v29, %v4509_v8  ;;  %v5227_v45 = vpack.c.bf16 %v4199_v39, %v4196_v55  ;;  %v4471_v63 = vadd.f32 %v4470_v25, %v4199_v39 }
 0x26e   : > { %v3929_v57 = vadd.f32 %v6064_v31, %v3928_v34  ;;  %v3968_v3 = vmul.f32 %v6064_v31, %v6064_v31  ;;  %v3998_v36 = vadd.f32 %v3997_v11, %v3967_v60  ;;  %5326 = vst [vmem:[%s7372_s27 + $0x18] sm:$0xff] %v5232_v40   ;;  %v6066_v44 = vadd.f32 %v3562_v43, %v7321_v56 }
 0x26f   : > { %v5152_v22 = vpack.c.bf16 %v6065_v26, %v6063_v2  ;;  %v4510_v9 = vmul.f32 %v4199_v39, %v4199_v39  ;;  %5325 = vst [vmem:[%s7372_s27 + $0x10] sm:$0xff] %v5227_v45   ;;  %v3970_v59 = vmul.f32 %v6063_v2, %v6063_v2  ;;  %v4512_v62 = vmul.f32 %v6034_v27, %v6034_v27 }
 0x270   : > { %v3999_v4 = vadd.f32 %v3998_v36, %v3968_v3  ;;  %v5147_v53 = vpack.c.bf16 %v6066_v44, %v6064_v31  ;;  %v3930_v20 = vadd.f32 %v6066_v44, %v3929_v57  ;;  %v3969_v19 = vmul.f32 %v6066_v44, %v6066_v44 }
 0x271   : > { %5311 = vst [vmem:[%s7377_s29 + $0x18] sm:$0xff] %v5152_v22   ;;  %v6037_v50 = vpop.f32.mrb[40].mxu1  ;;  %v4472_v1 = vadd.f32 %v6033_v54, %v4471_v63  ;;  %v4541_v33 = vadd.f32 %v4540_v48, %v4510_v9  ;;  %v3971_v54 = vmul.f32 %v6065_v26, %v6065_v26 }
 0x272   : > { %v5989_v10 = vpop.f32.mrb[8].mxu0  ;;  %v4212_v51 = vpop.f32.mrb[41].mxu1  ;;  %5310 = vst [vmem:[%s7377_s29 + $0x10] sm:$0xff] %v5147_v53   ;;  %v3931_v56 = vadd.f32 %v6063_v2, %v3930_v20  ;;  %v4000_v38 = vadd.f32 %v3999_v4, %v3969_v19  ;;  %v4515_v63 = vmul.f32 %v6037_v50, %v6037_v50 }
 0x273   : > { %v6067_v55 = vadd.f32 %v5989_v10, %v7323_v13  ;;  %v3575_v60 = vpop.f32.mrb[9].mxu0  ;;  %v4513_v24 = vmul.f32 %v4212_v51, %v4212_v51  ;;  %v6038_v25 = vpop.f32.mrb[42].mxu1  ;;  %v4542_v8 = vadd.f32 %v4541_v33, %v4511_v47  ;;  %v4473_v31 = vadd.f32 %v6034_v27, %v4472_v1 }
 0x274   : > { %v6068_v11 = vadd.f32 %v3575_v60, %v7325_v52  ;;  %v5990_v34 = vpop.f32.mrb[10].mxu0  ;;  %v5242_v29 = vpack.c.bf16 %v6038_v25, %v6037_v50  ;;  %v4215_v37 = vpop.f32.mrb[43].mxu1  ;;  %v4001_v39 = vadd.f32 %v4000_v38, %v3970_v59  ;;  %v3932_v40 = vadd.f32 %v6065_v26, %v3931_v56 }
 0x275   : > { %v6069_v43 = vadd.f32 %v5990_v34, %v7327_v5  ;;  %v3578_v2 = vpop.f32.mrb[11].mxu0  ;;  %v4474_v13 = vadd.f32 %v4473_v31, %v4212_v51  ;;  %v4543_v3 = vadd.f32 %v4542_v8, %v4512_v62  ;;  %v5237_v44 = vpack.c.bf16 %v4215_v37, %v4212_v51 }
 0x276   : > { %v3972_v57 = vmul.f32 %v6068_v11, %v6068_v11  ;;  %5328 = vst [vmem:[%s7372_s27 + $0x28] sm:$0xff] %v5242_v29   ;;  %v3933_v36 = vadd.f32 %v6068_v11, %v3932_v40  ;;  %v4002_v48 = vadd.f32 %v4001_v39, %v3971_v54  ;;  %v6070_v27 = vadd.f32 %v3578_v2, %v7329_v6 }
 0x277   : > { %v5162_v22 = vpack.c.bf16 %v6069_v43, %v6067_v55  ;;  %v4544_v52 = vadd.f32 %v4543_v3, %v4513_v24  ;;  %v4475_v45 = vadd.f32 %v4474_v13, %v4215_v37  ;;  %v3974_v4 = vmul.f32 %v6067_v55, %v6067_v55  ;;  %5327 = vst [vmem:[%s7372_s27 + $0x20] sm:$0xff] %v5237_v44  }
 0x278   : > { %v4003_v26 = vadd.f32 %v4002_v48, %v3972_v57  ;;  %v4514_v5 = vmul.f32 %v4215_v37, %v4215_v37  ;;  %v5157_v47 = vpack.c.bf16 %v6070_v27, %v6068_v11  ;;  %v3934_v53 = vadd.f32 %v6070_v27, %v3933_v36 }
 0x279   : > { %5313 = vst [vmem:[%s7377_s29 + $0x28] sm:$0xff] %v5162_v22   ;;  %v6041_v9 = vpop.f32.mrb[44].mxu1  ;;  %v3973_v20 = vmul.f32 %v6070_v27, %v6070_v27  ;;  %v4476_v19 = vadd.f32 %v6037_v50, %v4475_v45  ;;  %v3975_v1 = vmul.f32 %v6069_v43, %v6069_v43  ;;  %v4516_v33 = vmul.f32 %v6038_v25, %v6038_v25 }
 0x27a   : > { %v5993_v59 = vpop.f32.mrb[12].mxu0  ;;  %v4228_v62 = vpop.f32.mrb[45].mxu1  ;;  %v4545_v10 = vadd.f32 %v4544_v52, %v4514_v5  ;;  %5312 = vst [vmem:[%s7377_s29 + $0x20] sm:$0xff] %v5157_v47   ;;  %v3935_v38 = vadd.f32 %v6067_v55, %v3934_v53  ;;  %v4519_v57 = vmul.f32 %v6041_v9, %v6041_v9 }
 0x27b   : > { %v6071_v6 = vadd.f32 %v5993_v59, %v7331_v35  ;;  %v3591_v51 = vpop.f32.mrb[13].mxu0  ;;  %v6042_v56 = vpop.f32.mrb[46].mxu1  ;;  %v4004_v60 = vadd.f32 %v4003_v26, %v3973_v20  ;;  %v4477_v8 = vadd.f32 %v6038_v25, %v4476_v19  ;;  %v4517_v50 = vmul.f32 %v4228_v62, %v4228_v62 }
 0x27c   : > { %v6072_v24 = vadd.f32 %v3591_v51, %v7333_v41  ;;  %v5994_v11 = vpop.f32.mrb[14].mxu0  ;;  %v4231_v31 = vpop.f32.mrb[47].mxu1  ;;  %v4546_v34 = vadd.f32 %v4545_v10, %v4515_v63  ;;  %v5252_v37 = vpack.c.bf16 %v6042_v56, %v6041_v9  ;;  %v3936_v35 = vadd.f32 %v6069_v43, %v3935_v38 }
 0x27d   : > { %v6073_v29 = vadd.f32 %v5994_v11, %v7335_v28  ;;  %v3594_v54 = vpop.f32.mrb[15].mxu0  ;;  %v4005_v39 = vadd.f32 %v4004_v60, %v3974_v4  ;;  %v4478_v2 = vadd.f32 %v4477_v8, %v4228_v62  ;;  %v5247_v36 = vpack.c.bf16 %v4231_v31, %v4228_v62 }
 0x27e   : > { %v3976_v40 = vmul.f32 %v6072_v24, %v6072_v24  ;;  %v4547_v55 = vadd.f32 %v4546_v34, %v4516_v33  ;;  %5330 = vst [vmem:[%s7372_s27 + $0x38] sm:$0xff] %v5252_v37   ;;  %v3937_v41 = vadd.f32 %v6072_v24, %v3936_v35  ;;  %v6074_v3 = vadd.f32 %v3594_v54, %v7337_v32 }
 0x27f   : > { %v5172_v13 = vpack.c.bf16 %v6073_v29, %v6071_v6  ;;  %v4006_v25 = vadd.f32 %v4005_v39, %v3975_v1  ;;  %v3978_v48 = vmul.f32 %v6071_v6, %v6071_v6  ;;  %v4479_v28 = vadd.f32 %v4478_v2, %v4231_v31  ;;  %5329 = vst [vmem:[%s7372_s27 + $0x30] sm:$0xff] %v5247_v36  }
 0x280   : > { %v4548_v22 = vadd.f32 %v4547_v55, %v4517_v50  ;;  %v4518_v52 = vmul.f32 %v4231_v31, %v4231_v31  ;;  %v5167_v44 = vpack.c.bf16 %v6074_v3, %v6072_v24  ;;  %v3938_v45 = vadd.f32 %v6074_v3, %v3937_v41 }
 0x281   : > { %5315 = vst [vmem:[%s7377_s29 + $0x38] sm:$0xff] %v5172_v13   ;;  %v6045_v27 = vpop.f32.mrb[48].mxu1  ;;  %v4007_v43 = vadd.f32 %v4006_v25, %v3976_v40  ;;  %v3977_v4 = vmul.f32 %v6074_v3, %v6074_v3  ;;  %v3979_v5 = vmul.f32 %v6073_v29, %v6073_v29  ;;  %v4480_v47 = vadd.f32 %v6041_v9, %v4479_v28 }
 0x282   : > { %v5997_v63 = vpop.f32.mrb[16].mxu0  ;;  %v4244_v26 = vpop.f32.mrb[49].mxu1  ;;  %v4549_v53 = vadd.f32 %v4548_v22, %v4518_v52  ;;  %v4520_v59 = vmul.f32 %v6042_v56, %v6042_v56  ;;  %5314 = vst [vmem:[%s7377_s29 + $0x30] sm:$0xff] %v5167_v44   ;;  %v3939_v62 = vadd.f32 %v6071_v6, %v3938_v45  ;;  %v4523_v50 = vmul.f32 %v6045_v27, %v6045_v27 }
 0x283   : > { %v6075_v32 = vadd.f32 %v5997_v63, %v7339_v42  ;;  %v3607_v20 = vpop.f32.mrb[17].mxu0  ;;  %v6046_v19 = vpop.f32.mrb[50].mxu1  ;;  %v4008_v1 = vadd.f32 %v4007_v43, %v3977_v4  ;;  %v4481_v60 = vadd.f32 %v6042_v56, %v4480_v47  ;;  %v4521_v24 = vmul.f32 %v4244_v26, %v4244_v26 }
 0x284   : > { %v6076_v33 = vadd.f32 %v3607_v20, %v7341_v58  ;;  %v5998_v10 = vpop.f32.mrb[18].mxu0  ;;  %v4247_v51 = vpop.f32.mrb[51].mxu1  ;;  %v4550_v38 = vadd.f32 %v4549_v53, %v4519_v57  ;;  %v3940_v42 = vadd.f32 %v6073_v29, %v3939_v62  ;;  %v5262_v34 = vpack.c.bf16 %v6046_v19, %v6045_v27 }
 0x285   : > { %v6077_v8 = vadd.f32 %v5998_v10, %v7343_v46  ;;  %v3610_v9 = vpop.f32.mrb[19].mxu0  ;;  %v4009_v11 = vadd.f32 %v4008_v1, %v3978_v48  ;;  %v4482_v37 = vadd.f32 %v4481_v60, %v4244_v26  ;;  %v3982_v39 = vmul.f32 %v6075_v32, %v6075_v32 }
 0x286   : > { %v3980_v31 = vmul.f32 %v6076_v33, %v6076_v33  ;;  %v4551_v6 = vadd.f32 %v4550_v38, %v4520_v59  ;;  %v3941_v58 = vadd.f32 %v6076_v33, %v3940_v42  ;;  %5332 = vst [vmem:[%s7372_s27 + $0x48] sm:$0xff] %v5262_v34   ;;  %v6078_v56 = vadd.f32 %v3610_v9, %v7345_v49 }
 0x287   : > { %v5182_v54 = vpack.c.bf16 %v6077_v8, %v6075_v32  ;;  %v4010_v35 = vadd.f32 %v4009_v11, %v3979_v5  ;;  %v5257_v46 = vpack.c.bf16 %v4247_v51, %v4244_v26  ;;  %v4483_v2 = vadd.f32 %v4482_v37, %v4247_v51 }
 0x288   : > { %v4552_v40 = vadd.f32 %v4551_v6, %v4521_v24  ;;  %v4522_v57 = vmul.f32 %v4247_v51, %v4247_v51  ;;  %v5177_v13 = vpack.c.bf16 %v6078_v56, %v6076_v33  ;;  %v3942_v41 = vadd.f32 %v6078_v56, %v3941_v58 }
 0x289   : > { %5317 = vst [vmem:[%s7377_s29 + $0x48] sm:$0xff] %v5182_v54   ;;  %v6049_v29 = vpop.f32.mrb[52].mxu1  ;;  %v4011_v55 = vadd.f32 %v4010_v35, %v3980_v31  ;;  %v3981_v25 = vmul.f32 %v6078_v56, %v6078_v56  ;;  %v3983_v48 = vmul.f32 %v6077_v8, %v6077_v8  ;;  %5331 = vst [vmem:[%s7372_s27 + $0x40] sm:$0xff] %v5257_v46  }
 0x28a   : > { %v6001_v3 = vpop.f32.mrb[20].mxu0  ;;  %v4260_v36 = vpop.f32.mrb[53].mxu1  ;;  %v4484_v22 = vadd.f32 %v6045_v27, %v4483_v2  ;;  %v4553_v28 = vadd.f32 %v4552_v40, %v4522_v57  ;;  %v4524_v44 = vmul.f32 %v6046_v19, %v6046_v19  ;;  %5316 = vst [vmem:[%s7377_s29 + $0x40] sm:$0xff] %v5177_v13   ;;  %v3943_v45 = vadd.f32 %v6075_v32, %v3942_v41 }
 0x28b   : > { %v6079_v52 = vadd.f32 %v6001_v3, %v7347_v61  ;;  %v3623_v49 = vpop.f32.mrb[21].mxu0  ;;  %v6050_v43 = vpop.f32.mrb[54].mxu1  ;;  %v4012_v4 = vadd.f32 %v4011_v55, %v3981_v25  ;;  %v4525_v20 = vmul.f32 %v4260_v36, %v4260_v36  ;;  %v4527_v10 = vmul.f32 %v6049_v29, %v6049_v29 }
 0x28c   : > { %v6080_v63 = vadd.f32 %v3623_v49, %v7349_v0  ;;  %v6002_v26 = vpop.f32.mrb[22].mxu0  ;;  %v4263_v5 = vpop.f32.mrb[55].mxu1  ;;  %v4554_v47 = vadd.f32 %v4553_v28, %v4523_v50  ;;  %v4485_v53 = vadd.f32 %v6046_v19, %v4484_v22  ;;  %v3944_v61 = vadd.f32 %v6077_v8, %v3943_v45 }
 0x28d   : > { %v6081_v59 = vadd.f32 %v6002_v26, %v7351_v7  ;;  %v3626_v27 = vpop.f32.mrb[23].mxu0  ;;  %v4013_v62 = vadd.f32 %v4012_v4, %v3982_v39  ;;  %v5272_v33 = vpack.c.bf16 %v6050_v43, %v6049_v29  ;;  %v3986_v60 = vmul.f32 %v6079_v52, %v6079_v52 }
 0x28e   : > { %v3984_v1 = vmul.f32 %v6080_v63, %v6080_v63  ;;  %v4486_v51 = vadd.f32 %v4485_v53, %v4260_v36  ;;  %v4555_v32 = vadd.f32 %v4554_v47, %v4524_v44  ;;  %v3945_v0 = vadd.f32 %v6080_v63, %v3944_v61 }
 0x28f   : > { %v5192_v38 = vpack.c.bf16 %v6081_v59, %v6079_v52  ;;  %v4014_v24 = vadd.f32 %v4013_v62, %v3983_v48  ;;  %5334 = vst [vmem:[%s7372_s27 + $0x58] sm:$0xff] %v5272_v33   ;;  %v6082_v19 = vadd.f32 %v3626_v27, %v7353_v12  ;;  %v5267_v7 = vpack.c.bf16 %v4263_v5, %v4260_v36 }
 0x290   : > { %v4556_v9 = vadd.f32 %v4555_v32, %v4525_v20  ;;  %v4487_v11 = vadd.f32 %v4486_v51, %v4263_v5  ;;  %v4526_v42 = vmul.f32 %v4263_v5, %v4263_v5  ;;  %v3987_v39 = vmul.f32 %v6081_v59, %v6081_v59 }
 0x291   : > { %5319 = vst [vmem:[%s7377_s29 + $0x58] sm:$0xff] %v5192_v38   ;;  %v6053_v8 = vpop.f32.mrb[56].mxu1  ;;  %v4015_v31 = vadd.f32 %v4014_v24, %v3984_v1  ;;  %v5187_v34 = vpack.c.bf16 %v6082_v19, %v6080_v63  ;;  %v3946_v50 = vadd.f32 %v6082_v19, %v3945_v0  ;;  %v3985_v37 = vmul.f32 %v6082_v19, %v6082_v19 }
 0x292   : > { %v6005_v6 = vpop.f32.mrb[24].mxu0  ;;  %v4276_v54 = vpop.f32.mrb[57].mxu1  ;;  %5333 = vst [vmem:[%s7372_s27 + $0x50] sm:$0xff] %v5267_v7   ;;  %v4488_v58 = vadd.f32 %v6049_v29, %v4487_v11  ;;  %v4557_v35 = vadd.f32 %v4556_v9, %v4526_v42  ;;  %v4528_v46 = vmul.f32 %v6050_v43, %v6050_v43  ;;  %v4531_v44 = vmul.f32 %v6053_v8, %v6053_v8 }
 0x293   : > { %v6083_v56 = vadd.f32 %v6005_v6, %v7355_v15  ;;  %v3639_v12 = vpop.f32.mrb[25].mxu0  ;;  %v6054_v40 = vpop.f32.mrb[58].mxu1  ;;  %5318 = vst [vmem:[%s7377_s29 + $0x50] sm:$0xff] %v5187_v34   ;;  %v3947_v2 = vadd.f32 %v6079_v52, %v3946_v50  ;;  %v4016_v57 = vadd.f32 %v4015_v31, %v3985_v37  ;;  %v4529_v36 = vmul.f32 %v4276_v54, %v4276_v54 }
 0x294   : > { %v6084_v55 = vadd.f32 %v3639_v12, %v7357_v16  ;;  %v6006_v13 = vpop.f32.mrb[26].mxu0  ;;  %v4279_v41 = vpop.f32.mrb[59].mxu1  ;;  %v4558_v25 = vadd.f32 %v4557_v35, %v4527_v10  ;;  %v4489_v3 = vadd.f32 %v6050_v43, %v4488_v58  ;;  %v5282_v49 = vpack.c.bf16 %v6054_v40, %v6053_v8 }
 0x295   : > { %v6085_v48 = vadd.f32 %v6006_v13, %v7359_v17  ;;  %v3642_v29 = vpop.f32.mrb[27].mxu0  ;;  %v4017_v22 = vadd.f32 %v4016_v57, %v3986_v60  ;;  %v3948_v15 = vadd.f32 %v6081_v59, %v3947_v2  ;;  %v3990_v63 = vmul.f32 %v6083_v56, %v6083_v56 }
 0x296   : > { %v3988_v28 = vmul.f32 %v6084_v55, %v6084_v55  ;;  %v4490_v45 = vadd.f32 %v4489_v3, %v4276_v54  ;;  %v4559_v52 = vadd.f32 %v4558_v25, %v4528_v46  ;;  %5336 = vst [vmem:[%s7372_s27 + $0x68] sm:$0xff] %v5282_v49   ;;  %v6086_v43 = vadd.f32 %v3642_v29, %v7361_v21 }
 0x297   : > { %v5202_v4 = vpack.c.bf16 %v6085_v48, %v6083_v56  ;;  %v3949_v16 = vadd.f32 %v6084_v55, %v3948_v15  ;;  %v4018_v26 = vadd.f32 %v4017_v22, %v3987_v39  ;;  %v5277_v17 = vpack.c.bf16 %v4279_v41, %v4276_v54 }
 0x298   : > { %v4560_v5 = vadd.f32 %v4559_v52, %v4529_v36  ;;  %v4491_v47 = vadd.f32 %v4490_v45, %v4279_v41  ;;  %v4530_v53 = vmul.f32 %v4279_v41, %v4279_v41  ;;  %v5197_v27 = vpack.c.bf16 %v6086_v43, %v6084_v55 }
 0x299   : > { %5321 = vst [vmem:[%s7377_s29 + $0x68] sm:$0xff] %v5202_v4   ;;  %v6057_v20 = vpop.f32.mrb[60].mxu1  ;;  %v4019_v59 = vadd.f32 %v4018_v26, %v3988_v28  ;;  %v3950_v62 = vadd.f32 %v6086_v43, %v3949_v16  ;;  %v3989_v61 = vmul.f32 %v6086_v43, %v6086_v43  ;;  %v3991_v10 = vmul.f32 %v6085_v48, %v6085_v48 }
 0x29a   : > { %v6009_v1 = vpop.f32.mrb[28].mxu0  ;;  %v4292_v33 = vpop.f32.mrb[61].mxu1  ;;  %5335 = vst [vmem:[%s7372_s27 + $0x60] sm:$0xff] %v5277_v17   ;;  %v4492_v51 = vadd.f32 %v6053_v8, %v4491_v47  ;;  %v4561_v32 = vadd.f32 %v4560_v5, %v4530_v53  ;;  %v4532_v0 = vmul.f32 %v6054_v40, %v6054_v40  ;;  %5320 = vst [vmem:[%s7377_s29 + $0x60] sm:$0xff] %v5197_v27  }
 0x29b   : > { %v6087_v21 = vadd.f32 %v6009_v1, %v7363_v18  ;;  %v3655_v38 = vpop.f32.mrb[29].mxu0  ;;  %v7429_v60 = vpop.f32.mrb[62].mxu1  ;;  %v3951_v24 = vadd.f32 %v6083_v56, %v3950_v62  ;;  %v4020_v19 = vadd.f32 %v4019_v59, %v3989_v61  ;;  %v4533_v31 = vmul.f32 %v4292_v33, %v4292_v33 }
 0x29c   : > { %v6088_v9 = vadd.f32 %v3655_v38, %v7365_v14  ;;  %v6010_v7 = vpop.f32.mrb[30].mxu0  ;;  %v4295_v11 = vpop.f32.mrb[63].mxu1  ;;  %v4562_v42 = vadd.f32 %v4561_v32, %v4531_v44  ;;  %v4493_v8 = vadd.f32 %v6054_v40, %v4492_v51  ;;  %v5292_v54 = vpack.c.bf16 %v7429_v60, %v6057_v20 }
 0x29d   : > { %v7435_v18 = vadd.f32 %v6010_v7, %v7367_v30  ;;  %v3658_v34 = vpop.f32.mrb[31].mxu0  ;;  %v4021_v50 = vadd.f32 %v4020_v19, %v3990_v63  ;;  %v3952_v37 = vadd.f32 %v6085_v48, %v3951_v24  ;;  %v5287_v40 = vpack.c.bf16 %v4295_v11, %v4292_v33 }
 0x29e   : > { %v3992_v6 = vmul.f32 %v6088_v9, %v6088_v9  ;;  %v4494_v14 = vadd.f32 %v4493_v8, %v4292_v33  ;;  %v4563_v39 = vadd.f32 %v4562_v42, %v4532_v0  ;;  %5338 = vst [vmem:[%s7372_s27 + $0x78] sm:$0xff] %v5292_v54   ;;  %v6090_v30 = vadd.f32 %v3658_v34, %v7369_v23 }
 0x29f   : > { %v5212_v58 = vpack.c.bf16 %v7435_v18, %v6087_v21  ;;  %v3953_v35 = vadd.f32 %v6088_v9, %v3952_v37  ;;  %v4022_v56 = vadd.f32 %v4021_v50, %v3991_v10  ;;  %v4534_v2 = vmul.f32 %v4295_v11, %v4295_v11  ;;  %5337 = vst [vmem:[%s7372_s27 + $0x70] sm:$0xff] %v5287_v40   ;;  %s6591_s27 = scalar_lea.vmem %s6590_s11, 4096 }
 0x2a0   : > { %v4564_v12 = vadd.f32 %v4563_v39, %v4533_v31  ;;  %v4495_v46 = vadd.f32 %v4494_v14, %v4295_v11  ;;  %v5207_v55 = vpack.c.bf16 %v6090_v30, %v6088_v9  ;;  %v3993_v13 = vmul.f32 %v6090_v30, %v6090_v30  ;;  %p6593_p9 = scmp.lt.s32.totalorder %s6591_s27, %s6585_s18 }
 0x2a1   : > { %5323 = vst [vmem:[%s7377_s29 + $0x78] sm:$0xff] %v5212_v58   ;;  %v4023_v57 = vadd.f32 %v4022_v56, %v3992_v6  ;;  %v3954_v23 = vadd.f32 %v6090_v30, %v3953_v35  ;;  %v4535_v41 = vmul.f32 %v6057_v20, %v6057_v20  ;;  %v7460_v36 = vmul.f32 %v6087_v21, %v6087_v21 }
 0x2a2   : > { %v4496_v25 = vadd.f32 %v6057_v20, %v4495_v46  ;;  %v4565_v3 = vadd.f32 %v4564_v12, %v4534_v2  ;;  %5322 = vst [vmem:[%s7377_s29 + $0x70] sm:$0xff] %v5207_v55   ;;  %p6594_p12 = por %p6593_p9, %p6592_p7 }
 0x2a3   : > { %v3955_v48 = vadd.f32 %v6087_v21, %v3954_v23  ;;  %v4024_v29 = vadd.f32 %v4023_v57, %v3993_v13 }
 0x2a4   : > { %p6595_p1 = pnand %p6594_p12, %p6588_p3 }
 0x2a6   : > { %6598 = shalt.err (!%p6595_p1)
}
 0x2a7   : > { %s6599_s29 = scalar_lea.hbm %s7447_s15, 2048  ;;  %s6603_s10 = scalar_lea.hbm %s7610_s4, 4096 }
 0x2a8   : > { %p6600_p13 = scmp.ne.s32.totalorder %s7447_s15, %s6599_s29  ;;  %p6604_p4 = scmp.lt.u32.totalorder %s7447_s15, %s7610_s4 }
 0x2a9   : > { %p6605_p5 = scmp.lt.u32.totalorder %s6603_s10, %s6599_s29  ;;  %p6607_p11 = scmp.lt.u32.totalorder %s6599_s29, %s7447_s15 }
 0x2aa   : > { %p6601_p6 = pnand %p6600_p13, %p7627_p0 }
 0x2ab   : > { %p6606_p8 = por %p6605_p5, %p6604_p4 }
 0x2ac   : > { %p6602_p10 = pneg %p6601_p6 }
 0x2ad   : > { %p6608_p2 = por %p6607_p11, %p6606_p8 }
 0x2af   : > { %p6609_p3 = pnand %p6608_p2, %p6602_p10 }
 0x2b1   : > { %6612 = shalt.err (!%p6609_p3)
}
 0x2b2   : > { %s6756_s18 = smov 64   ;;  %s6757_s11 = smov 4   ;;  %v4536_v22 = vmul.f32 %v7429_v60, %v7429_v60  ;;  %v4497_v15 = vadd.f32 %v7429_v60, %v4496_v25  ;;  %v4566_v28 = vadd.f32 %v4565_v3, %v4535_v41 }
 0x2b3   : > { %6326 = dma.vmem_to_hbm [thread:$0]  (%p7627_p0), %s7450_s7, 2048, %s7447_s15, %s7465_s9, %s6756_s18, %s6756_s18, %s6757_s11  }
 0x2b4   : > { %s4576_s27 = scalar_lea.sflag [#allocation6], %s6979_s26  ;;  %s6613_s29 = scalar_lea.vmem %s7457_s30, 2048 }
 0x2b5   : > { %p6614_p7 = scmp.ne.s32.totalorder %s7457_s30, %s6613_s29  ;;  %s6758_s19 = smov [#allocation10]  }
 0x2b6   : > { %s6617_s14 = sshll.u32 %s6758_s19, 4  ;;  %s6618_s14 = int_to_ptr.vmem [resolvable:$false] %s6617_s14 }
 0x2b7   : > { %p6615_p9 = pnand %p6614_p7, %p7627_p0  ;;  %s6619_s10 = scalar_lea.vmem %s6618_s14, 4096 }
 0x2b8   : > { %p6620_p1 = scmp.lt.s32.totalorder %s7457_s30, %s6618_s14  ;;  %p6621_p13 = scmp.lt.s32.totalorder %s6619_s10, %s6613_s29 }
 0x2b9   : > { %p6616_p12 = pneg %p6615_p9 }
 0x2ba   : > { %p6622_p6 = por %p6621_p13, %p6620_p1 }
 0x2bc   : > { %p6623_p10 = pnand %p6622_p6, %p6616_p12 }
 0x2be   : > { %6626 = shalt.err (!%p6623_p10)
}
 0x2bf   : > { %s6627_s7 = scalar_lea.hbm %s7455_s16, 2048  ;;  %s6631_s20 = scalar_lea.hbm %s7609_s3, 4096 }
 0x2c0   : > { %p6628_p4 = scmp.ne.s32.totalorder %s7455_s16, %s6627_s7  ;;  %p6632_p11 = scmp.lt.u32.totalorder %s7455_s16, %s7609_s3 }
 0x2c1   : > { %p6633_p2 = scmp.lt.u32.totalorder %s6631_s20, %s6627_s7  ;;  %p6635_p7 = scmp.lt.u32.totalorder %s6627_s7, %s7455_s16 }
 0x2c2   : > { %p6629_p5 = pnand %p6628_p4, %p7627_p0 }
 0x2c3   : > { %p6634_p3 = por %p6633_p2, %p6632_p11 }
 0x2c4   : > { %p6630_p8 = pneg %p6629_p5 }
 0x2c5   : > { %p6636_p9 = por %p6635_p7, %p6634_p3 }
 0x2c7   : > { %p6637_p12 = pnand %p6636_p9, %p6630_p8 }
 0x2c9   : > { %6640 = shalt.err (!%p6637_p12)
}
 0x2ca   : > { %6325 = dma.vmem_to_hbm [thread:$0]  (%p7627_p0), %s7457_s30, 2048, %s7455_s16, %s4576_s27, %s6756_s18, %s6756_s18, %s6757_s11   ;;  %v3995_v49 = vmul.f32 %v7435_v18, %v7435_v18  ;;  %v3956_v44 = vadd.f32 %v7435_v18, %v3955_v48  ;;  %v4025_v45 = vadd.f32 %v4024_v29, %v7460_v36  ;;  %v4498_v52 = vrot.slane %v4497_v15, 4 }
 0x2cb   : > { %v4567_v4 = vadd.f32 %v4566_v28, %v4536_v22  ;;  %s4845_s30 = sshll.u32 %s6979_s26, 1  ;;  %s4999_s16 = sshll.u32 %s6817_s25, 5 }
 0x2cc   : > { %v3957_v63 = vrot.slane %v3956_v44, 4  ;;  %v4026_v16 = vadd.f32 %v4025_v45, %v3995_v49  ;;  %v4499_v26 = vadd.f32 %v4498_v52, %v4497_v15  ;;  %s326_s18 = scalar_lea.vmem [#allocation14], %s4845_s30  ;;  %s319_s27 = scalar_lea.vmem [#allocation13], %s4845_s30 }
 0x2cd   : > { %v4568_v43 = vrot.slane %v4567_v4, 4  ;;  %s4649_s11 = sshll.u32 %s326_s18, 4  ;;  %s4636_s29 = sshll.u32 %s319_s27, 4  ;;  %s7533_s11 = int_to_ptr.vmem [resolvable:$true] %s4649_s11  ;;  %s7540_s29 = int_to_ptr.vmem [resolvable:$true] %s4636_s29 }
 0x2ce   : > { %v3958_v5 = vadd.f32 %v3957_v63, %v3956_v44  ;;  %v4027_v17 = vrot.slane %v4026_v16, 4  ;;  %v4500_v47 = vrot.slane %v4499_v26, 2  ;;  %s7531_s15 = scalar_lea.hbm %s7612_s6, %s4999_s16  ;;  %s7538_s20 = scalar_lea.hbm %s7611_s5, %s4999_s16 }
 0x2cf   : > { %v4569_v53 = vadd.f32 %v4568_v43, %v4567_v4  ;;  %s4591_s19 = scalar_lea.sflag [#allocation15], %s6979_s26  ;;  %s6641_s14 = scalar_lea.vmem %s7533_s11, 32 }
 0x2d0   : > { %v3959_v20 = vrot.slane %v3958_v5, 2  ;;  %v4028_v59 = vadd.f32 %v4027_v17, %v4026_v16  ;;  %v4501_v27 = vadd.f32 %v4500_v47, %v4499_v26  ;;  %p6642_p1 = scmp.ne.s32.totalorder %s7533_s11, %s6641_s14  ;;  %s6759_s30 = smov [#allocation14]  }
 0x2d1   : > { %v4570_v62 = vrot.slane %v4569_v53, 2  ;;  %s6645_s10 = sshll.u32 %s6759_s30, 4  ;;  %s6646_s10 = int_to_ptr.vmem [resolvable:$false] %s6645_s10 }
 0x2d2   : > { %v3960_v61 = vadd.f32 %v3959_v20, %v3958_v5  ;;  %v4029_v1 = vrot.slane %v4028_v59, 2  ;;  %v4502_v33 = vrot.slane %v4501_v27, 1  ;;  %p6643_p13 = pnand %p6642_p1, %p7627_p0  ;;  %s6647_s7 = scalar_lea.vmem %s6646_s10, 64 }
 0x2d3   : > { %v4571_v10 = vadd.f32 %v4570_v62, %v4569_v53  ;;  %p6648_p10 = scmp.lt.s32.totalorder %s7533_s11, %s6646_s10  ;;  %p6649_p4 = scmp.lt.s32.totalorder %s6647_s7, %s6641_s14 }
 0x2d4   : > { %v3961_v51 = vrot.slane %v3960_v61, 1  ;;  %v4030_v32 = vadd.f32 %v4029_v1, %v4028_v59  ;;  %v4503_v21 = vadd.f32 %v4502_v33, %v4501_v27  ;;  %p6644_p6 = pneg %p6643_p13 }
 0x2d5   : > { %v4572_v38 = vrot.slane %v4571_v10, 1  ;;  %p6650_p5 = por %p6649_p4, %p6648_p10 }
 0x2d6   : > { %v3962_v60 = vadd.f32 %v3961_v51, %v3960_v61  ;;  %v4031_v0 = vrot.slane %v4030_v32, 1  ;;  %4504 = vst [vmem:[%s326_s18] sm:$0x1] %v4503_v21 }
 0x2d7   : > { %v4573_v24 = vadd.f32 %v4572_v38, %v4571_v10  ;;  %p6651_p8 = pnand %p6650_p5, %p6644_p6 }
 0x2d8   : > { %3963 = vst [vmem:[%s319_s27] sm:$0x1] %v3962_v60  ;;  %v4032_v19 = vadd.f32 %v4031_v0, %v4030_v32 }
 0x2d9   : > { %4574 = vst [vmem:[%s326_s18 + $0x1] sm:$0x1] %v4573_v24 }
 0x2da   : > { %4033 = vst [vmem:[%s319_s27 + $0x1] sm:$0x1] %v4032_v19 }
 0x2db   : > { %6654 = shalt.err (!%p6651_p8)
}
 0x2dc   : > { %s6655_s26 = scalar_lea.hbm %s7531_s15, 32  ;;  %s6659_s27 = scalar_lea.hbm %s7612_s6, 64 }
 0x2dd   : > { %p6656_p11 = scmp.ne.s32.totalorder %s7531_s15, %s6655_s26  ;;  %p6660_p7 = scmp.lt.u32.totalorder %s7531_s15, %s7612_s6 }
 0x2de   : > { %p6661_p9 = scmp.lt.u32.totalorder %s6659_s27, %s6655_s26  ;;  %p6663_p1 = scmp.lt.u32.totalorder %s6655_s26, %s7531_s15 }
 0x2df   : > { %p6657_p2 = pnand %p6656_p11, %p7627_p0 }
 0x2e0   : > { %p6662_p12 = por %p6661_p9, %p6660_p7 }
 0x2e1   : > { %p6658_p3 = pneg %p6657_p2 }
 0x2e2   : > { %p6664_p13 = por %p6663_p1, %p6662_p12 }
 0x2e4   : > { %p6665_p6 = pnand %p6664_p13, %p6658_p3 }
 0x2e6   : > { %6668 = shalt.err (!%p6665_p6)
}
 0x2e7   : > { %6328 = dma.vmem_to_hbm [thread:$0]  (%p7627_p0), %s7533_s11, 32, %s7531_s15, %s4591_s19  }
 0x2e8   : > { %s6669_s14 = scalar_lea.vmem %s7540_s29, 32  ;;  %s6760_s30 = smov [#allocation13]  }
 0x2e9   : > { %p6670_p10 = scmp.ne.s32.totalorder %s7540_s29, %s6669_s14  ;;  %s6673_s10 = sshll.u32 %s6760_s30, 4  ;;  %s6674_s10 = int_to_ptr.vmem [resolvable:$false] %s6673_s10 }
 0x2ea   : > { %s6675_s7 = scalar_lea.vmem %s6674_s10, 64  ;;  %p6676_p8 = scmp.lt.s32.totalorder %s7540_s29, %s6674_s10 }
 0x2eb   : > { %p6671_p4 = pnand %p6670_p10, %p7627_p0  ;;  %p6677_p11 = scmp.lt.s32.totalorder %s6675_s7, %s6669_s14 }
 0x2ed   : > { %p6672_p5 = pneg %p6671_p4  ;;  %p6678_p2 = por %p6677_p11, %p6676_p8 }
 0x2ef   : > { %p6679_p3 = pnand %p6678_p2, %p6672_p5 }
 0x2f1   : > { %6682 = shalt.err (!%p6679_p3)
}
 0x2f2   : > { %s6683_s11 = scalar_lea.hbm %s7538_s20, 32  ;;  %s6687_s26 = scalar_lea.hbm %s7611_s5, 64 }
 0x2f3   : > { %p6684_p7 = scmp.ne.s32.totalorder %s7538_s20, %s6683_s11  ;;  %p6688_p1 = scmp.lt.u32.totalorder %s7538_s20, %s7611_s5 }
 0x2f4   : > { %p6689_p13 = scmp.lt.u32.totalorder %s6687_s26, %s6683_s11  ;;  %p6691_p10 = scmp.lt.u32.totalorder %s6683_s11, %s7538_s20 }
 0x2f5   : > { %p6685_p9 = pnand %p6684_p7, %p7627_p0 }
 0x2f6   : > { %p6690_p6 = por %p6689_p13, %p6688_p1 }
 0x2f7   : > { %p6686_p12 = pneg %p6685_p9 }
 0x2f8   : > { %p6692_p4 = por %p6691_p10, %p6690_p6 }
 0x2fa   : > { %p6693_p5 = pnand %p6692_p4, %p6686_p12 }
 0x2fc   : > { %6696 = shalt.err (!%p6693_p5)
}
 0x2fd   : > { %6327 = dma.vmem_to_hbm [thread:$0]  (%p7627_p0), %s7540_s29, 32, %s7538_s20, %s7465_s9  }
 0x2fe PF: > { %s4661_s27 = sand.u32 1, %s6735_s21   ;;  %p7628_p8 = scmp.ne.s32.totalorder %s7618_s28, 0 }
 0x2ff   : > { %p7629_p11 = scmp.ge.s32.totalorder %s6747_s24, 2  ;;  %s4662_s25 = scalar_lea.sflag [#allocation6], %s4661_s27 }
 0x301   : > { %p6345_p2 = pnand %p7629_p11, %p7628_p8 }
 0x303   : > { %6722 = dma.done.wait (!%p6345_p2), %s4662_s25, 2048  }
 0x304   : > { %6724 = vsyncadd (!%p6345_p2), %s4662_s25, 4294965248  ;;  %s7630_s17 = sadd.s32 4294967294, %s6747_s24  }
 0x305   : > { %s4670_s14 = sand.u32 1, %s7630_s17  }
 0x306   : > { %s4671_s30 = scalar_lea.sflag [#allocation12], %s4670_s14 }
 0x307   : > { %6726 = dma.done.wait (!%p6345_p2), %s4671_s30, 2080  }
 0x308   : > { %6728 = vsyncadd (!%p6345_p2), %s4671_s30, 4294965216  ;;  %s4689_s12 = scalar_lea.sflag [#allocation15], %s4661_s27 }
 0x309   : > { %6730 = dma.done.wait (!%p6345_p2), %s4689_s12, 32  }
 0x30a   : > { %6732 = vsyncadd (!%p6345_p2), %s4689_s12, 4294967264  ;;  %p27_p0 = scmp.ge.s32.totalorder %s6914_s8, 4   ;;  %s7631_s21 = smov %s6739_s22 }
 0x30b   : > { %s7632_s22 = smov %s6743_s23  ;;  %s7633_s23 = smov %s6930_s13 }
 0x30c   : > { %s7634_s24 = smov %s6914_s8  ;;  %29 = sbr.rel (!%p27_p0) target bundleno = 10 (0xa), region = 145 }
 0x313   :  { %4694 = vsyncpa [#allocation5], 1 }
 0x314   :  { %4696 = vsyncpa [#allocation5 + $0x1], 1 }
 0x315   :  { %4697 = vsyncpa [#allocation8], 1 }
 0x316   :  { %4698 = vsyncpa [#allocation6], 1 }
 0x317   :  { %4700 = vsyncpa [#allocation6 + $0x1], 1 }
 0x318   :  { %4701 = vsyncpa [#allocation12], 1 }
 0x319   :  { %4703 = vsyncpa [#allocation12 + $0x1], 1 }
 0x31a   :  { %4704 = vsyncpa [#allocation15], 1 }
 0x31b   :  { %4706 = vsyncpa [#allocation15 + $0x1], 1 }

</bundles_post_ra>
